<compile_context>
chip_gen: v5e
topology: v5e:2x2
jax: 0.10.0
libtpu: 0.0.40
codegen_flags: <defaults>
</compile_context>

<pallas_src>
import functools
import math

import jax
import jax.numpy as jnp
from jax.experimental import pallas as pl
from jax.experimental.pallas import tpu as pltpu


# ----------------------------- kernel helpers -----------------------------

def _eye_mask(n):
    r = jax.lax.broadcasted_iota(jnp.int32, (n, n), 0)
    c = jax.lax.broadcasted_iota(jnp.int32, (n, n), 1)
    return r == c


# ------------------------------ fused kernel -------------------------------

def fused_kernel(su_ref, so_ref, tu_ref, to_ref, w1_ref, w2_ref, w_ref,
                 slab_ref, loss_ref, *, flow_day):
    n = slab_ref.shape[1]
    dim = w_ref.shape[0]

    def avg_read(h_ref):
        # AvgRead: relu(max over embed dim).  Input (1, N, FEAT, EMB).
        # TODO(synk): batch dim assumed == 1 (the PyTorch module squeeze(0)s it).
        return jnp.maximum(jnp.max(h_ref[0], axis=-1), 0.0)          # (N, FEAT)

    su = avg_read(su_ref)
    so = avg_read(so_ref)
    tu = avg_read(tu_ref)
    to = avg_read(to_ref)

    # Symmetrize weights once: S @ Wsym @ S.T == ((S@W@S.T) + (S@W@S.T).T) / 2.
    w1s = (w1_ref[...] + w1_ref[...].T) * 0.5
    w2s = (w2_ref[...] + w2_ref[...].T) * 0.5
    ws = (w_ref[...] + w_ref[...].T) * 0.5

    mask = _eye_mask(n)

    def normalize(m):
        # (m - min) / (max - min); same no-guard behavior as the reference.
        mn = jnp.min(m)
        mx = jnp.max(m)
        inv = pl.reciprocal(jnp.reshape(mx - mn, (1, 1)), approx=True)
        return (m - mn) * inv

    # ------------------------------ spatial path ------------------------------
    sw_u = jnp.dot(su, w1s, preferred_element_type=jnp.float32)      # (N, FEAT)
    sw_o = jnp.dot(so, w2s, preferred_element_type=jnp.float32)      # (N, FEAT)
    cat_sw = jnp.concatenate([sw_u, sw_o], axis=0)                   # (2N, FEAT)
    cat_s = jnp.concatenate([su, so], axis=0)                        # (2N, FEAT)
    g = jax.lax.dot_general(cat_sw, cat_s,
                            dimension_numbers=(((1,), (1,)), ((), ())),
                            preferred_element_type=jnp.float32)      # (2N, 2N)
    mu = normalize(g[:n, :n])        # normalized heter_spatial_unmasked
    mo = normalize(g[n:, n:])        # normalized heter_spatial_origin

    # hu = mu + I - diag(mu);  ho = mo + I - diag(mu)   (PyTorch reuses diag(mu)!)
    # => hu == where(eye, 1, mu)  and  hu - ho == mu - mo everywhere.
    slab_ref[0] = jnp.where(mask, 1.0, mu)
    loss_s = jnp.mean(jnp.abs(mu - mo))

    # ------------------------------- time path --------------------------------
    cat_t = jnp.concatenate([tu, to], axis=0)                        # (2N, FEAT)
    abs_acc = jnp.zeros((n, n), jnp.float32)
    for d in range(flow_day):                                        # static unroll
        f = cat_t[:, d * dim:(d + 1) * dim]                          # (2N, DIM)
        fw = jnp.dot(f, ws, preferred_element_type=jnp.float32)      # (2N, DIM)
        gt = jax.lax.dot_general(fw, f,
                                 dimension_numbers=(((1,), (1,)), ((), ())),
                                 preferred_element_type=jnp.float32)  # (2N, 2N)
        mtu = normalize(gt[:n, :n])
        mto = normalize(gt[n:, n:])
        # hu_d = mtu + I - diag(mtu); ho_d uses its own diag => diff is off-diag only.
        slab_ref[1 + d] = jnp.where(mask, 1.0, mtu)
        abs_acc = abs_acc + jnp.abs(mtu - mto)
    loss_t = jnp.sum(jnp.where(mask, 0.0, abs_acc)) * (1.0 / float(n * n * flow_day))

    col = jax.lax.broadcasted_iota(jnp.int32, (1, 2), 1)
    loss_ref[...] = jnp.where(col == 0, loss_s, loss_t)


# ------------------------------ wrapper (glue) -----------------------------

def spatial_temporal_heter(params, spatial_unmasked, spatial_origin,
                           time_unmasked, time_origin, flow_day):
    # inputs: (1, num_nodes, feat_dim, embed_dim)  -- squeeze(0) requires batch == 1
    n = spatial_unmasked.shape[1]

    kernel = functools.partial(fused_kernel, flow_day=flow_day)
    slab, losses = pl.pallas_call(
        kernel,
        out_shape=(
            jax.ShapeDtypeStruct((flow_day + 1, n, n), jnp.float32),
            jax.ShapeDtypeStruct((1, 2), jnp.float32),
        ),
        in_specs=[pl.BlockSpec(memory_space=pltpu.MemorySpace.VMEM)] * 7,
        out_specs=(
            pl.BlockSpec(memory_space=pltpu.MemorySpace.VMEM),
            pl.BlockSpec(memory_space=pltpu.MemorySpace.VMEM),
        ),
    )(spatial_unmasked, spatial_origin, time_unmasked, time_origin,
      params["W1"], params["W2"], params["W"])

    hu_spatial = slab[0]
    # per-day matrices at slab[1 + d]; match torch.stack(dim=-1) -> (N, N, flow_day)
    hu_time = jnp.transpose(slab[1:], (1, 2, 0))
    return hu_spatial, hu_time, losses[0, 0], losses[0, 1]


# --------------------------- pure-JAX reference ----------------------------

def reference(params, su4, so4, tu4, to4, flow_day):
    def avg(h):
        return jnp.maximum(jnp.max(h, axis=3), 0.0)[0]

    def heter(s, w):
        m = s @ w @ s.T
        m = (m + m.T) / 2
        return (m - m.min()) / (m.max() - m.min())

    su, so, tu, to = avg(su4), avg(so4), avg(tu4), avg(to4)
    n = su.shape[0]
    mu = heter(su, params["W1"])
    mo = heter(so, params["W2"])
    eye = jnp.eye(n)
    du = jnp.diag(jnp.diag(mu))
    hu_s = mu + eye - du
    ho_s = mo + eye - du
    loss_s = jnp.mean(jnp.abs(hu_s - ho_s))

    def trasdim(t):
        dim = t.shape[1] // flow_day
        f = t.reshape(n, flow_day, dim)
        outs = []
        for i in range(flow_day):
            m = heter(f[:, i, :], params["W"])
            outs.append(m + jnp.eye(n) - jnp.diag(jnp.diag(m)))
        return jnp.stack(outs, axis=-1)

    hu_t = trasdim(tu)
    ho_t = trasdim(to)
    loss_t = jnp.mean(jnp.abs(hu_t - ho_t))
    return hu_s, hu_t, loss_s, loss_t


# ----------------------------------- main -----------------------------------

if __name__ == "__main__":
    key = jax.random.PRNGKey(0)
    N, FEAT, EMB, FLOW_DAY = 16, 32, 8, 4          # batch=1, num_nodes=16, feat_dim=32
    DIM = FEAT // FLOW_DAY
    ks = jax.random.split(key, 7)

    # deterministic synthetic parameters (shapes from __init__)
    bound = 1.0 / math.sqrt(FEAT)                  # kaiming_uniform(a=sqrt(5))-style bound
    params = {
        "W1": jax.random.uniform(ks[0], (FEAT, FEAT), jnp.float32, -bound, bound),
        "W2": jax.random.normal(ks[1], (FEAT, FEAT), jnp.float32),
        "W": jax.random.normal(ks[2], (DIM, DIM), jnp.float32),   # TransformerDim.W
    }

    spatial_unmasked = jax.random.normal(ks[3], (1, N, FEAT, EMB), jnp.float32)
    spatial_origin = jax.random.normal(ks[4], (1, N, FEAT, EMB), jnp.float32)
    time_unmasked = jax.random.normal(ks[5], (1, N, FEAT, EMB), jnp.float32)
    time_origin = jax.random.normal(ks[6], (1, N, FEAT, EMB), jnp.float32)

    fwd = jax.jit(spatial_temporal_heter, static_argnames="flow_day")
    outs = jax.block_until_ready(
        fwd(params, spatial_unmasked, spatial_origin,
            time_unmasked, time_origin, flow_day=FLOW_DAY))

    refs = reference(params, spatial_unmasked, spatial_origin,
                     time_unmasked, time_origin, FLOW_DAY)
    for o, r in zip(outs, refs):
        assert jnp.allclose(o, r, atol=5e-2, rtol=5e-2), float(jnp.max(jnp.abs(o - r)))

    print("KERNEL_OK")
</pallas_src>

<mosaic_0001>
module attributes {stable_mosaic.version = 11 : i64} {
  func.func @fused_kernel(%arg0: memref<1x16x32x8xf32, #tpu.memory_space<vmem>>, %arg1: memref<1x16x32x8xf32, #tpu.memory_space<vmem>>, %arg2: memref<1x16x32x8xf32, #tpu.memory_space<vmem>>, %arg3: memref<1x16x32x8xf32, #tpu.memory_space<vmem>>, %arg4: memref<32x32xf32, #tpu.memory_space<vmem>>, %arg5: memref<32x32xf32, #tpu.memory_space<vmem>>, %arg6: memref<8x8xf32, #tpu.memory_space<vmem>>, %arg7: memref<5x16x16xf32, #tpu.memory_space<vmem>>, %arg8: memref<1x2xf32, #tpu.memory_space<vmem>>) attributes {dimension_semantics = [], scalar_prefetch = 0 : i64, scratch_operands = 0 : i64, tpu.core_type = #tpu.core_type<tc>} {
    %c0 = arith.constant 0 : index
    %c0_0 = arith.constant 0 : index
    %c0_1 = arith.constant 0 : index
    %c0_2 = arith.constant 0 : index
    %0 = vector.load %arg0[%c0, %c0_0, %c0_1, %c0_2] : memref<1x16x32x8xf32, #tpu.memory_space<vmem>>, vector<1x16x32x8xf32>
    %1 = vector.shape_cast %0 : vector<1x16x32x8xf32> to vector<16x32x8xf32>
    %cst = arith.constant dense<0xFF800000> : vector<16x32xf32>
    %2 = vector.multi_reduction <maximumf>, %1, %cst [2] : vector<16x32x8xf32> to vector<16x32xf32>
    %cst_3 = arith.constant 0.000000e+00 : f32
    %3 = vector.broadcast %cst_3 : f32 to vector<16x32xf32>
    %4 = arith.maximumf %2, %3 : vector<16x32xf32>
    %c0_4 = arith.constant 0 : index
    %c0_5 = arith.constant 0 : index
    %c0_6 = arith.constant 0 : index
    %c0_7 = arith.constant 0 : index
    %5 = vector.load %arg1[%c0_4, %c0_5, %c0_6, %c0_7] : memref<1x16x32x8xf32, #tpu.memory_space<vmem>>, vector<1x16x32x8xf32>
    %6 = vector.shape_cast %5 : vector<1x16x32x8xf32> to vector<16x32x8xf32>
    %cst_8 = arith.constant dense<0xFF800000> : vector<16x32xf32>
    %7 = vector.multi_reduction <maximumf>, %6, %cst_8 [2] : vector<16x32x8xf32> to vector<16x32xf32>
    %cst_9 = arith.constant 0.000000e+00 : f32
    %8 = vector.broadcast %cst_9 : f32 to vector<16x32xf32>
    %9 = arith.maximumf %7, %8 : vector<16x32xf32>
    %c0_10 = arith.constant 0 : index
    %c0_11 = arith.constant 0 : index
    %c0_12 = arith.constant 0 : index
    %c0_13 = arith.constant 0 : index
    %10 = vector.load %arg2[%c0_10, %c0_11, %c0_12, %c0_13] : memref<1x16x32x8xf32, #tpu.memory_space<vmem>>, vector<1x16x32x8xf32>
    %11 = vector.shape_cast %10 : vector<1x16x32x8xf32> to vector<16x32x8xf32>
    %cst_14 = arith.constant dense<0xFF800000> : vector<16x32xf32>
    %12 = vector.multi_reduction <maximumf>, %11, %cst_14 [2] : vector<16x32x8xf32> to vector<16x32xf32>
    %cst_15 = arith.constant 0.000000e+00 : f32
    %13 = vector.broadcast %cst_15 : f32 to vector<16x32xf32>
    %14 = arith.maximumf %12, %13 : vector<16x32xf32>
    %c0_16 = arith.constant 0 : index
    %c0_17 = arith.constant 0 : index
    %c0_18 = arith.constant 0 : index
    %c0_19 = arith.constant 0 : index
    %15 = vector.load %arg3[%c0_16, %c0_17, %c0_18, %c0_19] : memref<1x16x32x8xf32, #tpu.memory_space<vmem>>, vector<1x16x32x8xf32>
    %16 = vector.shape_cast %15 : vector<1x16x32x8xf32> to vector<16x32x8xf32>
    %cst_20 = arith.constant dense<0xFF800000> : vector<16x32xf32>
    %17 = vector.multi_reduction <maximumf>, %16, %cst_20 [2] : vector<16x32x8xf32> to vector<16x32xf32>
    %cst_21 = arith.constant 0.000000e+00 : f32
    %18 = vector.broadcast %cst_21 : f32 to vector<16x32xf32>
    %19 = arith.maximumf %17, %18 : vector<16x32xf32>
    %c0_22 = arith.constant 0 : index
    %c0_23 = arith.constant 0 : index
    %20 = vector.load %arg4[%c0_22, %c0_23] : memref<32x32xf32, #tpu.memory_space<vmem>>, vector<32x32xf32>
    %c0_24 = arith.constant 0 : index
    %c0_25 = arith.constant 0 : index
    %21 = vector.load %arg4[%c0_24, %c0_25] : memref<32x32xf32, #tpu.memory_space<vmem>>, vector<32x32xf32>
    %22 = tpu.transpose %21, [1, 0] : vector<32x32xf32> -> vector<32x32xf32>
    %23 = arith.addf %20, %22 : vector<32x32xf32>
    %cst_26 = arith.constant 5.000000e-01 : f32
    %24 = vector.broadcast %cst_26 : f32 to vector<32x32xf32>
    %25 = arith.mulf %23, %24 : vector<32x32xf32>
    %c0_27 = arith.constant 0 : index
    %c0_28 = arith.constant 0 : index
    %26 = vector.load %arg5[%c0_27, %c0_28] : memref<32x32xf32, #tpu.memory_space<vmem>>, vector<32x32xf32>
    %c0_29 = arith.constant 0 : index
    %c0_30 = arith.constant 0 : index
    %27 = vector.load %arg5[%c0_29, %c0_30] : memref<32x32xf32, #tpu.memory_space<vmem>>, vector<32x32xf32>
    %28 = tpu.transpose %27, [1, 0] : vector<32x32xf32> -> vector<32x32xf32>
    %29 = arith.addf %26, %28 : vector<32x32xf32>
    %cst_31 = arith.constant 5.000000e-01 : f32
    %30 = vector.broadcast %cst_31 : f32 to vector<32x32xf32>
    %31 = arith.mulf %29, %30 : vector<32x32xf32>
    %c0_32 = arith.constant 0 : index
    %c0_33 = arith.constant 0 : index
    %32 = vector.load %arg6[%c0_32, %c0_33] : memref<8x8xf32, #tpu.memory_space<vmem>>, vector<8x8xf32>
    %c0_34 = arith.constant 0 : index
    %c0_35 = arith.constant 0 : index
    %33 = vector.load %arg6[%c0_34, %c0_35] : memref<8x8xf32, #tpu.memory_space<vmem>>, vector<8x8xf32>
    %34 = tpu.transpose %33, [1, 0] : vector<8x8xf32> -> vector<8x8xf32>
    %35 = arith.addf %32, %34 : vector<8x8xf32>
    %cst_36 = arith.constant 5.000000e-01 : f32
    %36 = vector.broadcast %cst_36 : f32 to vector<8x8xf32>
    %37 = arith.mulf %35, %36 : vector<8x8xf32>
    %38 = tpu.iota {dimensions = array<i32: 0>} : vector<16x16xi32>
    %39 = tpu.iota {dimensions = array<i32: 1>} : vector<16x16xi32>
    %40 = arith.cmpi eq, %38, %39 : vector<16x16xi32>
    %cst_37 = arith.constant dense<0.000000e+00> : vector<16x32xf32>
    %41 = tpu.matmul %4, %25, %cst_37 {dimension_numbers = #tpu.dot_dimension_numbers<[1], [0], [0], [1], [0, 0, 1, 1], [], []>} : vector<16x32xf32>, vector<32x32xf32>, vector<16x32xf32> -> vector<16x32xf32>
    %cst_38 = arith.constant dense<0.000000e+00> : vector<16x32xf32>
    %42 = tpu.matmul %9, %31, %cst_38 {dimension_numbers = #tpu.dot_dimension_numbers<[1], [0], [0], [1], [0, 0, 1, 1], [], []>} : vector<16x32xf32>, vector<32x32xf32>, vector<16x32xf32> -> vector<16x32xf32>
    %43 = tpu.concatenate %41, %42 in 0 : vector<16x32xf32>, vector<16x32xf32> -> vector<32x32xf32>
    %44 = tpu.concatenate %4, %9 in 0 : vector<16x32xf32>, vector<16x32xf32> -> vector<32x32xf32>
    %cst_39 = arith.constant dense<0.000000e+00> : vector<32x32xf32>
    %45 = tpu.matmul %43, %44, %cst_39 {dimension_numbers = #tpu.dot_dimension_numbers<[1], [1], [0], [0], [0, 0, 1, 0], [], []>} : vector<32x32xf32>, vector<32x32xf32>, vector<32x32xf32> -> vector<32x32xf32>
    %46 = vector.extract_strided_slice %45 {offsets = [0, 0], sizes = [16, 16], strides = [1, 1]} : vector<32x32xf32> to vector<16x16xf32>
    %47 = vector.shape_cast %46 : vector<16x16xf32> to vector<1x16x16xf32>
    %cst_40 = arith.constant dense<0x7F800000> : vector<1xf32>
    %48 = vector.multi_reduction <minimumf>, %47, %cst_40 [1, 2] : vector<1x16x16xf32> to vector<1xf32>
    %49 = vector.shape_cast %48 : vector<1xf32> to vector<1x1x1xf32>
    %50 = vector.extract %49[0, 0, 0] : f32 from vector<1x1x1xf32>
    %51 = vector.shape_cast %46 : vector<16x16xf32> to vector<1x16x16xf32>
    %cst_41 = arith.constant dense<0xFF800000> : vector<1xf32>
    %52 = vector.multi_reduction <maximumf>, %51, %cst_41 [1, 2] : vector<1x16x16xf32> to vector<1xf32>
    %53 = vector.shape_cast %52 : vector<1xf32> to vector<1x1x1xf32>
    %54 = vector.extract %53[0, 0, 0] : f32 from vector<1x1x1xf32>
    %55 = arith.subf %54, %50 : f32
    %56 = vector.broadcast %55 : f32 to vector<1x1xf32>
    %57 = tpu.reciprocal %56 {approx = true} : vector<1x1xf32> -> vector<1x1xf32>
    %58 = vector.broadcast %50 : f32 to vector<16x16xf32>
    %59 = arith.subf %46, %58 : vector<16x16xf32>
    %60 = vector.broadcast %57 : vector<1x1xf32> to vector<16x16xf32>
    %61 = arith.mulf %59, %60 : vector<16x16xf32>
    %62 = vector.extract_strided_slice %45 {offsets = [16, 16], sizes = [16, 16], strides = [1, 1]} : vector<32x32xf32> to vector<16x16xf32>
    %63 = vector.shape_cast %62 : vector<16x16xf32> to vector<1x16x16xf32>
    %cst_42 = arith.constant dense<0x7F800000> : vector<1xf32>
    %64 = vector.multi_reduction <minimumf>, %63, %cst_42 [1, 2] : vector<1x16x16xf32> to vector<1xf32>
    %65 = vector.shape_cast %64 : vector<1xf32> to vector<1x1x1xf32>
    %66 = vector.extract %65[0, 0, 0] : f32 from vector<1x1x1xf32>
    %67 = vector.shape_cast %62 : vector<16x16xf32> to vector<1x16x16xf32>
    %cst_43 = arith.constant dense<0xFF800000> : vector<1xf32>
    %68 = vector.multi_reduction <maximumf>, %67, %cst_43 [1, 2] : vector<1x16x16xf32> to vector<1xf32>
    %69 = vector.shape_cast %68 : vector<1xf32> to vector<1x1x1xf32>
    %70 = vector.extract %69[0, 0, 0] : f32 from vector<1x1x1xf32>
    %71 = arith.subf %70, %66 : f32
    %72 = vector.broadcast %71 : f32 to vector<1x1xf32>
    %73 = tpu.reciprocal %72 {approx = true} : vector<1x1xf32> -> vector<1x1xf32>
    %74 = vector.broadcast %66 : f32 to vector<16x16xf32>
    %75 = arith.subf %62, %74 : vector<16x16xf32>
    %76 = vector.broadcast %73 : vector<1x1xf32> to vector<16x16xf32>
    %77 = arith.mulf %75, %76 : vector<16x16xf32>
    %cst_44 = arith.constant 1.000000e+00 : f32
    %78 = vector.broadcast %cst_44 : f32 to vector<16x16xf32>
    %79 = arith.select %40, %78, %61 : vector<16x16xi1>, vector<16x16xf32>
    %c0_45 = arith.constant 0 : index
    %c0_46 = arith.constant 0 : index
    %c0_47 = arith.constant 0 : index
    %80 = vector.load %arg7[%c0_45, %c0_46, %c0_47] : memref<5x16x16xf32, #tpu.memory_space<vmem>>, vector<1x16x16xf32>
    %81 = vector.shape_cast %80 : vector<1x16x16xf32> to vector<16x16xf32>
    %82 = vector.shape_cast %79 : vector<16x16xf32> to vector<1x16x16xf32>
    tpu.vector_store %arg7[%c0_45, %c0_46, %c0_47], %82 {strides = array<i32>} : memref<5x16x16xf32, #tpu.memory_space<vmem>>, vector<1x16x16xf32>,
    %83 = arith.subf %61, %77 : vector<16x16xf32>
    %84 = math.absf %83 : vector<16x16xf32>
    %85 = vector.shape_cast %84 : vector<16x16xf32> to vector<1x16x16xf32>
    %cst_48 = arith.constant dense<0.000000e+00> : vector<1xf32>
    %86 = vector.multi_reduction <add>, %85, %cst_48 [1, 2] : vector<1x16x16xf32> to vector<1xf32>
    %87 = vector.shape_cast %86 : vector<1xf32> to vector<1x1x1xf32>
    %88 = vector.extract %87[0, 0, 0] : f32 from vector<1x1x1xf32>
    %cst_49 = arith.constant 2.560000e+02 : f32
    %89 = arith.divf %88, %cst_49 : f32
    %90 = tpu.concatenate %14, %19 in 0 : vector<16x32xf32>, vector<16x32xf32> -> vector<32x32xf32>
    %cst_50 = arith.constant 0.000000e+00 : f32
    %91 = vector.broadcast %cst_50 : f32 to vector<16x16xf32>
    %92 = vector.extract_strided_slice %90 {offsets = [0, 0], sizes = [32, 8], strides = [1, 1]} : vector<32x32xf32> to vector<32x8xf32>
    %cst_51 = arith.constant dense<0.000000e+00> : vector<32x8xf32>
    %93 = tpu.matmul %92, %37, %cst_51 {dimension_numbers = #tpu.dot_dimension_numbers<[1], [0], [0], [1], [0, 0, 1, 1], [], []>} : vector<32x8xf32>, vector<8x8xf32>, vector<32x8xf32> -> vector<32x8xf32>
    %cst_52 = arith.constant dense<0.000000e+00> : vector<32x32xf32>
    %94 = tpu.matmul %93, %92, %cst_52 {dimension_numbers = #tpu.dot_dimension_numbers<[1], [1], [0], [0], [0, 0, 1, 0], [], []>} : vector<32x8xf32>, vector<32x8xf32>, vector<32x32xf32> -> vector<32x32xf32>
    %95 = vector.extract_strided_slice %94 {offsets = [0, 0], sizes = [16, 16], strides = [1, 1]} : vector<32x32xf32> to vector<16x16xf32>
    %96 = vector.shape_cast %95 : vector<16x16xf32> to vector<1x16x16xf32>
    %cst_53 = arith.constant dense<0x7F800000> : vector<1xf32>
    %97 = vector.multi_reduction <minimumf>, %96, %cst_53 [1, 2] : vector<1x16x16xf32> to vector<1xf32>
    %98 = vector.shape_cast %97 : vector<1xf32> to vector<1x1x1xf32>
    %99 = vector.extract %98[0, 0, 0] : f32 from vector<1x1x1xf32>
    %100 = vector.shape_cast %95 : vector<16x16xf32> to vector<1x16x16xf32>
    %cst_54 = arith.constant dense<0xFF800000> : vector<1xf32>
    %101 = vector.multi_reduction <maximumf>, %100, %cst_54 [1, 2] : vector<1x16x16xf32> to vector<1xf32>
    %102 = vector.shape_cast %101 : vector<1xf32> to vector<1x1x1xf32>
    %103 = vector.extract %102[0, 0, 0] : f32 from vector<1x1x1xf32>
    %104 = arith.subf %103, %99 : f32
    %105 = vector.broadcast %104 : f32 to vector<1x1xf32>
    %106 = tpu.reciprocal %105 {approx = true} : vector<1x1xf32> -> vector<1x1xf32>
    %107 = vector.broadcast %99 : f32 to vector<16x16xf32>
    %108 = arith.subf %95, %107 : vector<16x16xf32>
    %109 = vector.broadcast %106 : vector<1x1xf32> to vector<16x16xf32>
    %110 = arith.mulf %108, %109 : vector<16x16xf32>
    %111 = vector.extract_strided_slice %94 {offsets = [16, 16], sizes = [16, 16], strides = [1, 1]} : vector<32x32xf32> to vector<16x16xf32>
    %112 = vector.shape_cast %111 : vector<16x16xf32> to vector<1x16x16xf32>
    %cst_55 = arith.constant dense<0x7F800000> : vector<1xf32>
    %113 = vector.multi_reduction <minimumf>, %112, %cst_55 [1, 2] : vector<1x16x16xf32> to vector<1xf32>
    %114 = vector.shape_cast %113 : vector<1xf32> to vector<1x1x1xf32>
    %115 = vector.extract %114[0, 0, 0] : f32 from vector<1x1x1xf32>
    %116 = vector.shape_cast %111 : vector<16x16xf32> to vector<1x16x16xf32>
    %cst_56 = arith.constant dense<0xFF800000> : vector<1xf32>
    %117 = vector.multi_reduction <maximumf>, %116, %cst_56 [1, 2] : vector<1x16x16xf32> to vector<1xf32>
    %118 = vector.shape_cast %117 : vector<1xf32> to vector<1x1x1xf32>
    %119 = vector.extract %118[0, 0, 0] : f32 from vector<1x1x1xf32>
    %120 = arith.subf %119, %115 : f32
    %121 = vector.broadcast %120 : f32 to vector<1x1xf32>
    %122 = tpu.reciprocal %121 {approx = true} : vector<1x1xf32> -> vector<1x1xf32>
    %123 = vector.broadcast %115 : f32 to vector<16x16xf32>
    %124 = arith.subf %111, %123 : vector<16x16xf32>
    %125 = vector.broadcast %122 : vector<1x1xf32> to vector<16x16xf32>
    %126 = arith.mulf %124, %125 : vector<16x16xf32>
    %cst_57 = arith.constant 1.000000e+00 : f32
    %127 = vector.broadcast %cst_57 : f32 to vector<16x16xf32>
    %128 = arith.select %40, %127, %110 : vector<16x16xi1>, vector<16x16xf32>
    %c1 = arith.constant 1 : index
    %c0_58 = arith.constant 0 : index
    %c0_59 = arith.constant 0 : index
    %129 = vector.load %arg7[%c1, %c0_58, %c0_59] : memref<5x16x16xf32, #tpu.memory_space<vmem>>, vector<1x16x16xf32>
    %130 = vector.shape_cast %129 : vector<1x16x16xf32> to vector<16x16xf32>
    %131 = vector.shape_cast %128 : vector<16x16xf32> to vector<1x16x16xf32>
    tpu.vector_store %arg7[%c1, %c0_58, %c0_59], %131 {strides = array<i32>} : memref<5x16x16xf32, #tpu.memory_space<vmem>>, vector<1x16x16xf32>,
    %132 = arith.subf %110, %126 : vector<16x16xf32>
    %133 = math.absf %132 : vector<16x16xf32>
    %134 = arith.addf %91, %133 : vector<16x16xf32>
    %135 = vector.extract_strided_slice %90 {offsets = [0, 8], sizes = [32, 8], strides = [1, 1]} : vector<32x32xf32> to vector<32x8xf32>
    %cst_60 = arith.constant dense<0.000000e+00> : vector<32x8xf32>
    %136 = tpu.matmul %135, %37, %cst_60 {dimension_numbers = #tpu.dot_dimension_numbers<[1], [0], [0], [1], [0, 0, 1, 1], [], []>} : vector<32x8xf32>, vector<8x8xf32>, vector<32x8xf32> -> vector<32x8xf32>
    %cst_61 = arith.constant dense<0.000000e+00> : vector<32x32xf32>
    %137 = tpu.matmul %136, %135, %cst_61 {dimension_numbers = #tpu.dot_dimension_numbers<[1], [1], [0], [0], [0, 0, 1, 0], [], []>} : vector<32x8xf32>, vector<32x8xf32>, vector<32x32xf32> -> vector<32x32xf32>
    %138 = vector.extract_strided_slice %137 {offsets = [0, 0], sizes = [16, 16], strides = [1, 1]} : vector<32x32xf32> to vector<16x16xf32>
    %139 = vector.shape_cast %138 : vector<16x16xf32> to vector<1x16x16xf32>
    %cst_62 = arith.constant dense<0x7F800000> : vector<1xf32>
    %140 = vector.multi_reduction <minimumf>, %139, %cst_62 [1, 2] : vector<1x16x16xf32> to vector<1xf32>
    %141 = vector.shape_cast %140 : vector<1xf32> to vector<1x1x1xf32>
    %142 = vector.extract %141[0, 0, 0] : f32 from vector<1x1x1xf32>
    %143 = vector.shape_cast %138 : vector<16x16xf32> to vector<1x16x16xf32>
    %cst_63 = arith.constant dense<0xFF800000> : vector<1xf32>
    %144 = vector.multi_reduction <maximumf>, %143, %cst_63 [1, 2] : vector<1x16x16xf32> to vector<1xf32>
    %145 = vector.shape_cast %144 : vector<1xf32> to vector<1x1x1xf32>
    %146 = vector.extract %145[0, 0, 0] : f32 from vector<1x1x1xf32>
    %147 = arith.subf %146, %142 : f32
    %148 = vector.broadcast %147 : f32 to vector<1x1xf32>
    %149 = tpu.reciprocal %148 {approx = true} : vector<1x1xf32> -> vector<1x1xf32>
    %150 = vector.broadcast %142 : f32 to vector<16x16xf32>
    %151 = arith.subf %138, %150 : vector<16x16xf32>
    %152 = vector.broadcast %149 : vector<1x1xf32> to vector<16x16xf32>
    %153 = arith.mulf %151, %152 : vector<16x16xf32>
    %154 = vector.extract_strided_slice %137 {offsets = [16, 16], sizes = [16, 16], strides = [1, 1]} : vector<32x32xf32> to vector<16x16xf32>
    %155 = vector.shape_cast %154 : vector<16x16xf32> to vector<1x16x16xf32>
    %cst_64 = arith.constant dense<0x7F800000> : vector<1xf32>
    %156 = vector.multi_reduction <minimumf>, %155, %cst_64 [1, 2] : vector<1x16x16xf32> to vector<1xf32>
    %157 = vector.shape_cast %156 : vector<1xf32> to vector<1x1x1xf32>
    %158 = vector.extract %157[0, 0, 0] : f32 from vector<1x1x1xf32>
    %159 = vector.shape_cast %154 : vector<16x16xf32> to vector<1x16x16xf32>
    %cst_65 = arith.constant dense<0xFF800000> : vector<1xf32>
    %160 = vector.multi_reduction <maximumf>, %159, %cst_65 [1, 2] : vector<1x16x16xf32> to vector<1xf32>
    %161 = vector.shape_cast %160 : vector<1xf32> to vector<1x1x1xf32>
    %162 = vector.extract %161[0, 0, 0] : f32 from vector<1x1x1xf32>
    %163 = arith.subf %162, %158 : f32
    %164 = vector.broadcast %163 : f32 to vector<1x1xf32>
    %165 = tpu.reciprocal %164 {approx = true} : vector<1x1xf32> -> vector<1x1xf32>
    %166 = vector.broadcast %158 : f32 to vector<16x16xf32>
    %167 = arith.subf %154, %166 : vector<16x16xf32>
    %168 = vector.broadcast %165 : vector<1x1xf32> to vector<16x16xf32>
    %169 = arith.mulf %167, %168 : vector<16x16xf32>
    %cst_66 = arith.constant 1.000000e+00 : f32
    %170 = vector.broadcast %cst_66 : f32 to vector<16x16xf32>
    %171 = arith.select %40, %170, %153 : vector<16x16xi1>, vector<16x16xf32>
    %c2 = arith.constant 2 : index
    %c0_67 = arith.constant 0 : index
    %c0_68 = arith.constant 0 : index
    %172 = vector.load %arg7[%c2, %c0_67, %c0_68] : memref<5x16x16xf32, #tpu.memory_space<vmem>>, vector<1x16x16xf32>
    %173 = vector.shape_cast %172 : vector<1x16x16xf32> to vector<16x16xf32>
    %174 = vector.shape_cast %171 : vector<16x16xf32> to vector<1x16x16xf32>
    tpu.vector_store %arg7[%c2, %c0_67, %c0_68], %174 {strides = array<i32>} : memref<5x16x16xf32, #tpu.memory_space<vmem>>, vector<1x16x16xf32>,
    %175 = arith.subf %153, %169 : vector<16x16xf32>
    %176 = math.absf %175 : vector<16x16xf32>
    %177 = arith.addf %134, %176 : vector<16x16xf32>
    %178 = vector.extract_strided_slice %90 {offsets = [0, 16], sizes = [32, 8], strides = [1, 1]} : vector<32x32xf32> to vector<32x8xf32>
    %cst_69 = arith.constant dense<0.000000e+00> : vector<32x8xf32>
    %179 = tpu.matmul %178, %37, %cst_69 {dimension_numbers = #tpu.dot_dimension_numbers<[1], [0], [0], [1], [0, 0, 1, 1], [], []>} : vector<32x8xf32>, vector<8x8xf32>, vector<32x8xf32> -> vector<32x8xf32>
    %cst_70 = arith.constant dense<0.000000e+00> : vector<32x32xf32>
    %180 = tpu.matmul %179, %178, %cst_70 {dimension_numbers = #tpu.dot_dimension_numbers<[1], [1], [0], [0], [0, 0, 1, 0], [], []>} : vector<32x8xf32>, vector<32x8xf32>, vector<32x32xf32> -> vector<32x32xf32>
    %181 = vector.extract_strided_slice %180 {offsets = [0, 0], sizes = [16, 16], strides = [1, 1]} : vector<32x32xf32> to vector<16x16xf32>
    %182 = vector.shape_cast %181 : vector<16x16xf32> to vector<1x16x16xf32>
    %cst_71 = arith.constant dense<0x7F800000> : vector<1xf32>
    %183 = vector.multi_reduction <minimumf>, %182, %cst_71 [1, 2] : vector<1x16x16xf32> to vector<1xf32>
    %184 = vector.shape_cast %183 : vector<1xf32> to vector<1x1x1xf32>
    %185 = vector.extract %184[0, 0, 0] : f32 from vector<1x1x1xf32>
    %186 = vector.shape_cast %181 : vector<16x16xf32> to vector<1x16x16xf32>
    %cst_72 = arith.constant dense<0xFF800000> : vector<1xf32>
    %187 = vector.multi_reduction <maximumf>, %186, %cst_72 [1, 2] : vector<1x16x16xf32> to vector<1xf32>
    %188 = vector.shape_cast %187 : vector<1xf32> to vector<1x1x1xf32>
    %189 = vector.extract %188[0, 0, 0] : f32 from vector<1x1x1xf32>
    %190 = arith.subf %189, %185 : f32
    %191 = vector.broadcast %190 : f32 to vector<1x1xf32>
    %192 = tpu.reciprocal %191 {approx = true} : vector<1x1xf32> -> vector<1x1xf32>
    %193 = vector.broadcast %185 : f32 to vector<16x16xf32>
    %194 = arith.subf %181, %193 : vector<16x16xf32>
    %195 = vector.broadcast %192 : vector<1x1xf32> to vector<16x16xf32>
    %196 = arith.mulf %194, %195 : vector<16x16xf32>
    %197 = vector.extract_strided_slice %180 {offsets = [16, 16], sizes = [16, 16], strides = [1, 1]} : vector<32x32xf32> to vector<16x16xf32>
    %198 = vector.shape_cast %197 : vector<16x16xf32> to vector<1x16x16xf32>
    %cst_73 = arith.constant dense<0x7F800000> : vector<1xf32>
    %199 = vector.multi_reduction <minimumf>, %198, %cst_73 [1, 2] : vector<1x16x16xf32> to vector<1xf32>
    %200 = vector.shape_cast %199 : vector<1xf32> to vector<1x1x1xf32>
    %201 = vector.extract %200[0, 0, 0] : f32 from vector<1x1x1xf32>
    %202 = vector.shape_cast %197 : vector<16x16xf32> to vector<1x16x16xf32>
    %cst_74 = arith.constant dense<0xFF800000> : vector<1xf32>
    %203 = vector.multi_reduction <maximumf>, %202, %cst_74 [1, 2] : vector<1x16x16xf32> to vector<1xf32>
    %204 = vector.shape_cast %203 : vector<1xf32> to vector<1x1x1xf32>
    %205 = vector.extract %204[0, 0, 0] : f32 from vector<1x1x1xf32>
    %206 = arith.subf %205, %201 : f32
    %207 = vector.broadcast %206 : f32 to vector<1x1xf32>
    %208 = tpu.reciprocal %207 {approx = true} : vector<1x1xf32> -> vector<1x1xf32>
    %209 = vector.broadcast %201 : f32 to vector<16x16xf32>
    %210 = arith.subf %197, %209 : vector<16x16xf32>
    %211 = vector.broadcast %208 : vector<1x1xf32> to vector<16x16xf32>
    %212 = arith.mulf %210, %211 : vector<16x16xf32>
    %cst_75 = arith.constant 1.000000e+00 : f32
    %213 = vector.broadcast %cst_75 : f32 to vector<16x16xf32>
    %214 = arith.select %40, %213, %196 : vector<16x16xi1>, vector<16x16xf32>
    %c3 = arith.constant 3 : index
    %c0_76 = arith.constant 0 : index
    %c0_77 = arith.constant 0 : index
    %215 = vector.load %arg7[%c3, %c0_76, %c0_77] : memref<5x16x16xf32, #tpu.memory_space<vmem>>, vector<1x16x16xf32>
    %216 = vector.shape_cast %215 : vector<1x16x16xf32> to vector<16x16xf32>
    %217 = vector.shape_cast %214 : vector<16x16xf32> to vector<1x16x16xf32>
    tpu.vector_store %arg7[%c3, %c0_76, %c0_77], %217 {strides = array<i32>} : memref<5x16x16xf32, #tpu.memory_space<vmem>>, vector<1x16x16xf32>,
    %218 = arith.subf %196, %212 : vector<16x16xf32>
    %219 = math.absf %218 : vector<16x16xf32>
    %220 = arith.addf %177, %219 : vector<16x16xf32>
    %221 = vector.extract_strided_slice %90 {offsets = [0, 24], sizes = [32, 8], strides = [1, 1]} : vector<32x32xf32> to vector<32x8xf32>
    %cst_78 = arith.constant dense<0.000000e+00> : vector<32x8xf32>
    %222 = tpu.matmul %221, %37, %cst_78 {dimension_numbers = #tpu.dot_dimension_numbers<[1], [0], [0], [1], [0, 0, 1, 1], [], []>} : vector<32x8xf32>, vector<8x8xf32>, vector<32x8xf32> -> vector<32x8xf32>
    %cst_79 = arith.constant dense<0.000000e+00> : vector<32x32xf32>
    %223 = tpu.matmul %222, %221, %cst_79 {dimension_numbers = #tpu.dot_dimension_numbers<[1], [1], [0], [0], [0, 0, 1, 0], [], []>} : vector<32x8xf32>, vector<32x8xf32>, vector<32x32xf32> -> vector<32x32xf32>
    %224 = vector.extract_strided_slice %223 {offsets = [0, 0], sizes = [16, 16], strides = [1, 1]} : vector<32x32xf32> to vector<16x16xf32>
    %225 = vector.shape_cast %224 : vector<16x16xf32> to vector<1x16x16xf32>
    %cst_80 = arith.constant dense<0x7F800000> : vector<1xf32>
    %226 = vector.multi_reduction <minimumf>, %225, %cst_80 [1, 2] : vector<1x16x16xf32> to vector<1xf32>
    %227 = vector.shape_cast %226 : vector<1xf32> to vector<1x1x1xf32>
    %228 = vector.extract %227[0, 0, 0] : f32 from vector<1x1x1xf32>
    %229 = vector.shape_cast %224 : vector<16x16xf32> to vector<1x16x16xf32>
    %cst_81 = arith.constant dense<0xFF800000> : vector<1xf32>
    %230 = vector.multi_reduction <maximumf>, %229, %cst_81 [1, 2] : vector<1x16x16xf32> to vector<1xf32>
    %231 = vector.shape_cast %230 : vector<1xf32> to vector<1x1x1xf32>
    %232 = vector.extract %231[0, 0, 0] : f32 from vector<1x1x1xf32>
    %233 = arith.subf %232, %228 : f32
    %234 = vector.broadcast %233 : f32 to vector<1x1xf32>
    %235 = tpu.reciprocal %234 {approx = true} : vector<1x1xf32> -> vector<1x1xf32>
    %236 = vector.broadcast %228 : f32 to vector<16x16xf32>
    %237 = arith.subf %224, %236 : vector<16x16xf32>
    %238 = vector.broadcast %235 : vector<1x1xf32> to vector<16x16xf32>
    %239 = arith.mulf %237, %238 : vector<16x16xf32>
    %240 = vector.extract_strided_slice %223 {offsets = [16, 16], sizes = [16, 16], strides = [1, 1]} : vector<32x32xf32> to vector<16x16xf32>
    %241 = vector.shape_cast %240 : vector<16x16xf32> to vector<1x16x16xf32>
    %cst_82 = arith.constant dense<0x7F800000> : vector<1xf32>
    %242 = vector.multi_reduction <minimumf>, %241, %cst_82 [1, 2] : vector<1x16x16xf32> to vector<1xf32>
    %243 = vector.shape_cast %242 : vector<1xf32> to vector<1x1x1xf32>
    %244 = vector.extract %243[0, 0, 0] : f32 from vector<1x1x1xf32>
    %245 = vector.shape_cast %240 : vector<16x16xf32> to vector<1x16x16xf32>
    %cst_83 = arith.constant dense<0xFF800000> : vector<1xf32>
    %246 = vector.multi_reduction <maximumf>, %245, %cst_83 [1, 2] : vector<1x16x16xf32> to vector<1xf32>
    %247 = vector.shape_cast %246 : vector<1xf32> to vector<1x1x1xf32>
    %248 = vector.extract %247[0, 0, 0] : f32 from vector<1x1x1xf32>
    %249 = arith.subf %248, %244 : f32
    %250 = vector.broadcast %249 : f32 to vector<1x1xf32>
    %251 = tpu.reciprocal %250 {approx = true} : vector<1x1xf32> -> vector<1x1xf32>
    %252 = vector.broadcast %244 : f32 to vector<16x16xf32>
    %253 = arith.subf %240, %252 : vector<16x16xf32>
    %254 = vector.broadcast %251 : vector<1x1xf32> to vector<16x16xf32>
    %255 = arith.mulf %253, %254 : vector<16x16xf32>
    %cst_84 = arith.constant 1.000000e+00 : f32
    %256 = vector.broadcast %cst_84 : f32 to vector<16x16xf32>
    %257 = arith.select %40, %256, %239 : vector<16x16xi1>, vector<16x16xf32>
    %c4 = arith.constant 4 : index
    %c0_85 = arith.constant 0 : index
    %c0_86 = arith.constant 0 : index
    %258 = vector.load %arg7[%c4, %c0_85, %c0_86] : memref<5x16x16xf32, #tpu.memory_space<vmem>>, vector<1x16x16xf32>
    %259 = vector.shape_cast %258 : vector<1x16x16xf32> to vector<16x16xf32>
    %260 = vector.shape_cast %257 : vector<16x16xf32> to vector<1x16x16xf32>
    tpu.vector_store %arg7[%c4, %c0_85, %c0_86], %260 {strides = array<i32>} : memref<5x16x16xf32, #tpu.memory_space<vmem>>, vector<1x16x16xf32>,
    %261 = arith.subf %239, %255 : vector<16x16xf32>
    %262 = math.absf %261 : vector<16x16xf32>
    %263 = arith.addf %220, %262 : vector<16x16xf32>
    %cst_87 = arith.constant 0.000000e+00 : f32
    %264 = vector.broadcast %cst_87 : f32 to vector<16x16xf32>
    %265 = arith.select %40, %264, %263 : vector<16x16xi1>, vector<16x16xf32>
    %266 = vector.shape_cast %265 : vector<16x16xf32> to vector<1x16x16xf32>
    %cst_88 = arith.constant dense<0.000000e+00> : vector<1xf32>
    %267 = vector.multi_reduction <add>, %266, %cst_88 [1, 2] : vector<1x16x16xf32> to vector<1xf32>
    %268 = vector.shape_cast %267 : vector<1xf32> to vector<1x1x1xf32>
    %269 = vector.extract %268[0, 0, 0] : f32 from vector<1x1x1xf32>
    %cst_89 = arith.constant 9.765625E-4 : f32
    %270 = arith.mulf %269, %cst_89 : f32
    %271 = tpu.iota {dimensions = array<i32: 1>} : vector<1x2xi32>
    %c0_i32 = arith.constant 0 : i32
    %272 = vector.broadcast %c0_i32 : i32 to vector<1x2xi32>
    %273 = arith.cmpi eq, %271, %272 : vector<1x2xi32>
    %274 = vector.broadcast %89 : f32 to vector<1x2xf32>
    %275 = vector.broadcast %270 : f32 to vector<1x2xf32>
    %276 = arith.select %273, %274, %275 : vector<1x2xi1>, vector<1x2xf32>
    %c0_90 = arith.constant 0 : index
    %c0_91 = arith.constant 0 : index
    %277 = vector.load %arg8[%c0_90, %c0_91] : memref<1x2xf32, #tpu.memory_space<vmem>>, vector<1x2xf32>
    tpu.vector_store %arg8[%c0_90, %c0_91], %276 {strides = array<i32>} : memref<1x2xf32, #tpu.memory_space<vmem>>, vector<1x2xf32>,
    return
  }
}

</mosaic_0001>

<bundles_post_ra>
// kernel: spatial_temporal_heter.1
= control target key start
LH: loop header
LB: loop body
LE: loop exit
PB: predicated region body
PF: predicated region fallthrough
CT: control target
= control target key end

     0   :  { %vm92_vm0 = vcmask 64512   ;;  %vm1506_vm1 = vcmask 130112   ;;  %vm1510_vm2 = vcmask 195712   ;;  %vm1514_vm3 = vcmask 261312   ;;  %s5987_s5 = inlined_call_operand.vmem [shape: f32[32,32], index: 5, kind: input, shape index: {}]   ;;  %s5988_s4 = inlined_call_operand.vmem [shape: f32[32,32], index: 4, kind: input, shape index: {}]   ;;  %s5989_s0 = inlined_call_operand.vmem [shape: f32[1,16,32,8], index: 0, kind: input, shape index: {}]   ;;  %s5990_s1 = inlined_call_operand.vmem [shape: f32[1,16,32,8], index: 1, kind: input, shape index: {}]   ;;  %s5991_s2 = inlined_call_operand.vmem [shape: f32[1,16,32,8], index: 2, kind: input, shape index: {}]   ;;  %s5992_s3 = inlined_call_operand.vmem [shape: f32[1,16,32,8], index: 3, kind: input, shape index: {}]   ;;  %s5993_s6 = inlined_call_operand.vmem [shape: f32[8,8], index: 6, kind: input, shape index: {}]   ;;  %s5994_s7 = inlined_call_operand.vmem [shape: f32[5,16,16], index: 7, kind: output, shape index: {0}]   ;;  %s5995_s8 = inlined_call_operand.vmem [shape: f32[1,2], index: 8, kind: output, shape index: {1}]  }
   0x1   :  { %v3302_v0 = vld [vmem:[%s5987_s5] sm:$0xff]  ;;  %v30_v2 = vld [vmem:[%s5989_s0 + $0x10] sm:$0xff]  ;;  %v31_v4 = vld [vmem:[%s5989_s0 + $0x18] sm:$0xff]  ;;  %vm1621_vm4 = vcmask 1041409   ;;  %vm1623_vm5 = vcmask 1042434   ;;  %vm1625_vm6 = vcmask 1043459  }
   0x2   :  { %v3307_v1 = vld [vmem:[%s5988_s4] sm:$0xff]  ;;  %1357 = vxpose.xlu0.b32.start [1/4] (short) (narrow) %v3302_v0, 32  ;;  %v99_v3 = vsel %vm92_vm0, %v30_v2, -inf  ;;  %v3321_v5 = vld [vmem:[%s5987_s5 + $0x8] sm:$0xff]  ;;  %v102_v7 = vsel %vm92_vm0, %v31_v4, -inf  ;;  %v35_v8 = vld [vmem:[%s5989_s0 + $0x38] sm:$0xff] }
   0x3   :  { %1313 = vxpose.xlu2.b32.start [1/4] (short) (narrow) %v3307_v1, 32  ;;  %100 = vmax.xlane.f32.xlu1 %v99_v3  ;;  %v3326_v6 = vld [vmem:[%s5988_s4 + $0x8] sm:$0xff]  ;;  %v3337_v9 = vld [vmem:[%s5987_s5 + $0x10] sm:$0xff]  ;;  %v114_v11 = vsel %vm92_vm0, %v35_v8, -inf  ;;  %v3353_v13 = vld [vmem:[%s5987_s5 + $0x18] sm:$0xff]  ;;  %vm1627_vm7 = vcmask 1044484  }
   0x4   :  { %v3342_v10 = vld [vmem:[%s5988_s4 + $0x10] sm:$0xff]  ;;  %v3358_v14 = vld [vmem:[%s5988_s4 + $0x18] sm:$0xff]  ;;  %v41_v16 = vld [vmem:[%s5989_s0 + $0x68] sm:$0xff]  ;;  %vm1629_vm8 = vcmask 1045509   ;;  %vm1631_vm9 = vcmask 1046534   ;;  %vm1633_vm10 = vcmask 1047559  }
   0x5   :  { %v38_v12 = vld [vmem:[%s5989_s0 + $0x50] sm:$0xff]  ;;  %v132_v17 = vsel %vm92_vm0, %v41_v16, -inf  ;;  %v44_v18 = vld [vmem:[%s5989_s0 + $0x80] sm:$0xff]  ;;  %v47_v20 = vld [vmem:[%s5989_s0 + $0x98] sm:$0xff]  ;;  %vm1642_vm11 = vcmask 261120   ;;  %vm1928_vm12 = vcmask 130048  }
   0x6   :  { %v123_v15 = vsel %vm92_vm0, %v38_v12, -inf  ;;  %v141_v19 = vsel %vm92_vm0, %v44_v18, -inf  ;;  %v150_v21 = vsel %vm92_vm0, %v47_v20, -inf  ;;  %v50_v22 = vld [vmem:[%s5989_s0 + $0xb0] sm:$0xff]  ;;  %v53_v24 = vld [vmem:[%s5989_s0 + $0xc8] sm:$0xff]  ;;  %v56_v26 = vld [vmem:[%s5989_s0 + $0xe0] sm:$0xff] }
   0x7   :  { %v159_v23 = vsel %vm92_vm0, %v50_v22, -inf  ;;  %v168_v25 = vsel %vm92_vm0, %v53_v24, -inf  ;;  %v177_v27 = vsel %vm92_vm0, %v56_v26, -inf  ;;  %v59_v28 = vld [vmem:[%s5989_s0 + $0xf8] sm:$0xff]  ;;  %v62_v30 = vld [vmem:[%s5989_s0 + $0x110] sm:$0xff]  ;;  %v65_v32 = vld [vmem:[%s5989_s0 + $0x128] sm:$0xff] }
   0x8   :  { %v186_v29 = vsel %vm92_vm0, %v59_v28, -inf  ;;  %v195_v31 = vsel %vm92_vm0, %v62_v30, -inf  ;;  %v204_v33 = vsel %vm92_vm0, %v65_v32, -inf  ;;  %v68_v34 = vld [vmem:[%s5989_s0 + $0x140] sm:$0xff]  ;;  %v71_v36 = vld [vmem:[%s5989_s0 + $0x158] sm:$0xff]  ;;  %v74_v38 = vld [vmem:[%s5989_s0 + $0x170] sm:$0xff] }
   0x9   :  { %v213_v35 = vsel %vm92_vm0, %v68_v34, -inf  ;;  %v222_v37 = vsel %vm92_vm0, %v71_v36, -inf  ;;  %v231_v40 = vsel %vm92_vm0, %v74_v38, -inf  ;;  %v77_v41 = vld [vmem:[%s5989_s0 + $0x188] sm:$0xff]  ;;  %v32_v44 = vld [vmem:[%s5989_s0 + $0x20] sm:$0xff]  ;;  %v83_v52 = vld [vmem:[%s5989_s0 + $0x1b8] sm:$0xff] }
   0xa   :  { %1358 = vxpose.xlu0.b32.cont [2/4] (short) (narrow) %v3321_v5, 32  ;;  %v240_v43 = vsel %vm92_vm0, %v77_v41, -inf  ;;  %v80_v45 = vld [vmem:[%s5989_s0 + $0x1a0] sm:$0xff]  ;;  %v105_v48 = vsel %vm92_vm0, %v32_v44, -inf  ;;  %v33_v51 = vld [vmem:[%s5989_s0 + $0x28] sm:$0xff]  ;;  %v258_v56 = vsel %vm92_vm0, %v83_v52, -inf }
   0xb   :  { %1314 = vxpose.xlu2.b32.cont [2/4] (short) (narrow) %v3326_v6, 32  ;;  %103 = vmax.xlane.f32.xlu1 %v102_v7  ;;  %v28_v47 = vld [vmem:[%s5989_s0] sm:$0xff]  ;;  %v249_v49 = vsel %vm92_vm0, %v80_v45, -inf  ;;  %v29_v54 = vld [vmem:[%s5989_s0 + $0x8] sm:$0xff]  ;;  %v108_v55 = vsel %vm92_vm0, %v33_v51, -inf  ;;  %v86_v59 = vld [vmem:[%s5989_s0 + $0x1d0] sm:$0xff] }
   0xc   :  { %v93_v50 = vsel %vm92_vm0, %v28_v47, -inf  ;;  %v96_v57 = vsel %vm92_vm0, %v29_v54, -inf  ;;  %v36_v58 = vld [vmem:[%s5989_s0 + $0x40] sm:$0xff]  ;;  %v34_v61 = vld [vmem:[%s5989_s0 + $0x30] sm:$0xff]  ;;  %v267_v63 = vsel %vm92_vm0, %v86_v59, -inf  ;;  %v39_v3 = vld [vmem:[%s5989_s0 + $0x58] sm:$0xff] }
   0xd   :  { %v117_v62 = vsel %vm92_vm0, %v36_v58, -inf  ;;  %v111_v2 = vsel %vm92_vm0, %v34_v61, -inf  ;;  %v89_v4 = vld [vmem:[%s5989_s0 + $0x1e8] sm:$0xff]  ;;  %v42_v16 = vld [vmem:[%s5989_s0 + $0x70] sm:$0xff]  ;;  %v352_v24 = vld [vmem:[%s5990_s1 + $0x18] sm:$0xff]  ;;  %vm1961_vm13 = vcmask 261248  }
   0xe   :  { %v37_v8 = vld [vmem:[%s5989_s0 + $0x48] sm:$0xff]  ;;  %v276_v12 = vsel %vm92_vm0, %v89_v4, -inf  ;;  %v135_v20 = vsel %vm92_vm0, %v42_v16, -inf  ;;  %v43_v26 = vld [vmem:[%s5989_s0 + $0x78] sm:$0xff]  ;;  %v422_v28 = vsel %vm92_vm0, %v352_v24, -inf  ;;  %v48_v30 = vld [vmem:[%s5989_s0 + $0xa0] sm:$0xff] }
   0xf   :  { %v153_v34 = vsel %vm92_vm0, %v48_v30, -inf  ;;  %v358_v38 = vld [vmem:[%s5990_s1 + $0x48] sm:$0xff]  ;;  %v54_v47 = vld [vmem:[%s5989_s0 + $0xd0] sm:$0xff]  ;;  %v364_v58 = vld [vmem:[%s5990_s1 + $0x78] sm:$0xff] }
  0x10   :  { %v49_v41 = vld [vmem:[%s5989_s0 + $0xa8] sm:$0xff]  ;;  %v440_v44 = vsel %vm92_vm0, %v358_v38, -inf  ;;  %v171_v52 = vsel %vm92_vm0, %v54_v47, -inf  ;;  %v55_v61 = vld [vmem:[%s5989_s0 + $0xd8] sm:$0xff]  ;;  %v66_v30 = vld [vmem:[%s5989_s0 + $0x130] sm:$0xff] }
  0x11   :  { %v156_v45 = vsel %vm92_vm0, %v49_v41, -inf }
  0x12   :  { %1359 = vxpose.xlu0.b32.cont [3/4] (short) (narrow) %v3337_v9, 32 }
  0x13   :  { %1315 = vxpose.xlu2.b32.cont [3/4] (short) (narrow) %v3342_v10, 32  ;;  %115 = vmax.xlane.f32.xlu1 %v114_v11  ;;  %v126_v11 = vsel %vm92_vm0, %v39_v3, -inf }
  0x1a   :  { %1360 = vxpose.xlu0.b32.end [4/4] (short) (narrow) %v3353_v13, 32 }
  0x1b   :  { %1316 = vxpose.xlu2.b32.end [4/4] (short) (narrow) %v3358_v14, 32  ;;  %124 = vmax.xlane.f32.xlu1 %v123_v15  ;;  %v120_v15 = vsel %vm92_vm0, %v37_v8, -inf  ;;  %v60_v8 = vld [vmem:[%s5989_s0 + $0x100] sm:$0xff] }
  0x1c   :  { %v189_v16 = vsel %vm92_vm0, %v60_v8, -inf }
  0x23   :  { %133 = vmax.xlane.f32.xlu1 %v132_v17  ;;  %v349_v17 = vld [vmem:[%s5990_s1] sm:$0xff] }
  0x2b   :  { %142 = vmax.xlane.f32.xlu1 %v141_v19  ;;  %v40_v19 = vld [vmem:[%s5989_s0 + $0x60] sm:$0xff] }
  0x2c   :  { %v129_v22 = vsel %vm92_vm0, %v40_v19, -inf }
  0x33   :  { %151 = vmax.xlane.f32.xlu1 %v150_v21  ;;  %v413_v21 = vsel %vm92_vm0, %v349_v17, -inf }
  0x3b   :  { %160 = vmax.xlane.f32.xlu1 %v159_v23  ;;  %v45_v23 = vld [vmem:[%s5989_s0 + $0x88] sm:$0xff] }
  0x43   :  { %169 = vmax.xlane.f32.xlu1 %v168_v25 }
  0x4b   :  { %178 = vmax.xlane.f32.xlu1 %v177_v27  ;;  %v144_v27 = vsel %vm92_vm0, %v45_v23, -inf  ;;  %v370_v23 = vld [vmem:[%s5990_s1 + $0xa8] sm:$0xff] }
  0x53   :  { %187 = vmax.xlane.f32.xlu1 %v186_v29  ;;  %v138_v29 = vsel %vm92_vm0, %v43_v26, -inf  ;;  %v61_v26 = vld [vmem:[%s5989_s0 + $0x108] sm:$0xff] }
  0x5b   :  { %196 = vmax.xlane.f32.xlu1 %v195_v31  ;;  %v355_v31 = vld [vmem:[%s5990_s1 + $0x30] sm:$0xff] }
  0x63   :  { %205 = vmax.xlane.f32.xlu1 %v204_v33  ;;  %v46_v33 = vld [vmem:[%s5989_s0 + $0x90] sm:$0xff] }
  0x64   :  { %v147_v36 = vsel %vm92_vm0, %v46_v33, -inf }
  0x6b   :  { %214 = vmax.xlane.f32.xlu1 %v213_v35  ;;  %v431_v35 = vsel %vm92_vm0, %v355_v31, -inf  ;;  %v373_v31 = vld [vmem:[%s5990_s1 + $0xc0] sm:$0xff] }
  0x73   :  { %223 = vmax.xlane.f32.xlu1 %v222_v37  ;;  %v51_v37 = vld [vmem:[%s5989_s0 + $0xb8] sm:$0xff] }
  0x76   :  { %v3410_v39 = vpop.xlane.xlu1 %100 }
  0x7b   :  { %232 = vmax.xlane.f32.xlu1 %v231_v40 }
  0x7e   :  { %v3416_v42 = vpop.xlane.xlu1 %103 }
  0x83   :  { %241 = vmax.xlane.f32.xlu1 %v240_v43  ;;  %v162_v43 = vsel %vm92_vm0, %v51_v37, -inf }
  0x86   :  { %v3425_v46 = vpop.xlane.xlu1 %115 }
  0x8b   :  { %250 = vmax.xlane.f32.xlu1 %v249_v49  ;;  %94 = vmax.xlane.f32.xlu0 %v93_v50  ;;  %v52_v50 = vld [vmem:[%s5989_s0 + $0xc0] sm:$0xff] }
  0x8c   :  { %106 = vmax.xlane.f32.xlu2 %v105_v48  ;;  %v361_v48 = vld [vmem:[%s5990_s1 + $0x60] sm:$0xff] }
  0x8d   :  { %v449_v54 = vsel %vm92_vm0, %v361_v48, -inf }
  0x8e   :  { %v3439_v53 = vpop.xlane.xlu1 %124 }
  0x93   :  { %259 = vmax.xlane.f32.xlu1 %v258_v56  ;;  %97 = vmax.xlane.f32.xlu0 %v96_v57  ;;  %v165_v56 = vsel %vm92_vm0, %v52_v50, -inf  ;;  %v57_v57 = vld [vmem:[%s5989_s0 + $0xe8] sm:$0xff] }
  0x94   :  { %109 = vmax.xlane.f32.xlu2 %v108_v55 }
  0x96   :  { %v3453_v60 = vpop.xlane.xlu1 %133 }
  0x9b   :  { %268 = vmax.xlane.f32.xlu1 %v267_v63  ;;  %112 = vmax.xlane.f32.xlu0 %v111_v2  ;;  %v458_v63 = vsel %vm92_vm0, %v364_v58, -inf  ;;  %v174_v2 = vsel %vm92_vm0, %v55_v61, -inf }
  0x9c   :  { %118 = vmax.xlane.f32.xlu2 %v117_v62  ;;  %v1329_v55 = vpop.trf.xlu2  ;;  %v180_v62 = vsel %vm92_vm0, %v57_v57, -inf }
  0x9e   :  { %v3467_v7 = vpop.xlane.xlu1 %142 }
  0xa3   :  { %277 = vmax.xlane.f32.xlu1 %v276_v12  ;;  %121 = vmax.xlane.f32.xlu0 %v120_v15  ;;  %v58_v15 = vld [vmem:[%s5989_s0 + $0xf0] sm:$0xff] }
  0xa4   :  { %127 = vmax.xlane.f32.xlu2 %v126_v11  ;;  %v1330_v4 = vpop.trf.xlu2  ;;  %v367_v11 = vld [vmem:[%s5990_s1 + $0x90] sm:$0xff]  ;;  %v183_v19 = vsel %vm92_vm0, %v58_v15, -inf }
  0xa5   :  { %v467_v17 = vsel %vm92_vm0, %v367_v11, -inf  ;;  %v1346_v48 = vadd.f32 %v1330_v4, %v3326_v6  ;;  %v375_v6 = vld [vmem:[%s5990_s1 + $0xd0] sm:$0xff] }
  0xa6   :  { %v3481_v18 = vpop.xlane.xlu1 %151  ;;  %v1373_v51 = vpop.trf.xlu0  ;;  %v491_v58 = vsel %vm92_vm0, %v375_v6, -inf  ;;  %v70_v4 = vld [vmem:[%s5989_s0 + $0x150] sm:$0xff] }
  0xa7   :  { %v219_v15 = vsel %vm92_vm0, %v70_v4, -inf }
  0xab   :  { %414 = vmax.xlane.f32.xlu1 %v413_v21  ;;  %130 = vmax.xlane.f32.xlu0 %v129_v22  ;;  %v63_v22 = vld [vmem:[%s5989_s0 + $0x118] sm:$0xff] }
  0xac   :  { %136 = vmax.xlane.f32.xlu2 %v135_v20  ;;  %v1331_v21 = vpop.trf.xlu2 }
  0xad   :  { %v1347_v47 = vadd.f32 %v1331_v21, %v3342_v10  ;;  %v1350_v10 = vmul.f32 0.5, %v1346_v48  ;;  %v73_v21 = vld [vmem:[%s5989_s0 + $0x168] sm:$0xff] }
  0xae   :  { %v3495_v25 = vpop.xlane.xlu1 %160  ;;  %v1374_v3 = vpop.trf.xlu0 }
  0xaf   :  { %v1390_v37 = vadd.f32 %v1374_v3, %v3321_v5  ;;  %v1345_v5 = vadd.f32 %v1329_v55, %v3307_v1 }
  0xb1   :  { %v1394_v57 = vmul.f32 0.5, %v1390_v37 }
  0xb3   :  { %423 = vmax.xlane.f32.xlu1 %v422_v28  ;;  %139 = vmax.xlane.f32.xlu0 %v138_v29  ;;  %v476_v28 = vsel %vm92_vm0, %v370_v23, -inf  ;;  %v192_v29 = vsel %vm92_vm0, %v61_v26, -inf }
  0xb4   :  { %145 = vmax.xlane.f32.xlu2 %v144_v27  ;;  %v198_v27 = vsel %vm92_vm0, %v63_v22, -inf }
  0xb6   :  { %v3509_v32 = vpop.xlane.xlu1 %169  ;;  %v1375_v20 = vpop.trf.xlu0 }
  0xbb   :  { %432 = vmax.xlane.f32.xlu1 %v431_v35  ;;  %148 = vmax.xlane.f32.xlu0 %v147_v36  ;;  %v64_v35 = vld [vmem:[%s5989_s0 + $0x120] sm:$0xff]  ;;  %v1332_v36 = vpop.trf.xlu2 }
  0xbc   :  { %154 = vmax.xlane.f32.xlu2 %v153_v34  ;;  %v1348_v38 = vadd.f32 %v1332_v36, %v3358_v14  ;;  %v201_v50 = vsel %vm92_vm0, %v64_v35, -inf  ;;  %v1351_v14 = vmul.f32 0.5, %v1347_v47  ;;  %v79_v47 = vld [vmem:[%s5989_s0 + $0x198] sm:$0xff] }
  0xbe   :  { %v3523_v40 = vpop.xlane.xlu1 %178  ;;  %v1376_v33 = vpop.trf.xlu0 }
  0xbf   :  { %v1392_v41 = vadd.f32 %v1376_v33, %v3353_v13  ;;  %v1389_v13 = vadd.f32 %v1373_v51, %v3302_v0  ;;  %v67_v0 = vld [vmem:[%s5989_s0 + $0x138] sm:$0xff]  ;;  %v1349_v51 = vmul.f32 0.5, %v1345_v5  ;;  %v76_v33 = vld [vmem:[%s5989_s0 + $0x180] sm:$0xff] }
  0xc0   :  { %v84_v5 = vld [vmem:[%s5989_s0 + $0x1c0] sm:$0xff] }
  0xc1   :  { %v1393_v61 = vmul.f32 0.5, %v1389_v13  ;;  %v383_v13 = vld [vmem:[%s5990_s1 + $0x110] sm:$0xff] }
  0xc3   :  { %441 = vmax.xlane.f32.xlu1 %v440_v44  ;;  %157 = vmax.xlane.f32.xlu0 %v156_v45  ;;  %v485_v44 = vsel %vm92_vm0, %v373_v31, -inf  ;;  %v1391_v45 = vadd.f32 %v1375_v20, %v3337_v9  ;;  %v69_v9 = vld [vmem:[%s5989_s0 + $0x148] sm:$0xff] }
  0xc4   :  { %163 = vmax.xlane.f32.xlu2 %v162_v43  ;;  %v207_v43 = vsel %vm92_vm0, %v66_v30, -inf  ;;  %v216_v55 = vsel %vm92_vm0, %v69_v9, -inf  ;;  %v82_v9 = vld [vmem:[%s5989_s0 + $0x1b0] sm:$0xff] }
  0xc6   :  { %v3537_v49 = vpop.xlane.xlu1 %187 }
  0xcb   :  { %450 = vmax.xlane.f32.xlu1 %v449_v54  ;;  %166 = vmax.xlane.f32.xlu0 %v165_v56  ;;  %v1396_v54 = vmul.f32 0.5, %v1392_v41  ;;  %v1395_v56 = vmul.f32 0.5, %v1391_v45  ;;  %v81_v41 = vld [vmem:[%s5989_s0 + $0x1a8] sm:$0xff] }
  0xcc   :  { %172 = vmax.xlane.f32.xlu2 %v171_v52  ;;  %v1352_v52 = vmul.f32 0.5, %v1348_v38  ;;  %v237_v38 = vsel %vm92_vm0, %v76_v33, -inf  ;;  %v393_v33 = vld [vmem:[%s5990_s1 + $0x160] sm:$0xff] }
  0xcd   :  { %1876 = vmatpush.msra.mxu1 %v1396_v54  ;;  %v246_v54 = vsel %vm92_vm0, %v79_v47, -inf }
  0xce   :  { %v3551_v59 = vpop.xlane.xlu1 %196  ;;  %1659 = vmatpush.msra.mxu0 %v1352_v52 }
  0xcf   :  { %1877 = vmatpush.msra.mxu1 %v1395_v56 }
  0xd0   :  { %1660 = vmatpush.msra.mxu0 %v1351_v14 }
  0xd1   :  { %1878 = vmatpush.msra.mxu1 %v1394_v57  ;;  %v515_v57 = vsel %vm92_vm0, %v383_v13, -inf  ;;  %v392_v13 = vld [vmem:[%s5990_s1 + $0x158] sm:$0xff] }
  0xd2   :  { %1661 = vmatpush.msra.mxu0 %v1350_v10  ;;  %v261_v10 = vsel %vm92_vm0, %v84_v5, -inf  ;;  %v353_v5 = vld [vmem:[%s5990_s1 + $0x20] sm:$0xff] }
  0xd3   :  { %459 = vmax.xlane.f32.xlu1 %v458_v63  ;;  %175 = vmax.xlane.f32.xlu0 %v174_v2  ;;  %v72_v63 = vld [vmem:[%s5989_s0 + $0x160] sm:$0xff]  ;;  %v378_v2 = vld [vmem:[%s5990_s1 + $0xe8] sm:$0xff] }
  0xd4   :  { %181 = vmax.xlane.f32.xlu2 %v180_v62  ;;  %v210_v62 = vsel %vm92_vm0, %v67_v0, -inf  ;;  %1662 = vmatpush.msra.mxu0 %v1349_v51  ;;  %v225_v8 = vsel %vm92_vm0, %v72_v63, -inf  ;;  %v500_v11 = vsel %vm92_vm0, %v378_v2, -inf  ;;  %v255_v0 = vsel %vm92_vm0, %v82_v9, -inf  ;;  %v87_v51 = vld [vmem:[%s5989_s0 + $0x1d8] sm:$0xff] }
  0xd5   :  { %1879 = vmatpush.msra.mxu1 %v1393_v61  ;;  %v270_v2 = vsel %vm92_vm0, %v87_v51, -inf  ;;  %v287_v51 = vmax.f32 %v3410_v39, 0.0  ;;  %v298_v39 = vmax.f32 %v3453_v60, 0.0 }
  0xd6   :  { %v3565_v12 = vpop.xlane.xlu1 %205 }
  0xdb   :  { %468 = vmax.xlane.f32.xlu1 %v467_v17  ;;  %184 = vmax.xlane.f32.xlu0 %v183_v19  ;;  %v379_v17 = vld [vmem:[%s5990_s1 + $0xf0] sm:$0xff] }
  0xdc   :  { %190 = vmax.xlane.f32.xlu2 %v189_v16  ;;  %v75_v16 = vld [vmem:[%s5989_s0 + $0x178] sm:$0xff]  ;;  %v503_v26 = vsel %vm92_vm0, %v379_v17, -inf }
  0xdd   :  { %v234_v23 = vsel %vm92_vm0, %v75_v16, -inf }
  0xde   :  { %v3579_v24 = vpop.xlane.xlu1 %214 }
  0xe3   :  { %477 = vmax.xlane.f32.xlu1 %v476_v28  ;;  %193 = vmax.xlane.f32.xlu0 %v192_v29  ;;  %v78_v28 = vld [vmem:[%s5989_s0 + $0x190] sm:$0xff]  ;;  %v381_v29 = vld [vmem:[%s5990_s1 + $0x100] sm:$0xff] }
  0xe4   :  { %199 = vmax.xlane.f32.xlu2 %v198_v27  ;;  %v228_v27 = vsel %vm92_vm0, %v73_v21, -inf  ;;  %v243_v36 = vsel %vm92_vm0, %v78_v28, -inf  ;;  %v509_v37 = vsel %vm92_vm0, %v381_v29, -inf  ;;  %v88_v21 = vld [vmem:[%s5989_s0 + $0x1e0] sm:$0xff]  ;;  %v350_v29 = vld [vmem:[%s5990_s1 + $0x8] sm:$0xff] }
  0xe5   :  { %v273_v28 = vsel %vm92_vm0, %v88_v21, -inf  ;;  %v416_v47 = vsel %vm92_vm0, %v350_v29, -inf }
  0xe6   :  { %v3593_v34 = vpop.xlane.xlu1 %223 }
  0xeb   :  { %486 = vmax.xlane.f32.xlu1 %v485_v44  ;;  %202 = vmax.xlane.f32.xlu0 %v201_v50  ;;  %v252_v50 = vsel %vm92_vm0, %v81_v41, -inf  ;;  %v5996_v41 = vlaneseq }
  0xec   :  { %208 = vmax.xlane.f32.xlu2 %v207_v43  ;;  %v385_v43 = vld [vmem:[%s5990_s1 + $0x120] sm:$0xff] }
  0xed   :  { %v521_v52 = vsel %vm92_vm0, %v385_v43, -inf }
  0xee   :  { %v3615_v1 = vpop.xlane.xlu1 %232 }
  0xf3   :  { %492 = vmax.xlane.f32.xlu1 %v491_v58  ;;  %211 = vmax.xlane.f32.xlu0 %v210_v62  ;;  %v85_v62 = vld [vmem:[%s5989_s0 + $0x1c8] sm:$0xff] }
  0xf4   :  { %217 = vmax.xlane.f32.xlu2 %v216_v55  ;;  %v389_v55 = vld [vmem:[%s5990_s1 + $0x140] sm:$0xff] }
  0xf5   :  { %v533_v4 = vsel %vm92_vm0, %v389_v55, -inf }
  0xf6   :  { %v3629_v3 = vpop.xlane.xlu1 %241 }
  0xfb   :  { %501 = vmax.xlane.f32.xlu1 %v500_v11  ;;  %220 = vmax.xlane.f32.xlu0 %v219_v15  ;;  %v90_v11 = vld [vmem:[%s5989_s0 + $0x1f0] sm:$0xff]  ;;  %v384_v15 = vld [vmem:[%s5990_s1 + $0x118] sm:$0xff] }
  0xfc   :  { %226 = vmax.xlane.f32.xlu2 %v225_v8  ;;  %v264_v8 = vsel %vm92_vm0, %v85_v62, -inf  ;;  %v288_v62 = vmax.f32 %v3416_v42, 0.0 }
  0xfe   :  { %v3645_v20 = vpop.xlane.xlu1 %250  ;;  %v3650_v22 = vpop.xlane.xlu0 %94 }
  0xff   :  { %v3643_v19 = vpop.xlane.xlu2 %106 }
 0x103   :  { %504 = vmax.xlane.f32.xlu1 %v503_v26  ;;  %229 = vmax.xlane.f32.xlu0 %v228_v27  ;;  %v279_v26 = vsel %vm92_vm0, %v90_v11, -inf  ;;  %v518_v27 = vsel %vm92_vm0, %v384_v15, -inf  ;;  %v425_v11 = vsel %vm92_vm0, %v353_v5, -inf  ;;  %v542_v15 = vsel %vm92_vm0, %v392_v13, -inf }
 0x104   :  { %235 = vmax.xlane.f32.xlu2 %v234_v23 }
 0x106   :  { %v3663_v31 = vpop.xlane.xlu1 %259  ;;  %v3668_v35 = vpop.xlane.xlu0 %97 }
 0x107   :  { %v3661_v30 = vpop.xlane.xlu2 %109  ;;  %v286_v42 = vmax.f32 %v3668_v35, 0.0  ;;  %v304_v35 = vmax.f32 %v3481_v18, 0.0 }
 0x108   :  { %v290_v29 = vmax.f32 %v3661_v30, 0.0  ;;  %v310_v30 = vmax.f32 %v3509_v32, 0.0 }
 0x10b   :  { %510 = vmax.xlane.f32.xlu1 %v509_v37  ;;  %238 = vmax.xlane.f32.xlu0 %v237_v38  ;;  %v91_v38 = vld [vmem:[%s5989_s0 + $0x1f8] sm:$0xff] }
 0x10c   :  { %244 = vmax.xlane.f32.xlu2 %v243_v36 }
 0x10e   :  { %v3681_v45 = vpop.xlane.xlu1 %268  ;;  %v3686_v48 = vpop.xlane.xlu0 %112 }
 0x10f   :  { %v3679_v44 = vpop.xlane.xlu2 %118  ;;  %v291_v5 = vmax.f32 %v3686_v48, 0.0 }
 0x113   :  { %522 = vmax.xlane.f32.xlu1 %v521_v52  ;;  %247 = vmax.xlane.f32.xlu0 %v246_v54  ;;  %v282_v52 = vsel %vm92_vm0, %v91_v38, -inf  ;;  %v3764_v54 = vand.u32 127, %v5996_v41 }
 0x114   :  { %253 = vmax.xlane.f32.xlu2 %v252_v50  ;;  %v545_v50 = vsel %vm92_vm0, %v393_v33, -inf }
 0x115   :  { %v3784_v55 = vadd.s32 4294967272, %v3764_v54  ;;  %v3794_v21 = vadd.s32 4294967288, %v3764_v54 }
 0x116   :  { %v3699_v56 = vpop.xlane.xlu1 %277  ;;  %v3704_v6 = vpop.xlane.xlu0 %121 }
 0x117   :  { %v3697_v14 = vpop.xlane.xlu2 %127  ;;  %v3805_v33 = vperm.slane %v288_v62, %v3784_v55  ;;  %v1505_v18 = vperm.slane %v286_v42, %v3794_v21  ;;  %v3843_v48 = vperm.slane %v304_v35, %v3784_v55 }
 0x11b   :  { %516 = vmax.xlane.f32.xlu1 %v515_v57  ;;  %256 = vmax.xlane.f32.xlu0 %v255_v0  ;;  %v351_v57 = vld [vmem:[%s5990_s1 + $0x10] sm:$0xff]  ;;  %v3780_v0 = vadd.s32 4294967280, %v3764_v54 }
 0x11c   :  { %262 = vmax.xlane.f32.xlu2 %v261_v10 }
 0x11e   :  { %v3717_v61 = vpop.xlane.xlu1 %414  ;;  %v3722_v63 = vpop.xlane.xlu0 %130 }
 0x11f   :  { %v3715_v58 = vpop.xlane.xlu2 %136 }
 0x123   :  { %534 = vmax.xlane.f32.xlu1 %v533_v4  ;;  %265 = vmax.xlane.f32.xlu0 %v264_v8  ;;  %v292_v4 = vmax.f32 %v3425_v46, 0.0  ;;  %v295_v8 = vmax.f32 %v3439_v53, 0.0  ;;  %v301_v46 = vmax.f32 %v3467_v7, 0.0  ;;  %v289_v53 = vmax.f32 %v3643_v19, 0.0 }
 0x124   :  { %271 = vmax.xlane.f32.xlu2 %v270_v2  ;;  %v3815_v7 = vperm.slane %v298_v39, %v3794_v21  ;;  %v307_v19 = vmax.f32 %v3495_v25, 0.0  ;;  %v294_v25 = vmax.f32 %v3704_v6, 0.0  ;;  %v313_v6 = vmax.f32 %v3523_v40, 0.0 }
 0x125   :  { %v3808_v60 = vperm.slane %v292_v4, %v3784_v55  ;;  %v1516_v62 = vperm.slane %v289_v53, %v3764_v54  ;;  %v3852_v39 = vperm.slane %v310_v30, %v3794_v21 }
 0x126   :  { %v3735_v17 = vpop.xlane.xlu1 %423  ;;  %v3740_v23 = vpop.xlane.xlu0 %139  ;;  %v1524_v40 = vperm.slane %v294_v25, %v3794_v21  ;;  %v3864_v30 = vperm.slane %v313_v6, %v3764_v54 }
 0x127   :  { %v3733_v16 = vpop.xlane.xlu2 %145 }
 0x12b   :  { %519 = vmax.xlane.f32.xlu1 %v518_v27  ;;  %274 = vmax.xlane.f32.xlu0 %v273_v28  ;;  %v419_v27 = vsel %vm92_vm0, %v351_v57, -inf  ;;  %v1509_v28 = vperm.slane %v287_v51, %v3780_v0  ;;  %v354_v57 = vld [vmem:[%s5990_s1 + $0x28] sm:$0xff]  ;;  %v3838_v51 = vperm.slane %v301_v46, %v3764_v54  ;;  %v1519_v46 = vperm.slane %v291_v5, %v3780_v0 }
 0x12c   :  { %280 = vmax.xlane.f32.xlu2 %v279_v26  ;;  %v285_v26 = vmax.f32 %v3650_v22, 0.0  ;;  %v3811_v22 = vperm.slane %v295_v8, %v3780_v0 }
 0x12e   :  { %v3753_v37 = vpop.xlane.xlu1 %432  ;;  %v3758_v43 = vpop.xlane.xlu0 %148  ;;  %v1503_v38 = vperm.slane %v285_v26, %v3764_v54  ;;  %v428_v26 = vsel %vm92_vm0, %v354_v57, -inf }
 0x12f   :  { %v3751_v36 = vpop.xlane.xlu2 %154 }
 0x130   :  { %v305_v35 = vmax.f32 %v3751_v36, 0.0  ;;  %v359_v36 = vld [vmem:[%s5990_s1 + $0x50] sm:$0xff] }
 0x133   :  { %546 = vmax.xlane.f32.xlu1 %v545_v50  ;;  %283 = vmax.xlane.f32.xlu0 %v282_v52  ;;  %v397_v50 = vld [vmem:[%s5990_s1 + $0x180] sm:$0xff]  ;;  %v293_v52 = vmax.f32 %v3679_v44, 0.0  ;;  %v1517_v44 = vperm.slane %v290_v29, %v3794_v21  ;;  %v297_v29 = vmax.f32 %v3722_v63, 0.0  ;;  %v303_v63 = vmax.f32 %v3758_v43, 0.0 }
 0x134   :  { %417 = vmax.xlane.f32.xlu2 %v416_v47  ;;  %v356_v47 = vld [vmem:[%s5990_s1 + $0x38] sm:$0xff]  ;;  %v357_v43 = vld [vmem:[%s5990_s1 + $0x40] sm:$0xff] }
 0x135   :  { %v434_v8 = vsel %vm92_vm0, %v356_v47, -inf  ;;  %v1523_v42 = vperm.slane %v293_v52, %v3764_v54  ;;  %v1518_v53 = vsel %vm1506_vm1, %v1517_v44, %v1516_v62  ;;  %v296_v47 = vmax.f32 %v3697_v14, 0.0 }
 0x136   :  { %v3774_v10 = vpop.xlane.xlu1 %441  ;;  %v3787_v2 = vpop.xlane.xlu0 %157  ;;  %v1520_v52 = vsel %vm1510_vm2, %v1519_v46, %v1518_v53  ;;  %v1530_v57 = vperm.slane %v297_v29, %v3764_v54  ;;  %v300_v62 = vmax.f32 %v3740_v23, 0.0  ;;  %v1544_v44 = vperm.slane %v305_v35, %v3764_v54 }
 0x137   :  { %v3772_v9 = vpop.xlane.xlu2 %163  ;;  %v1525_v14 = vsel %vm1506_vm1, %v1524_v40, %v1523_v42  ;;  %v437_v23 = vsel %vm92_vm0, %v357_v43, -inf  ;;  %v360_v43 = vld [vmem:[%s5990_s1 + $0x58] sm:$0xff] }
 0x138   :  { %v308_v42 = vmax.f32 %v3772_v9, 0.0  ;;  %v1527_v40 = vsel %vm1510_vm2, %v3811_v22, %v1525_v14  ;;  %v1522_v22 = vsel %vm1514_vm3, %v3808_v60, %v1520_v52  ;;  %v401_v60 = vld [vmem:[%s5990_s1 + $0x1a0] sm:$0xff] }
 0x13b   :  { %543 = vmax.xlane.f32.xlu1 %v542_v15  ;;  %420 = vmax.xlane.f32.xlu0 %v419_v27  ;;  %v3849_v15 = vperm.slane %v307_v19, %v3780_v0  ;;  %v1507_v27 = vsel %vm1506_vm1, %v1505_v18, %v1503_v38  ;;  %v306_v19 = vmax.f32 %v3787_v2, 0.0  ;;  %v316_v38 = vmax.f32 %v3537_v49, 0.0  ;;  %v396_v2 = vld [vmem:[%s5990_s1 + $0x178] sm:$0xff]  ;;  %v365_v49 = vld [vmem:[%s5990_s1 + $0x80] sm:$0xff] }
 0x13c   :  { %426 = vmax.xlane.f32.xlu2 %v425_v11  ;;  %v557_v11 = vsel %vm92_vm0, %v397_v50, -inf  ;;  %v302_v50 = vmax.f32 %v3733_v16, 0.0  ;;  %v1511_v18 = vsel %vm1510_vm2, %v1509_v28, %v1507_v27  ;;  %v299_v16 = vmax.f32 %v3715_v58, 0.0 }
 0x13d   :  { %v1545_v6 = vperm.slane %v306_v19, %v3794_v21  ;;  %v1528_v58 = vperm.slane %v296_v47, %v3784_v55  ;;  %v1540_v27 = vperm.slane %v303_v63, %v3780_v0  ;;  %v1532_v19 = vsel %vm1506_vm1, %v3815_v7, %v1530_v57 }
 0x13e   :  { %v3832_v32 = vpop.xlane.xlu1 %450  ;;  %v167_v4 = vpop.xlane.xlu0 %166  ;;  %v1533_v53 = vperm.slane %v299_v16, %v3780_v0  ;;  %v1535_v47 = vperm.slane %v300_v62, %v3784_v55 }
 0x13f   :  { %v3830_v13 = vpop.xlane.xlu2 %172  ;;  %v309_v5 = vmax.f32 %v167_v4, 0.0  ;;  %v1538_v4 = vperm.slane %v302_v50, %v3794_v21  ;;  %v1546_v50 = vsel %vm1506_vm1, %v1545_v6, %v1544_v44  ;;  %v1529_v7 = vsel %vm1514_vm3, %v1528_v58, %v1527_v40 }
 0x140   :  { %v311_v46 = vmax.f32 %v3830_v13, 0.0  ;;  %v1515_v13 = vsel %vm1514_vm3, %v3805_v33, %v1511_v18  ;;  %v362_v33 = vld [vmem:[%s5990_s1 + $0x68] sm:$0xff]  ;;  %v1548_v18 = vsel %vm1510_vm2, %v3849_v15, %v1546_v50  ;;  %v569_v58 = vsel %vm92_vm0, %v401_v60, -inf }
 0x141   :  { %v1551_v29 = vperm.slane %v309_v5, %v3764_v54  ;;  %v1539_v63 = vsel %vm1506_vm1, %v1538_v4, %v3838_v51  ;;  %v1534_v51 = vsel %vm1510_vm2, %v1533_v53, %v1532_v19  ;;  %v1622_v57 = vsel %vm1621_vm4, %v1522_v22, %v1515_v13  ;;  %v363_v13 = vld [vmem:[%s5990_s1 + $0x70] sm:$0xff] }
 0x142   :  { %v1554_v14 = vperm.slane %v311_v46, %v3780_v0  ;;  %v1536_v62 = vsel %vm1514_vm3, %v1535_v47, %v1534_v51  ;;  %v1624_v4 = vsel %vm1623_vm5, %v1529_v7, %v1622_v57  ;;  %v366_v51 = vld [vmem:[%s5990_s1 + $0x88] sm:$0xff]  ;;  %v371_v57 = vld [vmem:[%s5990_s1 + $0xb0] sm:$0xff] }
 0x143   :  { %558 = vmax.xlane.f32.xlu1 %v557_v11  ;;  %429 = vmax.xlane.f32.xlu0 %v428_v26  ;;  %v443_v11 = vsel %vm92_vm0, %v359_v36, -inf  ;;  %v554_v26 = vsel %vm92_vm0, %v396_v2, -inf  ;;  %v1541_v36 = vsel %vm1510_vm2, %v1540_v27, %v1539_v63  ;;  %v1549_v2 = vperm.slane %v308_v42, %v3784_v55 }
 0x144   :  { %435 = vmax.xlane.f32.xlu2 %v434_v8  ;;  %v1553_v52 = vsel %vm1506_vm1, %v3852_v39, %v1551_v29  ;;  %v1543_v39 = vsel %vm1514_vm3, %v3843_v48, %v1541_v36  ;;  %v1626_v42 = vsel %vm1625_vm6, %v1536_v62, %v1624_v4  ;;  %v1563_v48 = vperm.slane %v316_v38, %v3784_v55  ;;  %v404_v62 = vld [vmem:[%s5990_s1 + $0x1b8] sm:$0xff] }
 0x145   :  { %v1555_v27 = vsel %vm1510_vm2, %v1554_v14, %v1553_v52  ;;  %v1628_v53 = vsel %vm1627_vm7, %v1543_v39, %v1626_v42  ;;  %v461_v63 = vsel %vm92_vm0, %v365_v49, -inf  ;;  %v455_v36 = vsel %vm92_vm0, %v363_v13, -inf  ;;  %v405_v14 = vld [vmem:[%s5990_s1 + $0x1c0] sm:$0xff]  ;;  %v374_v49 = vld [vmem:[%s5990_s1 + $0xc8] sm:$0xff] }
 0x146   :  { %v3880_v25 = vpop.xlane.xlu1 %459  ;;  %v176_v8 = vpop.xlane.xlu0 %175  ;;  %v369_v39 = vld [vmem:[%s5990_s1 + $0xa0] sm:$0xff] }
 0x147   :  { %v182_v28 = vpop.xlane.xlu2 %181  ;;  %v312_v35 = vmax.f32 %v176_v8, 0.0  ;;  %v452_v8 = vsel %vm92_vm0, %v362_v33, -inf  ;;  %v473_v4 = vsel %vm92_vm0, %v369_v39, -inf  ;;  %v678_v39 = vld [vmem:[%s5991_s2 + $0x48] sm:$0xff]  ;;  %v620_v41 = vmax.f32 %v3880_v25, 0.0 }
 0x148   :  { %v314_v9 = vmax.f32 %v182_v28, 0.0 }
 0x149   :  { %v1556_v16 = vperm.slane %v312_v35, %v3784_v55 }
 0x14a   :  { %v1559_v44 = vperm.slane %v314_v9, %v3794_v21 }
 0x14b   :  { %555 = vmax.xlane.f32.xlu1 %v554_v26  ;;  %438 = vmax.xlane.f32.xlu0 %v437_v23  ;;  %v1550_v26 = vsel %vm1514_vm3, %v1549_v2, %v1548_v18  ;;  %v1557_v23 = vsel %vm1514_vm3, %v1556_v16, %v1555_v27  ;;  %v368_v2 = vld [vmem:[%s5990_s1 + $0x98] sm:$0xff]  ;;  %v581_v16 = vsel %vm92_vm0, %v405_v14, -inf }
 0x14c   :  { %444 = vmax.xlane.f32.xlu2 %v443_v11  ;;  %v446_v11 = vsel %vm92_vm0, %v360_v43, -inf  ;;  %v1560_v40 = vsel %vm1506_vm1, %v1559_v44, %v3864_v30  ;;  %v1630_v35 = vsel %vm1629_vm8, %v1550_v26, %v1628_v53  ;;  %v400_v30 = vld [vmem:[%s5990_s1 + $0x198] sm:$0xff]  ;;  %v470_v52 = vsel %vm92_vm0, %v368_v2, -inf  ;;  %v409_v26 = vld [vmem:[%s5990_s1 + $0x1e0] sm:$0xff] }
 0x14d   :  { %v1632_v47 = vsel %vm1631_vm9, %v1557_v23, %v1630_v35  ;;  %v566_v7 = vsel %vm92_vm0, %v400_v30, -inf  ;;  %v464_v43 = vsel %vm92_vm0, %v366_v51, -inf  ;;  %v408_v35 = vld [vmem:[%s5990_s1 + $0x1d8] sm:$0xff] }
 0x14e   :  { %v3929_v28 = vpop.xlane.xlu1 %468  ;;  %v185_v15 = vpop.xlane.xlu0 %184  ;;  %v412_v2 = vld [vmem:[%s5990_s1 + $0x1f8] sm:$0xff] }
 0x14f   :  { %v3927_v5 = vpop.xlane.xlu2 %190  ;;  %v315_v6 = vmax.f32 %v185_v15, 0.0 }
 0x151   :  { %v1561_v46 = vperm.slane %v315_v6, %v3780_v0 }
 0x153   :  { %570 = vmax.xlane.f32.xlu1 %v569_v58  ;;  %447 = vmax.xlane.f32.xlu0 %v446_v11  ;;  %v1562_v29 = vsel %vm1510_vm2, %v1561_v46, %v1560_v40  ;;  %v578_v58 = vsel %vm92_vm0, %v404_v62, -inf  ;;  %v388_v11 = vld [vmem:[%s5990_s1 + $0x138] sm:$0xff]  ;;  %v593_v40 = vsel %vm92_vm0, %v409_v26, -inf }
 0x154   :  { %453 = vmax.xlane.f32.xlu2 %v452_v8  ;;  %v1564_v19 = vsel %vm1514_vm3, %v1563_v48, %v1562_v29  ;;  %v479_v8 = vsel %vm92_vm0, %v371_v57, -inf  ;;  %v372_v46 = vld [vmem:[%s5990_s1 + $0xb8] sm:$0xff]  ;;  %v530_v48 = vsel %vm92_vm0, %v388_v11, -inf  ;;  %v674_v29 = vld [vmem:[%s5991_s2 + $0x28] sm:$0xff]  ;;  %v602_v57 = vsel %vm92_vm0, %v412_v2, -inf }
 0x155   :  { %v3969_v9 = vsel %vm1633_vm10, %v1564_v19, %v1632_v47  ;;  %v482_v53 = vsel %vm92_vm0, %v372_v46, -inf  ;;  %v748_v13 = vsel %vm92_vm0, %v674_v29, -inf  ;;  %v376_v11 = vld [vmem:[%s5990_s1 + $0xd8] sm:$0xff]  ;;  %v760_v46 = vsel %vm92_vm0, %v678_v39, -inf  ;;  %v670_v29 = vld [vmem:[%s5991_s2 + $0x8] sm:$0xff] }
 0x156   :  { %v3966_v50 = vpop.xlane.xlu1 %477  ;;  %6000 = vst [vmem:[#allocation2_spill] sm:$0xff] %v3969_v9  ;;  %3108 = vmatmul.msk.f32.vlgmr.msra.gmra.mxu0 %vm1642_vm11, %v3969_v9  ;;  %v3976_v22 = vpop.xlane.xlu0 %193  ;;  %v328_v39 = vmax.f32 %v3593_v34, 0.0  ;;  %v623_v9 = vmax.f32 %v3929_v28, 0.0 }
 0x157   :  { %v3964_v38 = vpop.xlane.xlu2 %199  ;;  %v318_v2 = vmax.f32 %v3976_v22, 0.0  ;;  %v337_v22 = vmax.f32 %v3645_v20, 0.0  ;;  %v681_v20 = vld [vmem:[%s5991_s2 + $0x60] sm:$0xff] }
 0x159   :  { %v1566_v34 = vperm.slane %v318_v2, %v3794_v21 }
 0x15b   :  { %567 = vmax.xlane.f32.xlu1 %v566_v7  ;;  %456 = vmax.xlane.f32.xlu0 %v455_v36  ;;  %v488_v7 = vsel %vm92_vm0, %v374_v49, -inf  ;;  %v675_v36 = vld [vmem:[%s5991_s2 + $0x30] sm:$0xff] }
 0x15c   :  { %462 = vmax.xlane.f32.xlu2 %v461_v63  ;;  %v590_v63 = vsel %vm92_vm0, %v408_v35, -inf }
 0x15e   :  { %v3989_v60 = vpop.xlane.xlu1 %486  ;;  %v3994_v18 = vpop.xlane.xlu0 %202 }
 0x15f   :  { %v3987_v33 = vpop.xlane.xlu2 %208 }
 0x163   :  { %582 = vmax.xlane.f32.xlu1 %v581_v16  ;;  %465 = vmax.xlane.f32.xlu0 %v464_v43  ;;  %v751_v43 = vsel %vm92_vm0, %v675_v36, -inf  ;;  %v317_v36 = vmax.f32 %v3927_v5, 0.0  ;;  %v334_v5 = vmax.f32 %v3629_v3, 0.0  ;;  %v323_v3 = vmax.f32 %v3987_v33, 0.0  ;;  %v382_v33 = vld [vmem:[%s5990_s1 + $0x108] sm:$0xff] }
 0x164   :  { %471 = vmax.xlane.f32.xlu2 %v470_v52  ;;  %v377_v52 = vld [vmem:[%s5990_s1 + $0xe0] sm:$0xff] }
 0x165   :  { %v497_v62 = vsel %vm92_vm0, %v377_v52, -inf }
 0x166   :  { %v4007_v15 = vpop.xlane.xlu1 %492  ;;  %v4012_v6 = vpop.xlane.xlu0 %211 }
 0x167   :  { %v4005_v44 = vpop.xlane.xlu2 %217 }
 0x16b   :  { %579 = vmax.xlane.f32.xlu1 %v578_v58  ;;  %474 = vmax.xlane.f32.xlu0 %v473_v4 }
 0x16c   :  { %480 = vmax.xlane.f32.xlu2 %v479_v8  ;;  %v669_v8 = vld [vmem:[%s5991_s2] sm:$0xff] }
 0x16e   :  { %v4025_v42 = vpop.xlane.xlu1 %501  ;;  %v4030_v23 = vpop.xlane.xlu0 %220 }
 0x16f   :  { %v4023_v27 = vpop.xlane.xlu2 %226 }
 0x173   :  { %594 = vmax.xlane.f32.xlu1 %v593_v40  ;;  %483 = vmax.xlane.f32.xlu0 %v482_v53  ;;  %v494_v40 = vsel %vm92_vm0, %v376_v11, -inf  ;;  %v676_v53 = vld [vmem:[%s5991_s2 + $0x38] sm:$0xff]  ;;  %v331_v11 = vmax.f32 %v3615_v1, 0.0  ;;  %v4124_v1 = vperm.slane %v328_v39, %v3784_v55 }
 0x174   :  { %531 = vmax.xlane.f32.xlu2 %v530_v48  ;;  %v733_v48 = vsel %vm92_vm0, %v669_v8, -inf  ;;  %v754_v52 = vsel %vm92_vm0, %v676_v53, -inf  ;;  %v326_v53 = vmax.f32 %v4005_v44, 0.0 }
 0x175   :  { %v1589_v2 = vperm.slane %v331_v11, %v3780_v0  ;;  %v327_v11 = vmax.f32 %v4030_v23, 0.0 }
 0x176   :  { %v4043_v47 = vpop.xlane.xlu1 %504  ;;  %v4048_v30 = vpop.xlane.xlu0 %229 }
 0x177   :  { %v4041_v19 = vpop.xlane.xlu2 %235 }
 0x17b   :  { %591 = vmax.xlane.f32.xlu1 %v590_v63  ;;  %489 = vmax.xlane.f32.xlu0 %v488_v7  ;;  %v319_v63 = vmax.f32 %v3551_v59, 0.0  ;;  %v321_v59 = vmax.f32 %v3994_v18, 0.0 }
 0x17c   :  { %749 = vmax.xlane.f32.xlu2 %v748_v13  ;;  %v380_v13 = vld [vmem:[%s5990_s1 + $0xf8] sm:$0xff] }
 0x17d   :  { %v506_v8 = vsel %vm92_vm0, %v380_v13, -inf  ;;  %v330_v13 = vmax.f32 %v4048_v30, 0.0  ;;  %v320_v30 = vmax.f32 %v3964_v38, 0.0 }
 0x17e   :  { %v4061_v51 = vpop.xlane.xlu1 %510  ;;  %v4066_v16 = vpop.xlane.xlu0 %238 }
 0x17f   :  { %v4059_v14 = vpop.xlane.xlu2 %244  ;;  %v1570_v23 = vperm.slane %v320_v30, %v3784_v55 }
 0x183   :  { %603 = vmax.xlane.f32.xlu1 %v602_v57  ;;  %498 = vmax.xlane.f32.xlu0 %v497_v62  ;;  %v322_v57 = vmax.f32 %v3565_v12, 0.0  ;;  %v325_v62 = vmax.f32 %v3579_v24, 0.0  ;;  %v1568_v12 = vperm.slane %v319_v63, %v3780_v0  ;;  %v1565_v24 = vperm.slane %v317_v36, %v3764_v54 }
 0x184   :  { %752 = vmax.xlane.f32.xlu2 %v751_v43  ;;  %v736_v43 = vsel %vm92_vm0, %v670_v29, -inf  ;;  %v329_v29 = vmax.f32 %v4023_v27, 0.0 }
 0x185   :  { %v1579_v18 = vperm.slane %v325_v62, %v3764_v54  ;;  %v769_v62 = vsel %vm92_vm0, %v681_v20, -inf  ;;  %v333_v20 = vmax.f32 %v4066_v16, 0.0  ;;  %v1582_v16 = vperm.slane %v327_v11, %v3780_v0 }
 0x186   :  { %v4079_v4 = vpop.xlane.xlu1 %522  ;;  %v4084_v26 = vpop.xlane.xlu0 %247  ;;  %v1586_v38 = vperm.slane %v329_v29, %v3764_v54  ;;  %v680_v29 = vld [vmem:[%s5991_s2 + $0x58] sm:$0xff] }
 0x187   :  { %v4077_v58 = vpop.xlane.xlu2 %253 }
 0x18b   :  { %734 = vmax.xlane.f32.xlu1 %v733_v48  ;;  %495 = vmax.xlane.f32.xlu0 %v494_v40  ;;  %v1573_v48 = vperm.slane %v322_v57, %v3794_v21  ;;  %v1572_v40 = vperm.slane %v321_v59, %v3764_v54  ;;  %v1567_v57 = vsel %vm1506_vm1, %v1566_v34, %v1565_v24  ;;  %v324_v59 = vmax.f32 %v4012_v6, 0.0 }
 0x18c   :  { %761 = vmax.xlane.f32.xlu2 %v760_v46  ;;  %v340_v46 = vmax.f32 %v3663_v31, 0.0  ;;  %v673_v31 = vld [vmem:[%s5991_s2 + $0x20] sm:$0xff]  ;;  %v1587_v24 = vperm.slane %v330_v13, %v3794_v21  ;;  %v343_v34 = vmax.f32 %v3681_v45, 0.0  ;;  %v346_v6 = vmax.f32 %v3699_v56, 0.0  ;;  %v671_v56 = vld [vmem:[%s5991_s2 + $0x10] sm:$0xff] }
 0x18d   :  { %v745_v39 = vsel %vm92_vm0, %v673_v31, -inf  ;;  %v1577_v45 = vperm.slane %v324_v59, %v3784_v55  ;;  %v739_v11 = vsel %vm92_vm0, %v671_v56, -inf }
 0x18e   :  { %v4097_v49 = vpop.xlane.xlu1 %516  ;;  %v4103_v7 = vpop.xlane.xlu0 %256  ;;  %v4150_v44 = vperm.slane %v340_v46, %v3784_v55  ;;  %v1580_v46 = vperm.slane %v326_v53, %v3794_v21  ;;  %v1588_v13 = vsel %vm1506_vm1, %v1587_v24, %v1586_v38 }
 0x18f   :  { %v4095_v35 = vpop.xlane.xlu2 %262 }
 0x193   :  { %737 = vmax.xlane.f32.xlu1 %v736_v43  ;;  %507 = vmax.xlane.f32.xlu0 %v506_v8  ;;  %v4147_v43 = vperm.slane %v337_v22, %v3764_v54  ;;  %v1575_v8 = vperm.slane %v323_v3, %v3780_v0  ;;  %v1574_v22 = vsel %vm1506_vm1, %v1573_v48, %v1572_v40  ;;  %v341_v3 = vmax.f32 %v4095_v35, 0.0 }
 0x194   :  { %755 = vmax.xlane.f32.xlu2 %v754_v52  ;;  %v1594_v52 = vperm.slane %v334_v5, %v3794_v21  ;;  %v512_v5 = vsel %vm92_vm0, %v382_v33, -inf  ;;  %v1569_v48 = vsel %vm1510_vm2, %v1568_v12, %v1567_v57  ;;  %v338_v40 = vmax.f32 %v4077_v58, 0.0 }
 0x195   :  { %v1576_v53 = vsel %vm1510_vm2, %v1575_v8, %v1574_v22  ;;  %v339_v35 = vmax.f32 %v4103_v7, 0.0  ;;  %v1581_v12 = vsel %vm1506_vm1, %v1580_v46, %v1579_v18  ;;  %v332_v58 = vmax.f32 %v4041_v19, 0.0  ;;  %v386_v7 = vld [vmem:[%s5990_s1 + $0x128] sm:$0xff] }
 0x196   :  { %v4139_v36 = vpop.xlane.xlu1 %534  ;;  %v266_v27 = vpop.xlane.xlu0 %265  ;;  %v335_v33 = vmax.f32 %v4059_v14, 0.0  ;;  %v1593_v57 = vperm.slane %v333_v20, %v3764_v54  ;;  %v1601_v8 = vperm.slane %v338_v40, %v3794_v21  ;;  %v766_v14 = vsel %vm92_vm0, %v680_v29, -inf }
 0x197   :  { %v4137_v63 = vpop.xlane.xlu2 %271  ;;  %v342_v31 = vmax.f32 %v266_v27, 0.0  ;;  %v1603_v22 = vperm.slane %v339_v35, %v3780_v0  ;;  %v1578_v38 = vsel %vm1514_vm3, %v1577_v45, %v1576_v53  ;;  %v1591_v24 = vperm.slane %v332_v58, %v3784_v55 }
 0x198   :  { %v344_v46 = vmax.f32 %v4137_v63, 0.0  ;;  %v1590_v20 = vsel %vm1510_vm2, %v1589_v2, %v1588_v13  ;;  %v1610_v63 = vperm.slane %v343_v34, %v3780_v0  ;;  %v1602_v45 = vsel %vm1506_vm1, %v1601_v8, %v4147_v43 }
 0x199   :  { %v1608_v18 = vperm.slane %v342_v31, %v3794_v21  ;;  %v1595_v31 = vsel %vm1506_vm1, %v1594_v52, %v1593_v57  ;;  %v686_v52 = vld [vmem:[%s5991_s2 + $0x88] sm:$0xff]  ;;  %v1615_v35 = vperm.slane %v346_v6, %v3794_v21  ;;  %v1571_v56 = vsel %vm1514_vm3, %v1570_v23, %v1569_v48  ;;  %v387_v6 = vld [vmem:[%s5990_s1 + $0x130] sm:$0xff] }
 0x19a   :  { %v1612_v34 = vperm.slane %v344_v46, %v3784_v55  ;;  %v1635_v43 = vsel %vm1621_vm4, %v1578_v38, %v1571_v56  ;;  %v1592_v58 = vsel %vm1514_vm3, %v1591_v24, %v1590_v20 }
 0x19b   :  { %746 = vmax.xlane.f32.xlu1 %v745_v39  ;;  %513 = vmax.xlane.f32.xlu0 %v512_v5  ;;  %v1607_v39 = vperm.slane %v341_v3, %v3764_v54  ;;  %v1583_v5 = vsel %vm1510_vm2, %v1582_v16, %v1581_v12  ;;  %v1596_v3 = vperm.slane %v335_v33, %v3780_v0 }
 0x19c   :  { %770 = vmax.xlane.f32.xlu2 %v769_v62  ;;  %v336_v62 = vmax.f32 %v4084_v26, 0.0  ;;  %v524_v26 = vsel %vm92_vm0, %v386_v7, -inf  ;;  %v1585_v53 = vsel %vm1514_vm3, %v4124_v1, %v1583_v5  ;;  %v1604_v12 = vsel %vm1510_vm2, %v1603_v22, %v1602_v45  ;;  %v677_v1 = vld [vmem:[%s5991_s2 + $0x40] sm:$0xff] }
 0x19d   :  { %v1609_v16 = vsel %vm1506_vm1, %v1608_v18, %v1607_v39  ;;  %v1597_v13 = vsel %vm1510_vm2, %v1596_v3, %v1595_v31  ;;  %v1636_v48 = vsel %vm1623_vm5, %v1585_v53, %v1635_v43  ;;  %v784_v39 = vsel %vm92_vm0, %v686_v52, -inf  ;;  %v687_v3 = vld [vmem:[%s5991_s2 + $0x90] sm:$0xff]  ;;  %v672_v31 = vld [vmem:[%s5991_s2 + $0x18] sm:$0xff]  ;;  %v690_v52 = vld [vmem:[%s5991_s2 + $0xa8] sm:$0xff] }
 0x19e   :  { %v4185_v30 = vpop.xlane.xlu1 %519  ;;  %v275_v19 = vpop.xlane.xlu0 %274  ;;  %v1598_v40 = vperm.slane %v336_v62, %v3784_v55  ;;  %v1611_v23 = vsel %vm1510_vm2, %v1610_v63, %v1609_v16  ;;  %v757_v8 = vsel %vm92_vm0, %v677_v1, -inf  ;;  %v1637_v5 = vsel %vm1625_vm6, %v1592_v58, %v1636_v48 }
 0x19f   :  { %v281_v27 = vpop.xlane.xlu2 %280  ;;  %v345_v59 = vmax.f32 %v275_v19, 0.0  ;;  %v787_v53 = vsel %vm92_vm0, %v687_v3, -inf  ;;  %v742_v45 = vsel %vm92_vm0, %v672_v31, -inf  ;;  %v796_v43 = vsel %vm92_vm0, %v690_v52, -inf }
 0x1a0   :  { %v347_v29 = vmax.f32 %v281_v27, 0.0  ;;  %v1599_v7 = vsel %vm1514_vm3, %v1598_v40, %v1597_v13 }
 0x1a1   :  { %v1614_v2 = vperm.slane %v345_v59, %v3764_v54  ;;  %v1606_v59 = vsel %vm1514_vm3, %v4150_v44, %v1604_v12  ;;  %v1638_v46 = vsel %vm1627_vm7, %v1599_v7, %v1637_v5  ;;  %v395_v5 = vld [vmem:[%s5990_s1 + $0x170] sm:$0xff] }
 0x1a2   :  { %v1617_v57 = vperm.slane %v347_v29, %v3780_v0  ;;  %v1639_v38 = vsel %vm1629_vm8, %v1606_v59, %v1638_v46  ;;  %v390_v29 = vld [vmem:[%s5990_s1 + $0x148] sm:$0xff]  ;;  %v683_v59 = vld [vmem:[%s5991_s2 + $0x70] sm:$0xff] }
 0x1a3   :  { %740 = vmax.xlane.f32.xlu1 %v739_v11  ;;  %525 = vmax.xlane.f32.xlu0 %v524_v26  ;;  %v1616_v18 = vsel %vm1506_vm1, %v1615_v35, %v1614_v2  ;;  %v1613_v11 = vsel %vm1514_vm3, %v1612_v34, %v1611_v23  ;;  %v536_v2 = vsel %vm92_vm0, %v390_v29, -inf  ;;  %v679_v35 = vld [vmem:[%s5991_s2 + $0x50] sm:$0xff]  ;;  %v682_v23 = vld [vmem:[%s5991_s2 + $0x68] sm:$0xff] }
 0x1a4   :  { %767 = vmax.xlane.f32.xlu2 %v766_v14  ;;  %v527_v14 = vsel %vm92_vm0, %v387_v6, -inf  ;;  %v1618_v26 = vsel %vm1510_vm2, %v1617_v57, %v1616_v18  ;;  %v1640_v44 = vsel %vm1631_vm9, %v1613_v11, %v1639_v38  ;;  %v391_v34 = vld [vmem:[%s5990_s1 + $0x150] sm:$0xff]  ;;  %v763_v58 = vsel %vm92_vm0, %v679_v35, -inf  ;;  %v394_v57 = vld [vmem:[%s5990_s1 + $0x168] sm:$0xff] }
 0x1a5   :  { %v539_v13 = vsel %vm92_vm0, %v391_v34, -inf  ;;  %v691_v6 = vld [vmem:[%s5991_s2 + $0xb0] sm:$0xff]  ;;  %v772_v18 = vsel %vm92_vm0, %v682_v23, -inf  ;;  %v551_v38 = vsel %vm92_vm0, %v395_v5, -inf  ;;  %v398_v29 = vld [vmem:[%s5990_s1 + $0x188] sm:$0xff]  ;;  %v689_v34 = vld [vmem:[%s5991_s2 + $0xa0] sm:$0xff] }
 0x1a6   :  { %v4229_v27 = vpop.xlane.xlu1 %546  ;;  %v284_v62 = vpop.xlane.xlu0 %283  ;;  %v560_v52 = vsel %vm92_vm0, %v398_v29, -inf  ;;  %v698_v35 = vld [vmem:[%s5991_s2 + $0xe8] sm:$0xff]  ;;  %v693_v29 = vld [vmem:[%s5991_s2 + $0xc0] sm:$0xff] }
 0x1a7   :  { %v4227_v33 = vpop.xlane.xlu2 %417  ;;  %v348_v19 = vmax.f32 %v284_v62, 0.0  ;;  %v820_v23 = vsel %vm92_vm0, %v698_v35, -inf  ;;  %v402_v5 = vld [vmem:[%s5990_s1 + $0x1a8] sm:$0xff] }
 0x1a9   :  { %v1619_v22 = vperm.slane %v348_v19, %v3784_v55  ;;  %v548_v19 = vsel %vm92_vm0, %v394_v57, -inf  ;;  %v793_v57 = vsel %vm92_vm0, %v689_v34, -inf }
 0x1ab   :  { %758 = vmax.xlane.f32.xlu1 %v757_v8  ;;  %528 = vmax.xlane.f32.xlu0 %v527_v14  ;;  %v1620_v24 = vsel %vm1514_vm3, %v1619_v22, %v1618_v26  ;;  %v694_v8 = vld [vmem:[%s5991_s2 + $0xc8] sm:$0xff]  ;;  %v775_v26 = vsel %vm92_vm0, %v683_v59, -inf }
 0x1ac   :  { %785 = vmax.xlane.f32.xlu2 %v784_v39  ;;  %v4253_v20 = vsel %vm1633_vm10, %v1620_v24, %v1640_v44  ;;  %v799_v39 = vsel %vm92_vm0, %v691_v6, -inf  ;;  %v808_v46 = vsel %vm92_vm0, %v694_v8, -inf  ;;  %v695_v24 = vld [vmem:[%s5991_s2 + $0xd0] sm:$0xff]  ;;  %v684_v44 = vld [vmem:[%s5991_s2 + $0x78] sm:$0xff] }
 0x1ad   :  { %6001 = vst [vmem:[#allocation3_spill] sm:$0xff] %v4253_v20  ;;  %3109 = vmatmul.msk.f32.gmra.mxu0 %vm1642_vm11, %v4253_v20 }
 0x1ae   :  { %v4265_v16 = vpop.xlane.xlu1 %543  ;;  %v4270_v63 = vpop.xlane.xlu0 %420 }
 0x1af   :  { %v4263_v40 = vpop.xlane.xlu2 %426 }
 0x1b3   :  { %743 = vmax.xlane.f32.xlu1 %v742_v45  ;;  %537 = vmax.xlane.f32.xlu0 %v536_v2  ;;  %v811_v45 = vsel %vm92_vm0, %v695_v24, -inf  ;;  %v778_v2 = vsel %vm92_vm0, %v684_v44, -inf  ;;  %v572_v24 = vsel %vm92_vm0, %v402_v5, -inf  ;;  %v701_v44 = vld [vmem:[%s5991_s2 + $0x100] sm:$0xff]  ;;  %v406_v5 = vld [vmem:[%s5990_s1 + $0x1c8] sm:$0xff] }
 0x1b4   :  { %788 = vmax.xlane.f32.xlu2 %v787_v53  ;;  %v829_v34 = vsel %vm92_vm0, %v701_v44, -inf }
 0x1b6   :  { %v4283_v12 = vpop.xlane.xlu1 %558  ;;  %v4288_v1 = vpop.xlane.xlu0 %429 }
 0x1b7   :  { %v4281_v56 = vpop.xlane.xlu2 %435 }
 0x1bb   :  { %764 = vmax.xlane.f32.xlu1 %v763_v58  ;;  %540 = vmax.xlane.f32.xlu0 %v539_v13  ;;  %v399_v13 = vld [vmem:[%s5990_s1 + $0x190] sm:$0xff] }
 0x1bc   :  { %797 = vmax.xlane.f32.xlu2 %v796_v43 }
 0x1be   :  { %v4301_v7 = vpop.xlane.xlu1 %555  ;;  %v4306_v62 = vpop.xlane.xlu0 %438 }
 0x1bf   :  { %v4299_v48 = vpop.xlane.xlu2 %444 }
 0x1c3   :  { %773 = vmax.xlane.f32.xlu1 %v772_v18  ;;  %549 = vmax.xlane.f32.xlu0 %v548_v19  ;;  %v699_v18 = vld [vmem:[%s5991_s2 + $0xf0] sm:$0xff]  ;;  %v688_v19 = vld [vmem:[%s5991_s2 + $0x98] sm:$0xff] }
 0x1c4   :  { %800 = vmax.xlane.f32.xlu2 %v799_v39  ;;  %v563_v39 = vsel %vm92_vm0, %v399_v13, -inf  ;;  %v805_v13 = vsel %vm92_vm0, %v693_v29, -inf }
 0x1c6   :  { %v4319_v11 = vpop.xlane.xlu1 %570  ;;  %v4324_v22 = vpop.xlane.xlu0 %447 }
 0x1c7   :  { %v4317_v14 = vpop.xlane.xlu2 %453 }
 0x1cb   :  { %776 = vmax.xlane.f32.xlu1 %v775_v26  ;;  %552 = vmax.xlane.f32.xlu0 %v551_v38  ;;  %v823_v26 = vsel %vm92_vm0, %v699_v18, -inf  ;;  %v790_v38 = vsel %vm92_vm0, %v688_v19, -inf }
 0x1cc   :  { %809 = vmax.xlane.f32.xlu2 %v808_v46 }
 0x1ce   :  { %v4337_v31 = vpop.xlane.xlu1 %567  ;;  %v4342_v53 = vpop.xlane.xlu0 %456 }
 0x1cf   :  { %v4335_v3 = vpop.xlane.xlu2 %462 }
 0x1d3   :  { %779 = vmax.xlane.f32.xlu1 %v778_v2  ;;  %561 = vmax.xlane.f32.xlu0 %v560_v52  ;;  %v403_v52 = vld [vmem:[%s5990_s1 + $0x1b0] sm:$0xff] }
 0x1d4   :  { %812 = vmax.xlane.f32.xlu2 %v811_v45 }
 0x1d6   :  { %v4355_v58 = vpop.xlane.xlu1 %582  ;;  %v4360_v6 = vpop.xlane.xlu0 %465 }
 0x1d7   :  { %v4353_v43 = vpop.xlane.xlu2 %471 }
 0x1db   :  { %794 = vmax.xlane.f32.xlu1 %v793_v57  ;;  %564 = vmax.xlane.f32.xlu0 %v563_v39  ;;  %v705_v57 = vld [vmem:[%s5991_s2 + $0x120] sm:$0xff]  ;;  %v692_v39 = vld [vmem:[%s5991_s2 + $0xb8] sm:$0xff] }
 0x1dc   :  { %821 = vmax.xlane.f32.xlu2 %v820_v23  ;;  %v575_v23 = vsel %vm92_vm0, %v403_v52, -inf  ;;  %v841_v44 = vsel %vm92_vm0, %v705_v57, -inf  ;;  %v802_v29 = vsel %vm92_vm0, %v692_v39, -inf  ;;  %v611_v52 = vmax.f32 %v3753_v37, 0.0 }
 0x1dd   :  { %v609_v57 = vmax.f32 %v4263_v40, 0.0  ;;  %v610_v39 = vmax.f32 %v4288_v1, 0.0  ;;  %v613_v37 = vmax.f32 %v4306_v62, 0.0  ;;  %v703_v40 = vld [vmem:[%s5991_s2 + $0x110] sm:$0xff]  ;;  %v697_v1 = vld [vmem:[%s5991_s2 + $0xe0] sm:$0xff]  ;;  %v4451_v62 = vperm.slane %v623_v9, %v3780_v0 }
 0x1de   :  { %v4373_v59 = vpop.xlane.xlu1 %579  ;;  %v4378_v46 = vpop.xlane.xlu0 %474  ;;  %v1744_v28 = vperm.slane %v611_v52, %v3780_v0  ;;  %v817_v20 = vsel %vm92_vm0, %v697_v1, -inf }
 0x1df   :  { %v4371_v8 = vpop.xlane.xlu2 %480  ;;  %v1742_v9 = vperm.slane %v610_v39, %v3794_v21 }
 0x1e3   :  { %791 = vmax.xlane.f32.xlu1 %v790_v38  ;;  %573 = vmax.xlane.f32.xlu0 %v572_v24  ;;  %v605_v38 = vmax.f32 %v3717_v61, 0.0  ;;  %v608_v24 = vmax.f32 %v3735_v17, 0.0  ;;  %v606_v61 = vmax.f32 %v4227_v33, 0.0  ;;  %v626_v17 = vmax.f32 %v3966_v50, 0.0 }
 0x1e4   :  { %824 = vmax.xlane.f32.xlu2 %v823_v26 }
 0x1e5   :  { %v4434_v25 = vperm.slane %v608_v24, %v3784_v55  ;;  %v4463_v52 = vperm.slane %v626_v17, %v3794_v21  ;;  %v621_v17 = vmax.f32 %v4335_v3, 0.0  ;;  %v625_v3 = vmax.f32 %v4378_v46, 0.0 }
 0x1e6   :  { %v4391_v2 = vpop.xlane.xlu1 %594  ;;  %v4396_v35 = vpop.xlane.xlu0 %483 }
 0x1e7   :  { %v4389_v45 = vpop.xlane.xlu2 %531 }
 0x1eb   :  { %806 = vmax.xlane.f32.xlu1 %v805_v13  ;;  %576 = vmax.xlane.f32.xlu0 %v575_v23  ;;  %v617_v13 = vmax.f32 %v3832_v32, 0.0  ;;  %v584_v23 = vsel %vm92_vm0, %v406_v5, -inf  ;;  %v607_v32 = vmax.f32 %v4270_v63, 0.0  ;;  %v4448_v63 = vperm.slane %v620_v41, %v3784_v55 }
 0x1ec   :  { %830 = vmax.xlane.f32.xlu2 %v829_v34  ;;  %v614_v34 = vmax.f32 %v3774_v10, 0.0  ;;  %v1734_v10 = vperm.slane %v605_v38, %v3764_v54  ;;  %v1735_v5 = vperm.slane %v606_v61, %v3794_v21  ;;  %v615_v38 = vmax.f32 %v4299_v48, 0.0 }
 0x1ed   :  { %v4439_v33 = vperm.slane %v617_v13, %v3764_v54  ;;  %v1741_v41 = vperm.slane %v609_v57, %v3764_v54  ;;  %v629_v48 = vmax.f32 %v3989_v60, 0.0  ;;  %v835_v61 = vsel %vm92_vm0, %v703_v40, -inf }
 0x1ee   :  { %v4409_v19 = vpop.xlane.xlu1 %591  ;;  %v4414_v26 = vpop.xlane.xlu0 %489  ;;  %v1749_v50 = vperm.slane %v614_v34, %v3794_v21  ;;  %v1748_v34 = vperm.slane %v613_v37, %v3764_v54  ;;  %v622_v57 = vmax.f32 %v4360_v6, 0.0  ;;  %v1736_v37 = vsel %vm1506_vm1, %v1735_v5, %v1734_v10 }
 0x1ef   :  { %v4407_v18 = vpop.xlane.xlu2 %749  ;;  %v618_v60 = vmax.f32 %v4317_v14, 0.0  ;;  %v1743_v40 = vsel %vm1506_vm1, %v1742_v9, %v1741_v41  ;;  %v1776_v6 = vperm.slane %v629_v48, %v3764_v54  ;;  %v631_v10 = vmax.f32 %v4007_v15, 0.0  ;;  %v696_v15 = vld [vmem:[%s5991_s2 + $0xd8] sm:$0xff] }
 0x1f0   :  { %v1750_v1 = vsel %vm1506_vm1, %v1749_v50, %v1748_v34  ;;  %v634_v5 = vmax.f32 %v4025_v42, 0.0  ;;  %v1763_v50 = vperm.slane %v622_v57, %v3794_v21  ;;  %v1745_v42 = vsel %vm1510_vm2, %v1744_v28, %v1743_v40 }
 0x1f1   :  { %v1756_v46 = vperm.slane %v618_v60, %v3794_v21  ;;  %v624_v48 = vmax.f32 %v4353_v43, 0.0  ;;  %v627_v28 = vmax.f32 %v4371_v8, 0.0 }
 0x1f3   :  { %803 = vmax.xlane.f32.xlu1 %v802_v29  ;;  %585 = vmax.xlane.f32.xlu0 %v584_v23  ;;  %v407_v29 = vld [vmem:[%s5990_s1 + $0x1d0] sm:$0xff]  ;;  %v1737_v23 = vperm.slane %v607_v32, %v3780_v0  ;;  %v616_v32 = vmax.f32 %v4324_v22, 0.0 }
 0x1f4   :  { %842 = vmax.xlane.f32.xlu2 %v841_v44  ;;  %v587_v39 = vsel %vm92_vm0, %v407_v29, -inf }
 0x1f5   :  { %v1738_v14 = vsel %vm1510_vm2, %v1737_v23, %v1736_v37  ;;  %v1753_v29 = vperm.slane %v616_v32, %v3784_v55  ;;  %v1769_v23 = vperm.slane %v625_v3, %v3764_v54  ;;  %v1772_v3 = vperm.slane %v627_v28, %v3780_v0 }
 0x1f6   :  { %v4457_v44 = vpop.xlane.xlu1 %603  ;;  %v4468_v13 = vpop.xlane.xlu0 %498  ;;  %v1740_v8 = vsel %vm1514_vm3, %v4434_v25, %v1738_v14 }
 0x1f7   :  { %v4455_v24 = vpop.xlane.xlu2 %752  ;;  %6003 = vst [vmem:[#allocation5_spill] sm:$0xff] %v4457_v44  ;;  %v612_v44 = vmax.f32 %v4281_v56, 0.0  ;;  %v619_v56 = vmax.f32 %v4342_v53, 0.0  ;;  %v630_v53 = vmax.f32 %v4414_v26, 0.0  ;;  %v410_v26 = vld [vmem:[%s5990_s1 + $0x1e8] sm:$0xff]  ;;  %v1771_v25 = vsel %vm1506_vm1, %v4463_v52, %v1769_v23 }
 0x1f8   :  { %6002 = vst [vmem:[#allocation4_spill] sm:$0xff] %v4455_v24  ;;  %v1751_v24 = vperm.slane %v615_v38, %v3780_v0  ;;  %v1762_v38 = vperm.slane %v621_v17, %v3764_v54  ;;  %v633_v17 = vmax.f32 %v4468_v13, 0.0  ;;  %v596_v43 = vsel %vm92_vm0, %v410_v26, -inf }
 0x1f9   :  { %v1746_v22 = vperm.slane %v612_v44, %v3784_v55  ;;  %v1758_v34 = vperm.slane %v619_v56, %v3780_v0  ;;  %v1777_v60 = vperm.slane %v630_v53, %v3794_v21  ;;  %v1767_v56 = vperm.slane %v624_v48, %v3784_v55 }
 0x1fa   :  { %v1752_v44 = vsel %vm1510_vm2, %v1751_v24, %v1750_v1  ;;  %v628_v24 = vmax.f32 %v4396_v35, 0.0  ;;  %v1764_v37 = vsel %vm1506_vm1, %v1763_v50, %v1762_v38  ;;  %v1757_v35 = vsel %vm1506_vm1, %v1756_v46, %v4439_v33  ;;  %v700_v50 = vld [vmem:[%s5991_s2 + $0xf8] sm:$0xff] }
 0x1fb   :  { %818 = vmax.xlane.f32.xlu1 %v817_v20  ;;  %588 = vmax.xlane.f32.xlu0 %v587_v39  ;;  %v709_v20 = vld [vmem:[%s5991_s2 + $0x140] sm:$0xff]  ;;  %v814_v39 = vsel %vm92_vm0, %v696_v15, -inf  ;;  %v1747_v40 = vsel %vm1514_vm3, %v1746_v22, %v1745_v42  ;;  %v1754_v13 = vsel %vm1514_vm3, %v1753_v29, %v1752_v44  ;;  %v1759_v1 = vsel %vm1510_vm2, %v1758_v34, %v1757_v35  ;;  %v704_v22 = vld [vmem:[%s5991_s2 + $0x118] sm:$0xff] }
 0x1fc   :  { %836 = vmax.xlane.f32.xlu2 %v835_v61  ;;  %v853_v57 = vsel %vm92_vm0, %v709_v20, -inf  ;;  %v1766_v38 = vsel %vm1510_vm2, %v4451_v62, %v1764_v37  ;;  %v1774_v14 = vperm.slane %v628_v24, %v3784_v55  ;;  %v1783_v33 = vperm.slane %v633_v17, %v3764_v54 }
 0x1fd   :  { %v635_v53 = vmax.f32 %v4043_v47, 0.0  ;;  %v1846_v62 = vsel %vm1621_vm4, %v1747_v40, %v1740_v8  ;;  %v1778_v20 = vsel %vm1506_vm1, %v1777_v60, %v1776_v6  ;;  %v1779_v15 = vperm.slane %v631_v10, %v3780_v0  ;;  %v411_v47 = vld [vmem:[%s5990_s1 + $0x1f0] sm:$0xff] }
 0x1fe   :  { %v4506_v9 = vpop.xlane.xlu1 %734  ;;  %v496_v61 = vpop.xlane.xlu0 %495  ;;  %v1784_v42 = vperm.slane %v634_v5, %v3794_v21  ;;  %v1847_v46 = vsel %vm1623_vm5, %v1754_v13, %v1846_v62  ;;  %v1761_v44 = vsel %vm1514_vm3, %v4448_v63, %v1759_v1  ;;  %v1773_v6 = vsel %vm1510_vm2, %v1772_v3, %v1771_v25  ;;  %v711_v13 = vld [vmem:[%s5991_s2 + $0x150] sm:$0xff]  ;;  %v702_v1 = vld [vmem:[%s5991_s2 + $0x108] sm:$0xff] }
 0x1ff   :  { %v4504_v41 = vpop.xlane.xlu2 %761  ;;  %v632_v32 = vmax.f32 %v496_v61, 0.0  ;;  %v838_v10 = vsel %vm92_vm0, %v704_v22, -inf  ;;  %v826_v5 = vsel %vm92_vm0, %v700_v50, -inf  ;;  %v1768_v48 = vsel %vm1514_vm3, %v1767_v56, %v1766_v38  ;;  %v685_v38 = vld [vmem:[%s5991_s2 + $0x80] sm:$0xff]  ;;  %v712_v50 = vld [vmem:[%s5991_s2 + $0x158] sm:$0xff] }
 0x200   :  { %v1775_v28 = vsel %vm1514_vm3, %v1774_v14, %v1773_v6  ;;  %v1785_v63 = vsel %vm1506_vm1, %v1784_v42, %v1783_v33  ;;  %v1780_v61 = vsel %vm1510_vm2, %v1779_v15, %v1778_v20  ;;  %v1786_v24 = vperm.slane %v635_v53, %v3780_v0  ;;  %v706_v53 = vld [vmem:[%s5991_s2 + $0x128] sm:$0xff]  ;;  %v707_v6 = vld [vmem:[%s5991_s2 + $0x130] sm:$0xff] }
 0x201   :  { %v1781_v52 = vperm.slane %v632_v32, %v3784_v55  ;;  %v599_v17 = vsel %vm92_vm0, %v411_v47, -inf  ;;  %v859_v14 = vsel %vm92_vm0, %v711_v13, -inf  ;;  %v832_v33 = vsel %vm92_vm0, %v702_v1, -inf  ;;  %v718_v47 = vld [vmem:[%s5991_s2 + $0x188] sm:$0xff] }
 0x202   :  { %v1787_v32 = vsel %vm1510_vm2, %v1786_v24, %v1785_v63  ;;  %v781_v22 = vsel %vm92_vm0, %v685_v38, -inf  ;;  %v862_v42 = vsel %vm92_vm0, %v712_v50, -inf  ;;  %v847_v63 = vsel %vm92_vm0, %v707_v6, -inf  ;;  %v710_v24 = vld [vmem:[%s5991_s2 + $0x148] sm:$0xff]  ;;  %v720_v38 = vld [vmem:[%s5991_s2 + $0x198] sm:$0xff] }
 0x203   :  { %815 = vmax.xlane.f32.xlu1 %v814_v39  ;;  %597 = vmax.xlane.f32.xlu0 %v596_v43  ;;  %v1848_v39 = vsel %vm1625_vm6, %v1761_v44, %v1847_v46  ;;  %v844_v46 = vsel %vm92_vm0, %v706_v53, -inf  ;;  %v886_v50 = vsel %vm92_vm0, %v720_v38, -inf  ;;  %v724_v53 = vld [vmem:[%s5991_s2 + $0x1b8] sm:$0xff] }
 0x204   :  { %854 = vmax.xlane.f32.xlu2 %v853_v57  ;;  %v1782_v57 = vsel %vm1514_vm3, %v1781_v52, %v1780_v61  ;;  %v1849_v60 = vsel %vm1627_vm7, %v1768_v48, %v1848_v39  ;;  %v714_v52 = vld [vmem:[%s5991_s2 + $0x168] sm:$0xff]  ;;  %v721_v61 = vld [vmem:[%s5991_s2 + $0x1a0] sm:$0xff]  ;;  %v719_v39 = vld [vmem:[%s5991_s2 + $0x190] sm:$0xff]  ;;  %v898_v6 = vsel %vm92_vm0, %v724_v53, -inf }
 0x205   :  { %v1850_v43 = vsel %vm1629_vm8, %v1775_v28, %v1849_v60  ;;  %v868_v44 = vsel %vm92_vm0, %v714_v52, -inf  ;;  %v880_v28 = vsel %vm92_vm0, %v718_v47, -inf  ;;  %v889_v60 = vsel %vm92_vm0, %v721_v61, -inf  ;;  %v713_v52 = vld [vmem:[%s5991_s2 + $0x160] sm:$0xff]  ;;  %v716_v38 = vld [vmem:[%s5991_s2 + $0x178] sm:$0xff] }
 0x206   :  { %v4554_v26 = vpop.xlane.xlu1 %737  ;;  %v508_v34 = vpop.xlane.xlu0 %507  ;;  %v1851_v40 = vsel %vm1631_vm9, %v1782_v57, %v1850_v43  ;;  %v883_v43 = vsel %vm92_vm0, %v719_v39, -inf  ;;  %v729_v39 = vld [vmem:[%s5991_s2 + $0x1e0] sm:$0xff] }
 0x207   :  { %v4552_v29 = vpop.xlane.xlu2 %755  ;;  %v636_v23 = vmax.f32 %v508_v34, 0.0 }
 0x209   :  { %v1788_v37 = vperm.slane %v636_v23, %v3784_v55 }
 0x20b   :  { %827 = vmax.xlane.f32.xlu1 %v826_v5  ;;  %600 = vmax.xlane.f32.xlu0 %v599_v17  ;;  %v1789_v8 = vsel %vm1514_vm3, %v1788_v37, %v1787_v32  ;;  %v717_v5 = vld [vmem:[%s5991_s2 + $0x180] sm:$0xff]  ;;  %v856_v32 = vsel %vm92_vm0, %v710_v24, -inf }
 0x20c   :  { %839 = vmax.xlane.f32.xlu2 %v838_v10  ;;  %v4577_v35 = vsel %vm1633_vm10, %v1789_v8, %v1851_v40  ;;  %v877_v23 = vsel %vm92_vm0, %v717_v5, -inf  ;;  %v723_v8 = vld [vmem:[%s5991_s2 + $0x1b0] sm:$0xff]  ;;  %v708_v40 = vld [vmem:[%s5991_s2 + $0x138] sm:$0xff]  ;;  %v865_v5 = vsel %vm92_vm0, %v713_v52, -inf }
 0x20d   :  { %6004 = vst [vmem:[#allocation6_spill] sm:$0xff] %v4577_v35  ;;  %3110 = vmatmul.msk.f32.vlgmr.msra.gmra.mxu1 %vm1642_vm11, %v4577_v35  ;;  %v648_v35 = vmax.f32 %v4265_v16, 0.0 }
 0x20e   :  { %v4589_v3 = vpop.xlane.xlu1 %746  ;;  %v4594_v25 = vpop.xlane.xlu0 %513 }
 0x20f   :  { %v4587_v56 = vpop.xlane.xlu2 %770 }
 0x213   :  { %833 = vmax.xlane.f32.xlu1 %v832_v33  ;;  %782 = vmax.xlane.f32.xlu0 %v781_v22  ;;  %v895_v33 = vsel %vm92_vm0, %v723_v8, -inf  ;;  %v850_v22 = vsel %vm92_vm0, %v708_v40, -inf  ;;  %v913_v8 = vsel %vm92_vm0, %v729_v39, -inf  ;;  %v732_v40 = vld [vmem:[%s5991_s2 + $0x1f8] sm:$0xff]  ;;  %v990_v39 = vld [vmem:[%s5992_s3 + $0x8] sm:$0xff] }
 0x214   :  { %860 = vmax.xlane.f32.xlu2 %v859_v14  ;;  %v922_v52 = vsel %vm92_vm0, %v732_v40, -inf  ;;  %v1056_v40 = vsel %vm92_vm0, %v990_v39, -inf  ;;  %v639_v39 = vmax.f32 %v4097_v49, 0.0  ;;  %v657_v49 = vmax.f32 %v4319_v11, 0.0 }
 0x216   :  { %v4607_v20 = vpop.xlane.xlu1 %740  ;;  %v4612_v15 = vpop.xlane.xlu0 %525  ;;  %v4779_v16 = vperm.slane %v639_v39, %v3780_v0 }
 0x217   :  { %v4605_v62 = vpop.xlane.xlu2 %767 }
 0x21b   :  { %845 = vmax.xlane.f32.xlu1 %v844_v46  ;;  %869 = vmax.xlane.f32.xlu0 %v868_v44  ;;  %v726_v44 = vld [vmem:[%s5991_s2 + $0x1c8] sm:$0xff] }
 0x21c   :  { %863 = vmax.xlane.f32.xlu2 %v862_v42 }
 0x21e   :  { %v4625_v10 = vpop.xlane.xlu1 %758  ;;  %v4630_v48 = vpop.xlane.xlu0 %528 }
 0x21f   :  { %v4623_v34 = vpop.xlane.xlu2 %785 }
 0x223   :  { %848 = vmax.xlane.f32.xlu1 %v847_v63  ;;  %878 = vmax.xlane.f32.xlu0 %v877_v23  ;;  %v730_v63 = vld [vmem:[%s5991_s2 + $0x1e8] sm:$0xff]  ;;  %v715_v23 = vld [vmem:[%s5991_s2 + $0x170] sm:$0xff] }
 0x224   :  { %881 = vmax.xlane.f32.xlu2 %v880_v28  ;;  %v904_v28 = vsel %vm92_vm0, %v726_v44, -inf  ;;  %v874_v44 = vsel %vm92_vm0, %v716_v38, -inf  ;;  %v995_v38 = vld [vmem:[%s5992_s3 + $0x30] sm:$0xff] }
 0x226   :  { %v4643_v57 = vpop.xlane.xlu1 %743  ;;  %v4648_v37 = vpop.xlane.xlu0 %537 }
 0x227   :  { %v4641_v17 = vpop.xlane.xlu2 %788 }
 0x22b   :  { %857 = vmax.xlane.f32.xlu1 %v856_v32  ;;  %884 = vmax.xlane.f32.xlu0 %v883_v43  ;;  %v916_v32 = vsel %vm92_vm0, %v730_v63, -inf  ;;  %v871_v43 = vsel %vm92_vm0, %v715_v23, -inf }
 0x22c   :  { %890 = vmax.xlane.f32.xlu2 %v889_v60 }
 0x22e   :  { %v4661_v1 = vpop.xlane.xlu1 %764  ;;  %v4666_v14 = vpop.xlane.xlu0 %540 }
 0x22f   :  { %v4659_v13 = vpop.xlane.xlu2 %797 }
 0x233   :  { %851 = vmax.xlane.f32.xlu1 %v850_v22  ;;  %887 = vmax.xlane.f32.xlu0 %v886_v50  ;;  %v731_v50 = vld [vmem:[%s5991_s2 + $0x1f0] sm:$0xff] }
 0x234   :  { %896 = vmax.xlane.f32.xlu2 %v895_v33 }
 0x236   :  { %v4679_v46 = vpop.xlane.xlu1 %773  ;;  %v4684_v47 = vpop.xlane.xlu0 %549 }
 0x237   :  { %v4677_v42 = vpop.xlane.xlu2 %800 }
 0x23b   :  { %866 = vmax.xlane.f32.xlu1 %v865_v5  ;;  %905 = vmax.xlane.f32.xlu0 %v904_v28  ;;  %v993_v5 = vld [vmem:[%s5992_s3 + $0x20] sm:$0xff]  ;;  %v722_v28 = vld [vmem:[%s5991_s2 + $0x1a8] sm:$0xff] }
 0x23c   :  { %899 = vmax.xlane.f32.xlu2 %v898_v6  ;;  %v919_v6 = vsel %vm92_vm0, %v731_v50, -inf  ;;  %v725_v50 = vld [vmem:[%s5991_s2 + $0x1c0] sm:$0xff] }
 0x23e   :  { %v4697_v24 = vpop.xlane.xlu1 %776  ;;  %v4702_v60 = vpop.xlane.xlu0 %552 }
 0x23f   :  { %v4695_v61 = vpop.xlane.xlu2 %809 }
 0x243   :  { %872 = vmax.xlane.f32.xlu1 %v871_v43  ;;  %914 = vmax.xlane.f32.xlu0 %v913_v8  ;;  %v1065_v43 = vsel %vm92_vm0, %v993_v5, -inf  ;;  %v892_v8 = vsel %vm92_vm0, %v722_v28, -inf  ;;  %v991_v5 = vld [vmem:[%s5992_s3 + $0x10] sm:$0xff]  ;;  %v641_v28 = vmax.f32 %v4079_v4, 0.0  ;;  %v652_v4 = vmax.f32 %v4301_v7, 0.0 }
 0x244   :  { %917 = vmax.xlane.f32.xlu2 %v916_v32 }
 0x246   :  { %v4715_v22 = vpop.xlane.xlu1 %779  ;;  %v4720_v53 = vpop.xlane.xlu0 %561 }
 0x247   :  { %v4713_v33 = vpop.xlane.xlu2 %812  ;;  %6006 = vst [vmem:[#allocation8_spill] sm:$0xff] %v4715_v22  ;;  %v653_v22 = vmax.f32 %v4283_v12, 0.0 }
 0x248   :  { %6005 = vst [vmem:[#allocation7_spill] sm:$0xff] %v4713_v33 }
 0x24b   :  { %875 = vmax.xlane.f32.xlu1 %v874_v44  ;;  %920 = vmax.xlane.f32.xlu0 %v919_v6 }
 0x24c   :  { %923 = vmax.xlane.f32.xlu2 %v922_v52  ;;  %v637_v52 = vmax.f32 %v4061_v51, 0.0  ;;  %v649_v51 = vmax.f32 %v4229_v27, 0.0  ;;  %v4776_v27 = vperm.slane %v641_v28, %v3764_v54  ;;  %v644_v28 = vmax.f32 %v4389_v45, 0.0 }
 0x24e   :  { %v4733_v23 = vpop.xlane.xlu1 %794  ;;  %v4738_v32 = vpop.xlane.xlu0 %564  ;;  %v4773_v33 = vperm.slane %v637_v52, %v3764_v54  ;;  %v4788_v11 = vperm.slane %v649_v51, %v3764_v54  ;;  %v992_v52 = vld [vmem:[%s5992_s3 + $0x18] sm:$0xff]  ;;  %v665_v51 = vmax.f32 %v4391_v2, 0.0  ;;  %v932_v2 = vmax.f32 %v4552_v29, 0.0 }
 0x24f   :  { %v4731_v63 = vpop.xlane.xlu2 %821  ;;  %6007 = vst [vmem:[#allocation9_spill] sm:$0xff] %v4733_v23  ;;  %v901_v23 = vsel %vm92_vm0, %v725_v50, -inf  ;;  %v4800_v50 = vperm.slane %v657_v49, %v3764_v54  ;;  %v664_v49 = vmax.f32 %v4409_v19, 0.0 }
 0x251   :  { %6010 = vst [vmem:[#allocation12_spill] sm:$0xff] %v4800_v50  ;;  %v925_v50 = vmax.f32 %v4506_v9, 0.0  ;;  %v4847_v9 = vperm.slane %v665_v51, %v3764_v54  ;;  %v4862_v51 = vperm.slane %v932_v2, %v3784_v55 }
 0x253   :  { %893 = vmax.xlane.f32.xlu1 %v892_v8  ;;  %1057 = vmax.xlane.f32.xlu0 %v1056_v40  ;;  %v640_v8 = vmax.f32 %v4185_v30, 0.0  ;;  %v656_v30 = vmax.f32 %v4337_v31, 0.0  ;;  %v4791_v31 = vperm.slane %v648_v35, %v3784_v55 }
 0x254   :  { %1066 = vmax.xlane.f32.xlu2 %v1065_v43  ;;  %v645_v43 = vmax.f32 %v4139_v36, 0.0  ;;  %v1059_v36 = vsel %vm92_vm0, %v991_v5, -inf  ;;  %v660_v5 = vmax.f32 %v4373_v59, 0.0  ;;  %v6015_v59 = vld [vmem:[#allocation5_spill] sm:$0xff] }
 0x255   :  { %v4785_v7 = vperm.slane %v640_v8, %v3784_v55  ;;  %v4809_v35 = vperm.slane %v656_v30, %v3784_v55  ;;  %v998_v8 = vld [vmem:[%s5992_s3 + $0x48] sm:$0xff]  ;;  %v668_v45 = vmax.f32 %v6015_v59, 0.0  ;;  %v999_v59 = vld [vmem:[%s5992_s3 + $0x50] sm:$0xff] }
 0x256   :  { %v4752_v6 = vpop.xlane.xlu1 %791  ;;  %v4761_v40 = vpop.xlane.xlu0 %573  ;;  %v4782_v12 = vperm.slane %v645_v43, %v3764_v54  ;;  %v1080_v19 = vsel %vm92_vm0, %v998_v8, -inf  ;;  %v2095_v8 = vperm.slane %v925_v50, %v3764_v54  ;;  %v933_v50 = vmax.f32 %v4625_v10, 0.0 }
 0x257   :  { %v4750_v44 = vpop.xlane.xlu2 %824  ;;  %6009 = vst [vmem:[#allocation11_spill] sm:$0xff] %v4752_v6  ;;  %v1071_v6 = vsel %vm92_vm0, %v995_v38, -inf  ;;  %v4794_v38 = vperm.slane %v653_v22, %v3764_v54  ;;  %v661_v22 = vmax.f32 %v4355_v58, 0.0  ;;  %v935_v10 = vmax.f32 %v4661_v1, 0.0 }
 0x258   :  { %6008 = vst [vmem:[#allocation10_spill] sm:$0xff] %v4750_v44  ;;  %v4839_v44 = vperm.slane %v660_v5, %v3784_v55  ;;  %v2109_v1 = vperm.slane %v933_v50, %v3764_v54 }
 0x259   :  { %6011 = vst [vmem:[#allocation13_spill] sm:$0xff] %v4809_v35 }
 0x25b   :  { %902 = vmax.xlane.f32.xlu1 %v901_v23  ;;  %1060 = vmax.xlane.f32.xlu0 %v1059_v36  ;;  %v4797_v23 = vperm.slane %v652_v4, %v3784_v55  ;;  %v930_v4 = vmax.f32 %v4407_v18, 0.0  ;;  %v6014_v36 = vld [vmem:[#allocation4_spill] sm:$0xff]  ;;  %v929_v18 = vmax.f32 %v4589_v3, 0.0  ;;  %v642_v3 = vmax.f32 %v4612_v15, 0.0 }
 0x25c   :  { %1072 = vmax.xlane.f32.xlu2 %v1071_v6  ;;  %v727_v6 = vld [vmem:[%s5991_s2 + $0x1d0] sm:$0xff]  ;;  %v931_v58 = vmax.f32 %v6014_v36, 0.0  ;;  %v4836_v36 = vperm.slane %v661_v22, %v3764_v54  ;;  %v4852_v22 = vperm.slane %v664_v49, %v3784_v55 }
 0x25d   :  { %v907_v35 = vsel %vm92_vm0, %v727_v6, -inf  ;;  %v4844_v6 = vperm.slane %v644_v28, %v3784_v55  ;;  %v2103_v29 = vperm.slane %v930_v4, %v3794_v21  ;;  %v2102_v15 = vperm.slane %v929_v18, %v3764_v54 }
 0x25e   :  { %v4816_v43 = vpop.xlane.xlu1 %806  ;;  %v4825_v30 = vpop.xlane.xlu0 %576  ;;  %v2105_v5 = vperm.slane %v931_v58, %v3780_v0  ;;  %v1798_v2 = vperm.slane %v642_v3, %v3794_v21  ;;  %v928_v18 = vmax.f32 %v4643_v57, 0.0  ;;  %v647_v3 = vmax.f32 %v4666_v14, 0.0 }
 0x25f   :  { %v4814_v39 = vpop.xlane.xlu2 %830  ;;  %6013 = vst [vmem:[#allocation15_spill] sm:$0xff] %v4816_v43  ;;  %v1062_v43 = vsel %vm92_vm0, %v992_v52, -inf  ;;  %v638_v52 = vmax.f32 %v4594_v25, 0.0  ;;  %v643_v25 = vmax.f32 %v4630_v48, 0.0  ;;  %v1083_v57 = vsel %vm92_vm0, %v999_v59, -inf }
 0x260   :  { %6012 = vst [vmem:[#allocation14_spill] sm:$0xff] %v4814_v39  ;;  %v934_v39 = vmax.f32 %v4504_v41, 0.0  ;;  %v926_v41 = vmax.f32 %v4554_v26, 0.0  ;;  %v4856_v26 = vperm.slane %v668_v45, %v3784_v55  ;;  %v937_v45 = vmax.f32 %v4587_v56, 0.0 }
 0x261   :  { %v1791_v4 = vperm.slane %v638_v52, %v3794_v21  ;;  %v936_v56 = vmax.f32 %v4605_v62, 0.0 }
 0x262   :  { %6016 = vst [vmem:[#allocation4_spill] sm:$0xff] %v4856_v26  ;;  %v2110_v28 = vperm.slane %v934_v39, %v3794_v21  ;;  %v2096_v48 = vperm.slane %v926_v41, %v3794_v21  ;;  %v927_v39 = vmax.f32 %v4607_v20, 0.0  ;;  %v1800_v20 = vperm.slane %v643_v25, %v3780_v0 }
 0x263   :  { %908 = vmax.xlane.f32.xlu1 %v907_v35  ;;  %1081 = vmax.xlane.f32.xlu0 %v1080_v19  ;;  %v1001_v35 = vld [vmem:[%s5992_s3 + $0x60] sm:$0xff]  ;;  %v646_v19 = vmax.f32 %v4648_v37, 0.0  ;;  %v1792_v26 = vsel %vm1506_vm1, %v1791_v4, %v4773_v33  ;;  %v4906_v14 = vperm.slane %v937_v45, %v3764_v54  ;;  %v650_v4 = vmax.f32 %v4684_v47, 0.0  ;;  %v1000_v47 = vld [vmem:[%s5992_s3 + $0x58] sm:$0xff] }
 0x264   :  { %1063 = vmax.xlane.f32.xlu2 %v1062_v43  ;;  %v728_v43 = vld [vmem:[%s5991_s2 + $0x1d8] sm:$0xff]  ;;  %v1089_v52 = vsel %vm92_vm0, %v1001_v35, -inf  ;;  %v2097_v37 = vsel %vm1506_vm1, %v2096_v48, %v2095_v8  ;;  %v2098_v25 = vperm.slane %v927_v39, %v3780_v0  ;;  %v1799_v35 = vsel %vm1506_vm1, %v1798_v2, %v4776_v27  ;;  %v1003_v39 = vld [vmem:[%s5992_s3 + $0x70] sm:$0xff]  ;;  %s3250_s2 = smov 120  }
 0x265   :  { %v1805_v62 = vperm.slane %v646_v19, %v3794_v21  ;;  %v1801_v33 = vsel %vm1510_vm2, %v1800_v20, %v1799_v35  ;;  %v2114_v27 = vperm.slane %v936_v56, %v3784_v55  ;;  %v1807_v48 = vperm.slane %v647_v3, %v3780_v0 }
 0x266   :  { %v4877_v58 = vpop.xlane.xlu1 %803  ;;  %v4886_v41 = vpop.xlane.xlu0 %585  ;;  %v2099_v50 = vsel %vm1510_vm2, %v2098_v25, %v2097_v37  ;;  %v1803_v45 = vsel %vm1514_vm3, %v4844_v6, %v1801_v33  ;;  %v943_v2 = vmax.f32 %v4641_v17, 0.0  ;;  %v1095_v20 = vsel %vm92_vm0, %v1003_v39, -inf  ;;  %v1004_v33 = vld [vmem:[%s5992_s3 + $0x78] sm:$0xff] }
 0x267   :  { %v4875_v49 = vpop.xlane.xlu2 %842  ;;  %6018 = vst [vmem:[#allocation16_spill] sm:$0xff] %v4877_v58  ;;  %v2104_v58 = vsel %vm1506_vm1, %v2103_v29, %v2102_v15  ;;  %v2100_v29 = vperm.slane %v928_v18, %v3784_v55  ;;  %v2112_v15 = vperm.slane %v935_v10, %v3780_v0  ;;  %v1812_v6 = vperm.slane %v650_v4, %v3794_v21 }
 0x268   :  { %6017 = vst [vmem:[#allocation5_spill] sm:$0xff] %v4875_v49  ;;  %v910_v49 = vsel %vm92_vm0, %v728_v43, -inf  ;;  %v2106_v8 = vsel %vm1510_vm2, %v2105_v5, %v2104_v58  ;;  %v1794_v43 = vsel %vm1510_vm2, %v4779_v16, %v1792_v26  ;;  %v989_v5 = vld [vmem:[%s5992_s3] sm:$0xff]  ;;  %v2111_v16 = vsel %vm1506_vm1, %v2110_v28, %v2109_v1 }
 0x269   :  { %v651_v26 = vmax.f32 %v4702_v60, 0.0  ;;  %v2101_v18 = vsel %vm1514_vm3, %v2100_v29, %v2099_v50  ;;  %v946_v60 = vmax.f32 %v4659_v13, 0.0  ;;  %v2113_v19 = vsel %vm1510_vm2, %v2112_v15, %v2111_v16  ;;  %v994_v15 = vld [vmem:[%s5992_s3 + $0x28] sm:$0xff] }
 0x26a   :  { %v1053_v10 = vsel %vm92_vm0, %v989_v5, -inf  ;;  %v654_v17 = vmax.f32 %v4720_v53, 0.0  ;;  %v1086_v56 = vsel %vm92_vm0, %v1000_v47, -inf  ;;  %v2108_v13 = vsel %vm1514_vm3, %v4862_v51, %v2106_v8 }
 0x26b   :  { %911 = vmax.xlane.f32.xlu1 %v910_v49  ;;  %1084 = vmax.xlane.f32.xlu0 %v1083_v57  ;;  %v942_v49 = vmax.f32 %v4623_v34, 0.0  ;;  %v1806_v34 = vsel %vm1506_vm1, %v1805_v62, %v4782_v12  ;;  %v1796_v12 = vsel %vm1514_vm3, %v4785_v7, %v1794_v43  ;;  %v1814_v57 = vperm.slane %v651_v26, %v3780_v0 }
 0x26c   :  { %1090 = vmax.xlane.f32.xlu2 %v1089_v52  ;;  %v1808_v52 = vsel %vm1510_vm2, %v1807_v48, %v1806_v34  ;;  %v1853_v37 = vsel %vm1621_vm4, %v1803_v45, %v1796_v12  ;;  %v4955_v25 = vperm.slane %v943_v2, %v3780_v0  ;;  %v938_v53 = vmax.f32 %v4679_v46, 0.0  ;;  %v6021_v12 = vld [vmem:[#allocation12_spill] sm:$0xff] }
 0x26d   :  { %v4948_v3 = vperm.slane %v942_v49, %v3794_v21  ;;  %v655_v1 = vmax.f32 %v4738_v32, 0.0  ;;  %v4960_v7 = vsel %vm1621_vm4, %v2108_v13, %v2101_v18  ;;  %v4963_v35 = vperm.slane %v946_v60, %v3794_v21  ;;  %v6019_v18 = vld [vmem:[#allocation10_spill] sm:$0xff] }
 0x26e   :  { %v819_v59 = vpop.xlane.xlu1 %818  ;;  %v589_v28 = vpop.xlane.xlu0 %588  ;;  %v4966_v51 = vsel %vm1514_vm3, %v2114_v27, %v2113_v19  ;;  %v1810_v29 = vsel %vm1514_vm3, %v4791_v31, %v1808_v52  ;;  %v947_v62 = vmax.f32 %v4677_v42, 0.0  ;;  %v1813_v46 = vsel %vm1506_vm1, %v1812_v6, %v4788_v11 }
 0x26f   :  { %v4926_v58 = vpop.xlane.xlu2 %836  ;;  %v1819_v32 = vperm.slane %v654_v17, %v3794_v21  ;;  %v658_v8 = vmax.f32 %v4761_v40, 0.0  ;;  %v1815_v31 = vsel %vm1510_vm2, %v1814_v57, %v1813_v46  ;;  %v954_v43 = vmax.f32 %v4731_v63, 0.0  ;;  %v1006_v40 = vld [vmem:[%s5992_s3 + $0x88] sm:$0xff] }
 0x270   :  { %v659_v42 = vmax.f32 %v4825_v30, 0.0  ;;  %v662_v11 = vmax.f32 %v4886_v41, 0.0  ;;  %v2117_v4 = vperm.slane %v938_v53, %v3794_v21  ;;  %v1821_v39 = vperm.slane %v655_v1, %v3780_v0  ;;  %v6020_v17 = vld [vmem:[#allocation7_spill] sm:$0xff]  ;;  %v6022_v53 = vld [vmem:[#allocation13_spill] sm:$0xff] }
 0x271   :  { %v953_v5 = vmax.f32 %v819_v59, 0.0  ;;  %v663_v50 = vmax.f32 %v589_v28, 0.0  ;;  %v950_v63 = vmax.f32 %v4695_v61, 0.0  ;;  %v939_v30 = vmax.f32 %v4697_v24, 0.0  ;;  %v1010_v57 = vld [vmem:[%s5992_s3 + $0xa8] sm:$0xff] }
 0x272   :  { %v1098_v41 = vsel %vm92_vm0, %v1004_v33, -inf  ;;  %v1068_v16 = vsel %vm92_vm0, %v994_v15, -inf  ;;  %v1817_v26 = vsel %vm1514_vm3, %v4797_v23, %v1815_v31  ;;  %v1820_v47 = vsel %vm1506_vm1, %v1819_v32, %v4794_v38  ;;  %v1009_v33 = vld [vmem:[%s5992_s3 + $0xa0] sm:$0xff] }
 0x273   :  { %1054 = vmax.xlane.f32.xlu1 %v1053_v10  ;;  %1087 = vmax.xlane.f32.xlu0 %v1086_v56  ;;  %v1826_v45 = vperm.slane %v658_v8, %v3794_v21  ;;  %v1104_v59 = vsel %vm92_vm0, %v1006_v40, -inf  ;;  %v2145_v2 = vperm.slane %v954_v43, %v3794_v21  ;;  %v955_v61 = vmax.f32 %v6019_v18, 0.0  ;;  %v6023_v40 = vld [vmem:[#allocation8_spill] sm:$0xff]  ;;  %v6026_v18 = vld [vmem:[#allocation15_spill] sm:$0xff] }
 0x274   :  { %1096 = vmax.xlane.f32.xlu2 %v1095_v20  ;;  %v1828_v24 = vperm.slane %v659_v42, %v3780_v0  ;;  %v1833_v34 = vperm.slane %v662_v11, %v3794_v21  ;;  %v1822_v28 = vsel %vm1510_vm2, %v1821_v39, %v1820_v47  ;;  %v2144_v60 = vperm.slane %v953_v5, %v3764_v54 }
 0x275   :  { %v1835_v23 = vperm.slane %v663_v50, %v3780_v0  ;;  %v1854_v38 = vsel %vm1623_vm5, %v1810_v29, %v1853_v37  ;;  %v5013_v20 = vperm.slane %v947_v62, %v3780_v0  ;;  %v2118_v10 = vsel %vm1506_vm1, %v2117_v4, %v4906_v14  ;;  %v997_v37 = vld [vmem:[%s5992_s3 + $0x40] sm:$0xff]  ;;  %v6024_v50 = vld [vmem:[#allocation9_spill] sm:$0xff] }
 0x276   :  { %v4987_v48 = vpop.xlane.xlu1 %815  ;;  %v598_v49 = vpop.xlane.xlu0 %597  ;;  %v5018_v52 = vperm.slane %v950_v63, %v3794_v21  ;;  %v2119_v6 = vperm.slane %v939_v30, %v3780_v0  ;;  %v951_v56 = vmax.f32 %v6020_v17, 0.0  ;;  %v1827_v13 = vsel %vm1506_vm1, %v1826_v45, %v6021_v12  ;;  %v1013_v12 = vld [vmem:[%s5992_s3 + $0xc0] sm:$0xff] }
 0x277   :  { %v4985_v27 = vpop.xlane.xlu2 %854  ;;  %v666_v19 = vmax.f32 %v598_v49, 0.0  ;;  %v1855_v14 = vsel %vm1625_vm6, %v1817_v26, %v1854_v38  ;;  %v1824_v1 = vsel %vm1514_vm3, %v6022_v53, %v1822_v28  ;;  %v2147_v29 = vperm.slane %v955_v61, %v3780_v0  ;;  %v6027_v38 = vld [vmem:[#allocation4_spill] sm:$0xff] }
 0x278   :  { %v1829_v62 = vsel %vm1510_vm2, %v1828_v24, %v1827_v13  ;;  %v1834_v46 = vsel %vm1506_vm1, %v1833_v34, %v4836_v36  ;;  %v2146_v15 = vsel %vm1506_vm1, %v2145_v2, %v2144_v60  ;;  %v940_v4 = vmax.f32 %v6023_v40, 0.0  ;;  %v1011_v53 = vld [vmem:[%s5992_s3 + $0xb0] sm:$0xff] }
 0x279   :  { %v1836_v31 = vsel %vm1510_vm2, %v1835_v23, %v1834_v46  ;;  %v1840_v43 = vperm.slane %v666_v19, %v3794_v21  ;;  %v1116_v5 = vsel %vm92_vm0, %v1010_v57, -inf  ;;  %v1077_v36 = vsel %vm92_vm0, %v997_v37, -inf }
 0x27a   :  { %v945_v49 = vmax.f32 %v6024_v50, 0.0  ;;  %v1113_v30 = vsel %vm92_vm0, %v1009_v33, -inf  ;;  %v1838_v47 = vsel %vm1514_vm3, %v4852_v22, %v1836_v31  ;;  %v1856_v45 = vsel %vm1627_vm7, %v1824_v1, %v1855_v14  ;;  %v996_v14 = vld [vmem:[%s5992_s3 + $0x38] sm:$0xff] }
 0x27b   :  { %1069 = vmax.xlane.f32.xlu1 %v1068_v16  ;;  %1105 = vmax.xlane.f32.xlu0 %v1104_v59  ;;  %v2148_v16 = vsel %vm1510_vm2, %v2147_v29, %v2146_v15  ;;  %v6025_v59 = vld [vmem:[#allocation14_spill] sm:$0xff]  ;;  %v949_v61 = vmax.f32 %v6026_v18, 0.0  ;;  %v1841_v24 = vsel %vm1506_vm1, %v1840_v43, %v4847_v9  ;;  %v959_v28 = vmax.f32 %v4926_v58, 0.0 }
 0x27c   :  { %1099 = vmax.xlane.f32.xlu2 %v1098_v41  ;;  %v1831_v41 = vsel %vm1514_vm3, %v4839_v44, %v1829_v62  ;;  %v957_v2 = vmax.f32 %v6025_v59, 0.0  ;;  %v2120_v44 = vsel %vm1510_vm2, %v2119_v6, %v2118_v10  ;;  %v2140_v23 = vperm.slane %v951_v56, %v3780_v0  ;;  %v6028_v6 = vld [vmem:[#allocation11_spill] sm:$0xff]  ;;  %v6029_v62 = vld [vmem:[#allocation16_spill] sm:$0xff] }
 0x27d   :  { %v1857_v60 = vsel %vm1629_vm8, %v1831_v41, %v1856_v45  ;;  %v2121_v10 = vperm.slane %v940_v4, %v3784_v55  ;;  %v2130_v58 = vperm.slane %v945_v49, %v3764_v54  ;;  %v944_v13 = vmax.f32 %v6028_v6, 0.0  ;;  %v6030_v49 = vld [vmem:[#allocation5_spill] sm:$0xff]  ;;  %v1015_v59 = vld [vmem:[%s5992_s3 + $0xd0] sm:$0xff] }
 0x27e   :  { %v828_v8 = vpop.xlane.xlu1 %827  ;;  %v601_v11 = vpop.xlane.xlu0 %600  ;;  %v1858_v17 = vsel %vm1631_vm9, %v1838_v47, %v1857_v60  ;;  %v2151_v1 = vperm.slane %v957_v2, %v3764_v54  ;;  %v2137_v29 = vperm.slane %v949_v61, %v3764_v54  ;;  %v948_v46 = vmax.f32 %v6029_v62, 0.0  ;;  %v1018_v62 = vld [vmem:[%s5992_s3 + $0xe8] sm:$0xff] }
 0x27f   :  { %v840_v32 = vpop.xlane.xlu2 %839  ;;  %v956_v42 = vmax.f32 %v828_v8, 0.0  ;;  %v667_v39 = vmax.f32 %v601_v11, 0.0  ;;  %v2154_v33 = vperm.slane %v959_v28, %v3780_v0  ;;  %v952_v15 = vmax.f32 %v4987_v48, 0.0 }
 0x280   :  { %v960_v19 = vmax.f32 %v840_v32, 0.0  ;;  %v1125_v43 = vsel %vm92_vm0, %v1013_v12, -inf  ;;  %v1074_v40 = vsel %vm92_vm0, %v996_v14, -inf  ;;  %v1119_v4 = vsel %vm92_vm0, %v1011_v53, -inf  ;;  %v1664_v14 = vpop.f32.mrf.mxu0  ;;  %v1016_v53 = vld [vmem:[%s5992_s3 + $0xd8] sm:$0xff] }
 0x281   :  { %v2149_v63 = vperm.slane %v956_v42, %v3784_v55  ;;  %v1842_v26 = vperm.slane %v667_v39, %v3780_v0  ;;  %v2122_v39 = vsel %vm1514_vm3, %v2121_v10, %v2120_v44  ;;  %v2139_v50 = vsel %vm1506_vm1, %v5018_v52, %v2137_v29  ;;  %v1012_v44 = vld [vmem:[%s5992_s3 + $0xb8] sm:$0xff] }
 0x282   :  { %v2156_v42 = vperm.slane %v960_v19, %v3784_v55  ;;  %v2208_v52 = vsel %vm1623_vm5, %v4966_v51, %v4960_v7  ;;  %v2141_v61 = vsel %vm1510_vm2, %v2140_v23, %v2139_v50 }
 0x283   :  { %v5061_v34 = vsel %vm1514_vm3, %v2149_v63, %v2148_v16  ;;  %1078 = vmax.xlane.f32.xlu1 %v1077_v36  ;;  %1114 = vmax.xlane.f32.xlu0 %v1113_v30  ;;  %v1843_v22 = vsel %vm1510_vm2, %v1842_v26, %v1841_v24  ;;  %v2128_v36 = vperm.slane %v944_v13, %v3784_v55  ;;  %v961_v63 = vmax.f32 %v6030_v49, 0.0  ;;  %v6031_v16 = vld [vmem:[#allocation6_spill] sm:$0xff] }
 0x284   :  { %1117 = vmax.xlane.f32.xlu2 %v1116_v5  ;;  %v1845_v9 = vsel %vm1514_vm3, %v6027_v38, %v1843_v22  ;;  %v2132_v5 = vsel %vm1506_vm1, %v4963_v35, %v2130_v58  ;;  %v2135_v30 = vperm.slane %v948_v46, %v3784_v55  ;;  %v2142_v26 = vperm.slane %v952_v15, %v3784_v55  ;;  %v1021_v49 = vld [vmem:[%s5992_s3 + $0x100] sm:$0xff] }
 0x285   :  { %v1859_v56 = vsel %vm1633_vm10, %v1845_v9, %v1858_v17  ;;  %v2209_v18 = vsel %vm1625_vm6, %v2122_v39, %v2208_v52  ;;  %v2158_v28 = vperm.slane %v961_v63, %v3764_v54  ;;  %v1131_v9 = vsel %vm92_vm0, %v1015_v59, -inf }
 0x286   :  { %v834_v37 = vpop.xlane.xlu1 %833  ;;  %3111 = vmatmul.msk.f32.gmra.mxu1 %vm1642_vm11, %v1859_v56  ;;  %3112 = vmatpush.xpose.msk.msra.mxu2 %vm1642_vm11, %v1859_v56  ;;  %v783_v8 = vpop.xlane.xlu0 %782  ;;  %v2143_v38 = vsel %vm1514_vm3, %v2142_v26, %v2141_v61  ;;  %v1122_v58 = vsel %vm92_vm0, %v1012_v44, -inf  ;;  %v6033_v56 = vld [vmem:[#allocation2_spill] sm:$0xff] }
 0x287   :  { %v5077_v57 = vpop.xlane.xlu2 %860  ;;  %v958_v32 = vmax.f32 %v834_v37, 0.0  ;;  %v941_v31 = vmax.f32 %v783_v8, 0.0 }
 0x289   :  { %v2152_v11 = vperm.slane %v958_v32, %v3794_v21  ;;  %v2123_v48 = vperm.slane %v941_v31, %v3764_v54 }
 0x28a   :  { %3113 = vmatpush.xpose.msk.msra.mxu2 %vm1642_vm11, %v6031_v16 }
 0x28b   :  { %v2153_v41 = vsel %vm1506_vm1, %v2152_v11, %v2151_v1  ;;  %v2125_v47 = vsel %vm1506_vm1, %v4948_v3, %v2123_v48  ;;  %1075 = vmax.xlane.f32.xlu1 %v1074_v40  ;;  %1120 = vmax.xlane.f32.xlu0 %v1119_v4  ;;  %v2134_v3 = vsel %vm1510_vm2, %v5013_v20, %v2132_v5  ;;  %v6032_v20 = vld [vmem:[#allocation3_spill] sm:$0xff]  ;;  %v1140_v11 = vsel %vm92_vm0, %v1018_v62, -inf  ;;  %v1667_v48 = vpop.f32.mrf.mxu0 }
 0x28c   :  { %1126 = vmax.xlane.f32.xlu2 %v1125_v43  ;;  %v2155_v35 = vsel %vm1510_vm2, %v2154_v33, %v2153_v41  ;;  %v2127_v45 = vsel %vm1510_vm2, %v4955_v25, %v2125_v47  ;;  %v1002_v25 = vld [vmem:[%s5992_s3 + $0x68] sm:$0xff]  ;;  %v2136_v22 = vsel %vm1514_vm3, %v2135_v30, %v2134_v3  ;;  %v1134_v33 = vsel %vm92_vm0, %v1016_v53, -inf  ;;  %v1007_v30 = vld [vmem:[%s5992_s3 + $0x90] sm:$0xff] }
 0x28d   :  { %v5123_v2 = vsel %vm1514_vm3, %v2156_v42, %v2155_v35  ;;  %v2129_v24 = vsel %vm1514_vm3, %v2128_v36, %v2127_v45  ;;  %v1092_v10 = vsel %vm92_vm0, %v1002_v25, -inf  ;;  %v965_v4 = vmax.f32 %v4985_v27, 0.0  ;;  %v1881_v25 = vpop.f32.mrf.mxu1 }
 0x28e   :  { %v846_v51 = vpop.xlane.xlu1 %845  ;;  %3114 = vmatpush.xpose.msk.msra.mxu2 %vm1642_vm11, %v6032_v20  ;;  %v5140_v23 = vpop.xlane.xlu0 %869  ;;  %v2210_v19 = vsel %vm1627_vm7, %v2129_v24, %v2209_v18  ;;  %v967_v5 = vmax.f32 %v5077_v57, 0.0  ;;  %v1020_v57 = vld [vmem:[%s5992_s3 + $0xf8] sm:$0xff]  ;;  %v1149_v47 = vsel %vm92_vm0, %v1021_v49, -inf  ;;  %v1107_v18 = vsel %vm92_vm0, %v1007_v30, -inf }
 0x28f   :  { %v864_v7 = vpop.xlane.xlu2 %863  ;;  %v962_v60 = vmax.f32 %v846_v51, 0.0  ;;  %v2211_v17 = vsel %vm1629_vm8, %v2136_v22, %v2210_v19  ;;  %v2165_v41 = vperm.slane %v965_v4, %v3764_v54  ;;  %v1146_v3 = vsel %vm92_vm0, %v1020_v57, -inf  ;;  %v1008_v20 = vld [vmem:[%s5992_s3 + $0x98] sm:$0xff]  ;;  %v1025_v19 = vld [vmem:[%s5992_s3 + $0x120] sm:$0xff]  ;;  %v1034_v57 = vld [vmem:[%s5992_s3 + $0x168] sm:$0xff] }
 0x290   :  { %v2212_v6 = vsel %vm1631_vm9, %v2143_v38, %v2211_v17  ;;  %v968_v50 = vmax.f32 %v864_v7, 0.0  ;;  %v2168_v35 = vperm.slane %v967_v5, %v3780_v0  ;;  %v1024_v4 = vld [vmem:[%s5992_s3 + $0x118] sm:$0xff] }
 0x291   :  { %v2159_v12 = vperm.slane %v962_v60, %v3794_v21  ;;  %v5152_v13 = vsel %vm1633_vm10, %v5061_v34, %v2212_v6  ;;  %v1005_v34 = vld [vmem:[%s5992_s3 + $0x80] sm:$0xff]  ;;  %v970_v6 = vmax.f32 %v5140_v23, 0.0  ;;  %v1014_v23 = vld [vmem:[%s5992_s3 + $0xc8] sm:$0xff]  ;;  %v1158_v49 = vsel %vm92_vm0, %v1024_v4, -inf }
 0x292   :  { %3115 = vmatpush.xpose.msk.msra.mxu2 %vm1642_vm11, %v6033_v56  ;;  %v1101_v42 = vsel %vm92_vm0, %v1005_v34, -inf  ;;  %v2170_v45 = vperm.slane %v968_v50, %v3784_v55  ;;  %v1027_v34 = vld [vmem:[%s5992_s3 + $0x130] sm:$0xff] }
 0x293   :  { %v2160_v37 = vsel %vm1506_vm1, %v2159_v12, %v2158_v28  ;;  %1093 = vmax.xlane.f32.xlu1 %v1092_v10  ;;  %1123 = vmax.xlane.f32.xlu0 %v1122_v58  ;;  %v1026_v28 = vld [vmem:[%s5992_s3 + $0x128] sm:$0xff]  ;;  %v1110_v10 = vsel %vm92_vm0, %v1008_v20, -inf  ;;  %v1161_v58 = vsel %vm92_vm0, %v1025_v19, -inf  ;;  %v1035_v19 = vld [vmem:[%s5992_s3 + $0x170] sm:$0xff] }
 0x294   :  { %1132 = vmax.xlane.f32.xlu2 %v1131_v9  ;;  %v1164_v17 = vsel %vm92_vm0, %v1026_v28, -inf  ;;  %v1037_v28 = vld [vmem:[%s5992_s3 + $0x180] sm:$0xff] }
 0x295   :  { %3116 = vmatmul.msk.f32.vlgmr.msra.gmra.mxu2 %vm1642_vm11, %v1664_v14  ;;  %v1029_v14 = vld [vmem:[%s5992_s3 + $0x140] sm:$0xff] }
 0x296   :  { %v849_v29 = vpop.xlane.xlu1 %848  ;;  %v879_v8 = vpop.xlane.xlu0 %878 }
 0x297   :  { %v882_v1 = vpop.xlane.xlu2 %881  ;;  %v963_v32 = vmax.f32 %v849_v29, 0.0  ;;  %v973_v15 = vmax.f32 %v879_v8, 0.0 }
 0x298   :  { %v974_v46 = vmax.f32 %v882_v1, 0.0 }
 0x299   :  { %v2161_v43 = vperm.slane %v963_v32, %v3780_v0  ;;  %v2179_v40 = vperm.slane %v973_v15, %v3764_v54  ;;  %v1173_v32 = vsel %vm92_vm0, %v1029_v14, -inf  ;;  %v1167_v15 = vsel %vm92_vm0, %v1027_v34, -inf  ;;  %v1040_v34 = vld [vmem:[%s5992_s3 + $0x198] sm:$0xff] }
 0x29a   :  { %v2180_v31 = vperm.slane %v974_v46, %v3794_v21 }
 0x29b   :  { %v2162_v39 = vsel %vm1510_vm2, %v2161_v43, %v2160_v37  ;;  %1102 = vmax.xlane.f32.xlu1 %v1101_v42  ;;  %1141 = vmax.xlane.f32.xlu0 %v1140_v11  ;;  %v1028_v43 = vld [vmem:[%s5992_s3 + $0x138] sm:$0xff] }
 0x29c   :  { %1135 = vmax.xlane.f32.xlu2 %v1134_v33  ;;  %v2181_v36 = vsel %vm1506_vm1, %v2180_v31, %v2179_v40  ;;  %v1128_v33 = vsel %vm92_vm0, %v1014_v23, -inf  ;;  %v1017_v40 = vld [vmem:[%s5992_s3 + $0xe0] sm:$0xff] }
 0x29d   :  { %3117 = vmatmul.msk.f32.gmra.mxu2 %vm1642_vm11, %v1667_v48  ;;  %v1137_v50 = vsel %vm92_vm0, %v1017_v40, -inf }
 0x29e   :  { %v858_v27 = vpop.xlane.xlu1 %857  ;;  %v885_v26 = vpop.xlane.xlu0 %884 }
 0x29f   :  { %v5181_v63 = vpop.xlane.xlu2 %890  ;;  %v966_v16 = vmax.f32 %v858_v27, 0.0  ;;  %v975_v52 = vmax.f32 %v885_v26, 0.0 }
 0x2a1   :  { %v2166_v59 = vperm.slane %v966_v16, %v3794_v21  ;;  %v2182_v61 = vperm.slane %v975_v52, %v3780_v0 }
 0x2a3   :  { %v2167_v24 = vsel %vm1506_vm1, %v2166_v59, %v2165_v41  ;;  %1108 = vmax.xlane.f32.xlu1 %v1107_v18  ;;  %1147 = vmax.xlane.f32.xlu0 %v1146_v3  ;;  %v5200_v51 = vsel %vm1510_vm2, %v2182_v61, %v2181_v36  ;;  %v1170_v36 = vsel %vm92_vm0, %v1028_v43, -inf  ;;  %v1188_v59 = vsel %vm92_vm0, %v1034_v57, -inf }
 0x2a4   :  { %1150 = vmax.xlane.f32.xlu2 %v1149_v47  ;;  %v2169_v7 = vsel %vm1510_vm2, %v2168_v35, %v2167_v24  ;;  %v1019_v35 = vld [vmem:[%s5992_s3 + $0xf0] sm:$0xff]  ;;  %v1033_v47 = vld [vmem:[%s5992_s3 + $0x160] sm:$0xff] }
 0x2a5   :  { %v2171_v44 = vsel %vm1514_vm3, %v2170_v45, %v2169_v7  ;;  %3118 = vmatmul.msk.f32.gmra.mxu2 %vm1642_vm11, %v1881_v25  ;;  %v1143_v3 = vsel %vm92_vm0, %v1019_v35, -inf  ;;  %v1185_v61 = vsel %vm92_vm0, %v1033_v47, -inf  ;;  %v1032_v47 = vld [vmem:[%s5992_s3 + $0x158] sm:$0xff] }
 0x2a6   :  { %v852_v60 = vpop.xlane.xlu1 %851  ;;  %v888_v9 = vpop.xlane.xlu0 %887 }
 0x2a7   :  { %v5207_v22 = vpop.xlane.xlu2 %896  ;;  %v964_v38 = vmax.f32 %v852_v60, 0.0  ;;  %v976_v27 = vmax.f32 %v888_v9, 0.0  ;;  %v1197_v9 = vsel %vm92_vm0, %v1037_v28, -inf }
 0x2a9   :  { %v2163_v12 = vperm.slane %v964_v38, %v3784_v55  ;;  %v2184_v41 = vperm.slane %v976_v27, %v3784_v55 }
 0x2ab   :  { %v2164_v37 = vsel %vm1514_vm3, %v2163_v12, %v2162_v39  ;;  %1111 = vmax.xlane.f32.xlu1 %v1110_v10  ;;  %1162 = vmax.xlane.f32.xlu0 %v1161_v58  ;;  %v2185_v24 = vsel %vm1514_vm3, %v2184_v41, %v5200_v51  ;;  %v1022_v51 = vld [vmem:[%s5992_s3 + $0x108] sm:$0xff]  ;;  %v1191_v12 = vsel %vm92_vm0, %v1035_v19, -inf  ;;  %v1039_v10 = vld [vmem:[%s5992_s3 + $0x190] sm:$0xff]  ;;  %v1049_v41 = vld [vmem:[%s5992_s3 + $0x1e0] sm:$0xff] }
 0x2ac   :  { %1165 = vmax.xlane.f32.xlu2 %v1164_v17  ;;  %v2214_v56 = vsel %vm1621_vm4, %v2164_v37, %v5123_v2  ;;  %v2173_v2 = vperm.slane %v970_v6, %v3794_v21  ;;  %v1152_v17 = vsel %vm92_vm0, %v1022_v51, -inf  ;;  %v1023_v37 = vld [vmem:[%s5992_s3 + $0x110] sm:$0xff] }
 0x2ad   :  { %v2215_v53 = vsel %vm1623_vm5, %v2171_v44, %v2214_v56  ;;  %v1036_v56 = vld [vmem:[%s5992_s3 + $0x178] sm:$0xff] }
 0x2ae   :  { %v867_v29 = vpop.xlane.xlu1 %866  ;;  %v5236_v46 = vpop.xlane.xlu0 %905  ;;  %v1194_v23 = vsel %vm92_vm0, %v1036_v56, -inf }
 0x2af   :  { %v5227_v1 = vpop.xlane.xlu2 %899  ;;  %v969_v62 = vmax.f32 %v867_v29, 0.0  ;;  %v1155_v29 = vsel %vm92_vm0, %v1023_v37, -inf }
 0x2b1   :  { %v2172_v8 = vperm.slane %v969_v62, %v3764_v54 }
 0x2b3   :  { %v2174_v31 = vsel %vm1506_vm1, %v2173_v2, %v2172_v8  ;;  %1129 = vmax.xlane.f32.xlu1 %v1128_v33  ;;  %1168 = vmax.xlane.f32.xlu0 %v1167_v15  ;;  %v1042_v8 = vld [vmem:[%s5992_s3 + $0x1a8] sm:$0xff]  ;;  %v1206_v15 = vsel %vm92_vm0, %v1040_v34, -inf }
 0x2b4   :  { %1174 = vmax.xlane.f32.xlu2 %v1173_v32  ;;  %v1030_v32 = vld [vmem:[%s5992_s3 + $0x148] sm:$0xff]  ;;  %v1212_v43 = vsel %vm92_vm0, %v1042_v8, -inf  ;;  %v977_v8 = vmax.f32 %v5181_v63, 0.0 }
 0x2b6   :  { %v873_v11 = vpop.xlane.xlu1 %872  ;;  %v5254_v5 = vpop.xlane.xlu0 %914 }
 0x2b7   :  { %v5246_v42 = vpop.xlane.xlu2 %917  ;;  %v971_v39 = vmax.f32 %v873_v11, 0.0  ;;  %v1046_v11 = vld [vmem:[%s5992_s3 + $0x1c8] sm:$0xff] }
 0x2b8   :  { %v986_v63 = vmax.f32 %v5246_v42, 0.0 }
 0x2b9   :  { %v2175_v48 = vperm.slane %v971_v39, %v3780_v0  ;;  %v1031_v39 = vld [vmem:[%s5992_s3 + $0x150] sm:$0xff] }
 0x2bb   :  { %v2176_v30 = vsel %vm1510_vm2, %v2175_v48, %v2174_v31  ;;  %1138 = vmax.xlane.f32.xlu1 %v1137_v50  ;;  %1159 = vmax.xlane.f32.xlu0 %v1158_v49  ;;  %v1176_v31 = vsel %vm92_vm0, %v1030_v32, -inf  ;;  %v1224_v50 = vsel %vm92_vm0, %v1046_v11, -inf  ;;  %v1179_v49 = vsel %vm92_vm0, %v1031_v39, -inf  ;;  %v1041_v11 = vld [vmem:[%s5992_s3 + $0x1a0] sm:$0xff] }
 0x2bc   :  { %1171 = vmax.xlane.f32.xlu2 %v1170_v36  ;;  %v1045_v36 = vld [vmem:[%s5992_s3 + $0x1c0] sm:$0xff] }
 0x2bd   :  { %v1221_v27 = vsel %vm92_vm0, %v1045_v36, -inf  ;;  %v2186_v36 = vperm.slane %v977_v8, %v3764_v54 }
 0x2be   :  { %v876_v26 = vpop.xlane.xlu1 %875  ;;  %v5273_v45 = vpop.xlane.xlu0 %920 }
 0x2bf   :  { %v5265_v16 = vpop.xlane.xlu2 %923  ;;  %v972_v52 = vmax.f32 %v876_v26, 0.0 }
 0x2c1   :  { %v2177_v18 = vperm.slane %v972_v52, %v3784_v55  ;;  %v1047_v52 = vld [vmem:[%s5992_s3 + $0x1d0] sm:$0xff] }
 0x2c2   :  { %v1227_v28 = vsel %vm92_vm0, %v1047_v52, -inf }
 0x2c3   :  { %v2178_v7 = vsel %vm1514_vm3, %v2177_v18, %v2176_v30  ;;  %1144 = vmax.xlane.f32.xlu1 %v1143_v3  ;;  %1186 = vmax.xlane.f32.xlu0 %v1185_v61 }
 0x2c4   :  { %1189 = vmax.xlane.f32.xlu2 %v1188_v59  ;;  %v2216_v25 = vsel %vm1625_vm6, %v2178_v7, %v2215_v53  ;;  %v1203_v53 = vsel %vm92_vm0, %v1039_v10, -inf  ;;  %v1038_v10 = vld [vmem:[%s5992_s3 + $0x188] sm:$0xff] }
 0x2c5   :  { %v5284_v44 = vsel %vm1627_vm7, %v2185_v24, %v2216_v25  ;;  %v1233_v24 = vsel %vm92_vm0, %v1049_v41, -inf  ;;  %v1182_v25 = vsel %vm92_vm0, %v1032_v47, -inf }
 0x2c6   :  { %v5291_v20 = vpop.xlane.xlu1 %893  ;;  %v1058_v38 = vpop.xlane.xlu0 %1057 }
 0x2c7   :  { %v5289_v60 = vpop.xlane.xlu2 %1066  ;;  %v1246_v30 = vmax.f32 %v1058_v38, 0.0 }
 0x2c8   :  { %v1249_v51 = vmax.f32 %v5289_v60, 0.0  ;;  %v1048_v60 = vld [vmem:[%s5992_s3 + $0x1d8] sm:$0xff] }
 0x2c9   :  { %v2286_v59 = vperm.slane %v1246_v30, %v3794_v21  ;;  %v1230_v34 = vsel %vm92_vm0, %v1048_v60, -inf  ;;  %v980_v30 = vmax.f32 %v5227_v1, 0.0 }
 0x2ca   :  { %v2292_v37 = vperm.slane %v1249_v51, %v3764_v54 }
 0x2cb   :  { %1153 = vmax.xlane.f32.xlu1 %v1152_v17  ;;  %1192 = vmax.xlane.f32.xlu0 %v1191_v12 }
 0x2cc   :  { %1198 = vmax.xlane.f32.xlu2 %v1197_v9  ;;  %v1051_v9 = vld [vmem:[%s5992_s3 + $0x1f0] sm:$0xff] }
 0x2ce   :  { %v5307_v6 = vpop.xlane.xlu1 %902  ;;  %v1061_v14 = vpop.xlane.xlu0 %1060 }
 0x2cf   :  { %v5305_v58 = vpop.xlane.xlu2 %1072  ;;  %v1247_v57 = vmax.f32 %v1061_v14, 0.0  ;;  %v981_v41 = vmax.f32 %v5307_v6, 0.0  ;;  %v2191_v6 = vperm.slane %v980_v30, %v3784_v55 }
 0x2d0   :  { %v1251_v47 = vmax.f32 %v5305_v58, 0.0 }
 0x2d1   :  { %v2288_v61 = vperm.slane %v1247_v57, %v3780_v0  ;;  %v982_v57 = vmax.f32 %v5236_v46, 0.0  ;;  %v2193_v58 = vperm.slane %v981_v41, %v3764_v54  ;;  %v1050_v41 = vld [vmem:[%s5992_s3 + $0x1e8] sm:$0xff] }
 0x2d3   :  { %1156 = vmax.xlane.f32.xlu1 %v1155_v29  ;;  %1195 = vmax.xlane.f32.xlu0 %v1194_v23  ;;  %v1200_v23 = vsel %vm92_vm0, %v1038_v10, -inf }
 0x2d4   :  { %1204 = vmax.xlane.f32.xlu2 %v1203_v53  ;;  %v1239_v53 = vsel %vm92_vm0, %v1051_v9, -inf }
 0x2d6   :  { %v5323_v62 = vpop.xlane.xlu1 %908  ;;  %v5331_v33 = vpop.xlane.xlu0 %1081 }
 0x2d7   :  { %v5321_v2 = vpop.xlane.xlu2 %1063 }
 0x2db   :  { %1177 = vmax.xlane.f32.xlu1 %v1176_v31  ;;  %1213 = vmax.xlane.f32.xlu0 %v1212_v43 }
 0x2dc   :  { %1207 = vmax.xlane.f32.xlu2 %v1206_v15  ;;  %v978_v15 = vmax.f32 %v5291_v20, 0.0 }
 0x2de   :  { %v5341_v4 = vpop.xlane.xlu1 %911  ;;  %v5349_v48 = vpop.xlane.xlu0 %1084  ;;  %v2187_v20 = vperm.slane %v978_v15, %v3794_v21 }
 0x2df   :  { %v5339_v40 = vpop.xlane.xlu2 %1090  ;;  %v984_v52 = vmax.f32 %v5341_v4, 0.0  ;;  %v988_v4 = vmax.f32 %v5265_v16, 0.0 }
 0x2e0   :  { %v2188_v46 = vsel %vm1506_vm1, %v2187_v20, %v2186_v36 }
 0x2e3   :  { %1180 = vmax.xlane.f32.xlu1 %v1179_v49  ;;  %1222 = vmax.xlane.f32.xlu0 %v1221_v27  ;;  %v985_v49 = vmax.f32 %v5254_v5, 0.0  ;;  %v1209_v27 = vsel %vm92_vm0, %v1041_v11, -inf  ;;  %v1248_v5 = vmax.f32 %v5321_v2, 0.0  ;;  %v1043_v2 = vld [vmem:[%s5992_s3 + $0x1b0] sm:$0xff] }
 0x2e4   :  { %1225 = vmax.xlane.f32.xlu2 %v1224_v50  ;;  %v979_v50 = vmax.f32 %v5207_v22, 0.0  ;;  %v983_v22 = vmax.f32 %v5323_v62, 0.0  ;;  %v1215_v16 = vsel %vm92_vm0, %v1043_v2, -inf }
 0x2e5   :  { %v2200_v1 = vperm.slane %v985_v49, %v3764_v54  ;;  %v2290_v51 = vperm.slane %v1248_v5, %v3784_v55  ;;  %v1052_v5 = vld [vmem:[%s5992_s3 + $0x1f8] sm:$0xff] }
 0x2e6   :  { %v1055_v35 = vpop.xlane.xlu1 %1054  ;;  %v5366_v3 = vpop.xlane.xlu0 %1087  ;;  %v2189_v42 = vperm.slane %v979_v50, %v3780_v0 }
 0x2e7   :  { %v5357_v26 = vpop.xlane.xlu2 %1096  ;;  %v1245_v18 = vmax.f32 %v1055_v35, 0.0  ;;  %v987_v35 = vmax.f32 %v5273_v45, 0.0  ;;  %v2194_v45 = vperm.slane %v982_v57, %v3794_v21 }
 0x2e9   :  { %v2285_v7 = vperm.slane %v1245_v18, %v3764_v54  ;;  %v2203_v18 = vperm.slane %v987_v35, %v3780_v0  ;;  %v2195_v10 = vsel %vm1506_vm1, %v2194_v45, %v2193_v58 }
 0x2eb   :  { %v2287_v19 = vsel %vm1506_vm1, %v2286_v59, %v2285_v7  ;;  %1183 = vmax.xlane.f32.xlu1 %v1182_v25  ;;  %1228 = vmax.xlane.f32.xlu0 %v1227_v28  ;;  %v2201_v59 = vperm.slane %v986_v63, %v3794_v21  ;;  %v2190_v28 = vsel %vm1510_vm2, %v2189_v42, %v2188_v46 }
 0x2ec   :  { %1234 = vmax.xlane.f32.xlu2 %v1233_v24  ;;  %v5376_v38 = vsel %vm1510_vm2, %v2288_v61, %v2287_v19  ;;  %v2295_v61 = vperm.slane %v1251_v47, %v3780_v0  ;;  %v2196_v24 = vperm.slane %v983_v22, %v3780_v0  ;;  %v2198_v19 = vperm.slane %v984_v52, %v3784_v55 }
 0x2ed   :  { %v2291_v8 = vsel %vm1514_vm3, %v2290_v51, %v5376_v38  ;;  %v1236_v22 = vsel %vm92_vm0, %v1050_v41, -inf }
 0x2ee   :  { %v1070_v12 = vpop.xlane.xlu1 %1069  ;;  %v5390_v14 = vpop.xlane.xlu0 %1105 }
 0x2ef   :  { %v5381_v17 = vpop.xlane.xlu2 %1099  ;;  %v1250_v56 = vmax.f32 %v1070_v12, 0.0  ;;  %v2202_v12 = vsel %vm1506_vm1, %v2201_v59, %v2200_v1  ;;  %v1242_v1 = vsel %vm92_vm0, %v1052_v5, -inf }
 0x2f1   :  { %v2293_v29 = vperm.slane %v1250_v56, %v3794_v21  ;;  %v2192_v56 = vsel %vm1514_vm3, %v2191_v6, %v2190_v28  ;;  %v1257_v28 = vmax.f32 %v5339_v40, 0.0 }
 0x2f2   :  { %v2218_v63 = vsel %vm1629_vm8, %v2192_v56, %v5284_v44  ;;  %v1262_v56 = vmax.f32 %v5390_v14, 0.0 }
 0x2f3   :  { %v2294_v32 = vsel %vm1506_vm1, %v2293_v29, %v2292_v37  ;;  %1201 = vmax.xlane.f32.xlu1 %v1200_v23  ;;  %1231 = vmax.xlane.f32.xlu0 %v1230_v34  ;;  %v2205_v37 = vperm.slane %v988_v4, %v3784_v55  ;;  %v2204_v23 = vsel %vm1510_vm2, %v2203_v18, %v2202_v12  ;;  %v1255_v12 = vmax.f32 %v5349_v48, 0.0 }
 0x2f4   :  { %1240 = vmax.xlane.f32.xlu2 %v1239_v53  ;;  %v2197_v53 = vsel %vm1510_vm2, %v2196_v24, %v2195_v10  ;;  %v2296_v29 = vsel %vm1510_vm2, %v2295_v61, %v2294_v32  ;;  %v1044_v32 = vld [vmem:[%s5992_s3 + $0x1b8] sm:$0xff]  ;;  %v1254_v24 = vmax.f32 %v5331_v33, 0.0  ;;  %v1256_v10 = vmax.f32 %v5366_v3, 0.0  ;;  %s3251_s3 = smov 112  }
 0x2f5   :  { %v2199_v34 = vsel %vm1514_vm3, %v2198_v19, %v2197_v53  ;;  %v2206_v38 = vsel %vm1514_vm3, %v2205_v37, %v2204_v23  ;;  %v1218_v30 = vsel %vm92_vm0, %v1044_v32, -inf  ;;  %v2306_v37 = vperm.slane %v1257_v28, %v3764_v54 }
 0x2f6   :  { %v5401_v43 = vpop.xlane.xlu1 %1078  ;;  %v5406_v39 = vpop.xlane.xlu0 %1114  ;;  %v2219_v20 = vsel %vm1631_vm9, %v2199_v34, %v2218_v63  ;;  %v2302_v3 = vperm.slane %v1255_v12, %v3780_v0  ;;  %v1260_v23 = vmax.f32 %v5381_v17, 0.0 }
 0x2f7   :  { %v5399_v31 = vpop.xlane.xlu2 %1117  ;;  %v5475_v57 = vsel %vm1633_vm10, %v2206_v38, %v2219_v20 }
 0x2f8   :  { %v1266_v33 = vmax.f32 %v5399_v31, 0.0 }
 0x2fa   :  { %v2321_v14 = vperm.slane %v1266_v33, %v3794_v21 }
 0x2fb   :  { %1210 = vmax.xlane.f32.xlu1 %v1209_v27 }
 0x2fe   :  { %v1076_v7 = vpop.xlane.xlu1 %1075  ;;  %v5438_v25 = vpop.xlane.xlu0 %1120 }
 0x2ff   :  { %v5429_v62 = vpop.xlane.xlu2 %1126  ;;  %v1252_v9 = vmax.f32 %v1076_v7, 0.0  ;;  %v1253_v7 = vmax.f32 %v5401_v43, 0.0  ;;  %v1265_v43 = vmax.f32 %v5406_v39, 0.0  ;;  %v1267_v39 = vmax.f32 %v5438_v25, 0.0 }
 0x300   :  { %v2311_v25 = vperm.slane %v1260_v23, %v3784_v55 }
 0x301   :  { %v2297_v60 = vperm.slane %v1252_v9, %v3784_v55  ;;  %v1259_v9 = vmax.f32 %v5357_v26, 0.0  ;;  %v1269_v26 = vmax.f32 %v5429_v62, 0.0  ;;  %v2320_v62 = vperm.slane %v1265_v43, %v3764_v54 }
 0x303   :  { %v2298_v15 = vsel %vm1514_vm3, %v2297_v60, %v2296_v29  ;;  %1216 = vmax.xlane.f32.xlu1 %v1215_v16  ;;  %v1884_v11 = vpop.f32.mrf.mxu1  ;;  %v2300_v16 = vperm.slane %v1254_v24, %v3794_v21  ;;  %v2299_v60 = vperm.slane %v1253_v7, %v3764_v54  ;;  %v2309_v29 = vperm.slane %v1259_v9, %v3780_v0 }
 0x304   :  { %v5457_v36 = vsel %vm1621_vm4, %v2298_v15, %v2291_v8  ;;  %3119 = vmatmul.msk.f32.gmra.mxu2 %vm1642_vm11, %v1884_v11  ;;  %v2304_v8 = vperm.slane %v1256_v10, %v3784_v55  ;;  %v2327_v17 = vperm.slane %v1269_v26, %v3764_v54 }
 0x305   :  { %v2301_v31 = vsel %vm1506_vm1, %v2300_v16, %v2299_v60 }
 0x306   :  { %v1094_v49 = vpop.xlane.xlu1 %1093  ;;  %v5469_v27 = vpop.xlane.xlu0 %1123 }
 0x307   :  { %v5460_v50 = vpop.xlane.xlu2 %1132  ;;  %2572 = vrot.lane.b32.xlu0 %v5152_v13, %s3250_s2  ;;  %v1258_v51 = vmax.f32 %v1094_v49, 0.0  ;;  %v2314_v49 = vperm.slane %v1262_v56, %v3794_v21  ;;  %v1268_v41 = vmax.f32 %v5469_v27, 0.0 }
 0x308   :  { %v1271_v11 = vmax.f32 %v5460_v50, 0.0 }
 0x309   :  { %v2307_v40 = vperm.slane %v1258_v51, %v3794_v21 }
 0x30b   :  { %1219 = vmax.xlane.f32.xlu1 %v1218_v30  ;;  %v2308_v32 = vsel %vm1506_vm1, %v2307_v40, %v2306_v37  ;;  %v2303_v30 = vsel %vm1510_vm2, %v2302_v3, %v2301_v31 }
 0x30c   :  { %2574 = vrot.lane.b32.xlu2 %v5475_v57, %s3250_s2  ;;  %v2310_v50 = vsel %vm1510_vm2, %v2309_v29, %v2308_v32  ;;  %v2305_v24 = vsel %vm1514_vm3, %v2304_v8, %v2303_v30 }
 0x30d   :  { %v2398_v51 = vsel %vm1623_vm5, %v2305_v24, %v5457_v36 }
 0x30e   :  { %v1103_v35 = vpop.xlane.xlu1 %1102  ;;  %v5484_v47 = vpop.xlane.xlu0 %1141 }
 0x30f   :  { %v5479_v44 = vpop.xlane.xlu2 %1135  ;;  %v1261_v53 = vmax.f32 %v1103_v35, 0.0 }
 0x310   :  { %v1272_v5 = vmax.f32 %v5479_v44, 0.0 }
 0x311   :  { %v2313_v38 = vperm.slane %v1261_v53, %v3764_v54 }
 0x312   :  { %v2332_v28 = vperm.slane %v1272_v5, %v3784_v55 }
 0x313   :  { %1237 = vmax.xlane.f32.xlu1 %v1236_v22  ;;  %v2323_v22 = vperm.slane %v1267_v39, %v3780_v0 }
 0x316   :  { %v1109_v52 = vpop.xlane.xlu1 %1108  ;;  %v5492_v59 = vpop.xlane.xlu0 %1147 }
 0x317   :  { %v5487_v42 = vpop.xlane.xlu2 %1150  ;;  %v1263_v34 = vmax.f32 %v1109_v52, 0.0  ;;  %v1276_v44 = vmax.f32 %v5492_v59, 0.0 }
 0x318   :  { %v1277_v53 = vmax.f32 %v5487_v42, 0.0 }
 0x319   :  { %v2316_v35 = vperm.slane %v1263_v34, %v3780_v0  ;;  %v2339_v40 = vperm.slane %v1276_v44, %v3784_v55 }
 0x31a   :  { %v2341_v31 = vperm.slane %v1277_v53, %v3764_v54 }
 0x31b   :  { %1243 = vmax.xlane.f32.xlu1 %v1242_v1  ;;  %v2322_v1 = vsel %vm1506_vm1, %v2321_v14, %v2320_v62 }
 0x31c   :  { %v2324_v7 = vsel %vm1510_vm2, %v2323_v22, %v2322_v1 }
 0x31e   :  { %v1112_v45 = vpop.xlane.xlu1 %1111  ;;  %v1163_v58 = vpop.xlane.xlu0 %1162 }
 0x31f   :  { %v1166_v46 = vpop.xlane.xlu2 %1165  ;;  %v1281_v2 = vmax.f32 %v1163_v58, 0.0  ;;  %v1264_v15 = vmax.f32 %v1112_v45, 0.0  ;;  %v2315_v58 = vsel %vm1506_vm1, %v2314_v49, %v2313_v38 }
 0x320   :  { %v1282_v6 = vmax.f32 %v1166_v46, 0.0  ;;  %v2330_v46 = vperm.slane %v1271_v11, %v3780_v0 }
 0x321   :  { %v2348_v18 = vperm.slane %v1281_v2, %v3764_v54  ;;  %v2318_v52 = vperm.slane %v1264_v15, %v3784_v55  ;;  %v2312_v2 = vsel %vm1514_vm3, %v2311_v25, %v2310_v50 }
 0x322   :  { %v2349_v4 = vperm.slane %v1282_v6, %v3794_v21  ;;  %v1274_v6 = vmax.f32 %v5484_v47, 0.0  ;;  %v2399_v59 = vsel %vm1625_vm6, %v2312_v2, %v2398_v51 }
 0x324   :  { %v5498_v61 = vsel %vm1506_vm1, %v2349_v4, %v2348_v18  ;;  %v2325_v4 = vperm.slane %v1268_v41, %v3784_v55  ;;  %v2317_v18 = vsel %vm1510_vm2, %v2316_v35, %v2315_v58 }
 0x325   :  { %v2319_v47 = vsel %vm1514_vm3, %v2318_v52, %v2317_v18 }
 0x326   :  { %v1130_v19 = vpop.xlane.xlu1 %1129  ;;  %v1169_v60 = vpop.xlane.xlu0 %1168  ;;  %v2326_v33 = vsel %vm1514_vm3, %v2325_v4, %v2324_v7  ;;  %v2400_v43 = vsel %vm1627_vm7, %v2319_v47, %v2399_v59 }
 0x327   :  { %v1270_v48 = vmax.f32 %v1130_v19, 0.0  ;;  %v2335_v19 = vperm.slane %v1274_v6, %v3794_v21  ;;  %v5555_v10 = vpop.xlane.xlu2 %1174  ;;  %v2401_v29 = vsel %vm1629_vm8, %v2326_v33, %v2400_v43  ;;  %v1283_v39 = vmax.f32 %v1169_v60, 0.0 }
 0x328   :  { %v1285_v60 = vmax.f32 %v5555_v10, 0.0 }
 0x329   :  { %v2328_v20 = vperm.slane %v1270_v48, %v3794_v21  ;;  %v2351_v32 = vperm.slane %v1283_v39, %v3780_v0 }
 0x32b   :  { %v2329_v27 = vsel %vm1506_vm1, %v2328_v20, %v2327_v17  ;;  %v2352_v20 = vsel %vm1510_vm2, %v2351_v32, %v5498_v61  ;;  %v5595_v61 = vld [vmem:[%s5993_s6] sm:$0xff]  ;;  %s3252_s6 = smov 104  }
 0x32c   :  { %v2331_v9 = vsel %vm1510_vm2, %v2330_v46, %v2329_v27 }
 0x32d   :  { %v2333_v56 = vsel %vm1514_vm3, %v2332_v28, %v2331_v9 }
 0x32e   :  { %v1139_v63 = vpop.xlane.xlu1 %1138  ;;  %v2402_v23 = vsel %vm1631_vm9, %v2333_v56, %v2401_v29  ;;  %v1160_v14 = vpop.xlane.xlu0 %1159 }
 0x32f   :  { %v1273_v45 = vmax.f32 %v1139_v63, 0.0  ;;  %v1172_v42 = vpop.xlane.xlu2 %1171  ;;  %v1280_v49 = vmax.f32 %v1160_v14, 0.0 }
 0x330   :  { %v1284_v11 = vmax.f32 %v1172_v42, 0.0 }
 0x331   :  { %v2334_v12 = vperm.slane %v1273_v45, %v3764_v54  ;;  %v2346_v30 = vperm.slane %v1280_v49, %v3784_v55 }
 0x332   :  { %v2353_v17 = vperm.slane %v1284_v11, %v3784_v55 }
 0x333   :  { %v2336_v26 = vsel %vm1506_vm1, %v2335_v19, %v2334_v12 }
 0x334   :  { %v2354_v35 = vsel %vm1514_vm3, %v2353_v17, %v2352_v20 }
 0x336   :  { %v1145_v16 = vpop.xlane.xlu1 %1144  ;;  %v1187_v50 = vpop.xlane.xlu0 %1186 }
 0x337   :  { %v1275_v37 = vmax.f32 %v1145_v16, 0.0  ;;  %v1190_v52 = vpop.xlane.xlu2 %1189  ;;  %v1289_v9 = vmax.f32 %v1187_v50, 0.0 }
 0x338   :  { %v1290_v19 = vmax.f32 %v1190_v52, 0.0 }
 0x339   :  { %v2337_v36 = vperm.slane %v1275_v37, %v3780_v0  ;;  %v2362_v59 = vperm.slane %v1289_v9, %v3764_v54 }
 0x33a   :  { %v2363_v16 = vperm.slane %v1290_v19, %v3794_v21 }
 0x33b   :  { %v2338_v48 = vsel %vm1510_vm2, %v2337_v36, %v2336_v26 }
 0x33c   :  { %v2340_v3 = vsel %vm1514_vm3, %v2339_v40, %v2338_v48  ;;  %v2364_v48 = vsel %vm1506_vm1, %v2363_v16, %v2362_v59 }
 0x33d   :  { %v5569_v34 = vsel %vm1633_vm10, %v2340_v3, %v2402_v23  ;;  %v2355_v23 = vperm.slane %v1285_v60, %v3764_v54 }
 0x33e   :  { %v1154_v8 = vpop.xlane.xlu1 %1153  ;;  %2576 = vrot.lane.b32.xlu0 %v5569_v34, %s3250_s2  ;;  %v1193_v6 = vpop.xlane.xlu0 %1192 }
 0x33f   :  { %v1278_v15 = vmax.f32 %v1154_v8, 0.0  ;;  %v1199_v58 = vpop.xlane.xlu2 %1198  ;;  %v1291_v12 = vmax.f32 %v1193_v6, 0.0 }
 0x340   :  { %v1293_v37 = vmax.f32 %v1199_v58, 0.0 }
 0x341   :  { %v2342_v62 = vperm.slane %v1278_v15, %v3794_v21  ;;  %v2365_v56 = vperm.slane %v1291_v12, %v3780_v0 }
 0x342   :  { %v2369_v8 = vperm.slane %v1293_v37, %v3764_v54 }
 0x343   :  { %v2343_v63 = vsel %vm1506_vm1, %v2342_v62, %v2341_v31  ;;  %v2366_v62 = vsel %vm1510_vm2, %v2365_v56, %v2364_v48 }
 0x346   :  { %v1157_v38 = vpop.xlane.xlu1 %1156  ;;  %2741 = vrot.lane.b32.xlu0 %v5152_v13, %s3251_s3  ;;  %v1196_v2 = vpop.xlane.xlu0 %1195 }
 0x347   :  { %v1279_v25 = vmax.f32 %v1157_v38, 0.0  ;;  %v1205_v4 = vpop.xlane.xlu2 %1204  ;;  %v1292_v31 = vmax.f32 %v1196_v2, 0.0 }
 0x348   :  { %v1295_v29 = vmax.f32 %v1205_v4, 0.0 }
 0x349   :  { %v2344_v41 = vperm.slane %v1279_v25, %v3780_v0  ;;  %v2367_v20 = vperm.slane %v1292_v31, %v3784_v55 }
 0x34b   :  { %v2345_v22 = vsel %vm1510_vm2, %v2344_v41, %v2343_v63  ;;  %v2372_v63 = vperm.slane %v1295_v29, %v3780_v0 }
 0x34c   :  { %v2347_v5 = vsel %vm1514_vm3, %v2346_v30, %v2345_v22 }
 0x34d   :  { %v5588_v1 = vsel %vm1621_vm4, %v2354_v35, %v2347_v5 }
 0x34e   :  { %v1178_v46 = vpop.xlane.xlu1 %1177  ;;  %2743 = vrot.lane.b32.xlu0 %v5475_v57, %s3251_s3  ;;  %v1214_v44 = vpop.xlane.xlu0 %1213 }
 0x34f   :  { %v1208_v24 = vpop.xlane.xlu2 %1207  ;;  %v1286_v43 = vmax.f32 %v1178_v46, 0.0  ;;  %v1298_v39 = vmax.f32 %v1214_v44, 0.0 }
 0x350   :  { %v1296_v49 = vmax.f32 %v1208_v24, 0.0 }
 0x351   :  { %v2356_v10 = vperm.slane %v1286_v43, %v3794_v21  ;;  %v2377_v25 = vperm.slane %v1298_v39, %v3794_v21 }
 0x352   :  { %v2374_v2 = vperm.slane %v1296_v49, %v3784_v55 }
 0x353   :  { %v2357_v35 = vsel %vm1506_vm1, %v2356_v10, %v2355_v23 }
 0x355   :  { %1398 = vxpose.xlu1.b32.start.end [1/1] (short) (narrow) %v5595_v61, 8 }
 0x356   :  { %v1181_v45 = vpop.xlane.xlu1 %1180  ;;  %2745 = vrot.lane.b32.xlu0 %v5569_v34, %s3251_s3  ;;  %v1223_v28 = vpop.xlane.xlu0 %1222 }
 0x357   :  { %v1226_v47 = vpop.xlane.xlu2 %1225  ;;  %v1287_v26 = vmax.f32 %v1181_v45, 0.0  ;;  %v1301_v42 = vmax.f32 %v1223_v28, 0.0 }
 0x358   :  { %v1302_v15 = vmax.f32 %v1226_v47, 0.0 }
 0x359   :  { %v2358_v11 = vperm.slane %v1287_v26, %v3780_v0  ;;  %v2383_v22 = vperm.slane %v1301_v42, %v3764_v54 }
 0x35a   :  { %v2384_v50 = vperm.slane %v1302_v15, %v3794_v21 }
 0x35b   :  { %v2359_v46 = vsel %vm1510_vm2, %v2358_v11, %v2357_v35 }
 0x35c   :  { %v2385_v19 = vsel %vm1506_vm1, %v2384_v50, %v2383_v22 }
 0x35e   :  { %v1184_v27 = vpop.xlane.xlu1 %1183  ;;  %v1229_v33 = vpop.xlane.xlu0 %1228 }
 0x35f   :  { %v1235_v53 = vpop.xlane.xlu2 %1234  ;;  %v1288_v3 = vmax.f32 %v1184_v27, 0.0  ;;  %v1303_v30 = vmax.f32 %v1229_v33, 0.0 }
 0x360   :  { %v1305_v6 = vmax.f32 %v1235_v53, 0.0 }
 0x361   :  { %v2360_v17 = vperm.slane %v1288_v3, %v3784_v55  ;;  %v2386_v28 = vperm.slane %v1303_v30, %v3780_v0 }
 0x362   :  { %v2390_v12 = vperm.slane %v1305_v6, %v3764_v54 }
 0x363   :  { %v2361_v4 = vsel %vm1514_vm3, %v2360_v17, %v2359_v46 }
 0x364   :  { %v2405_v16 = vsel %vm1623_vm5, %v2361_v4, %v5588_v1 }
 0x366   :  { %v1202_v18 = vpop.xlane.xlu1 %1201  ;;  %v1232_v58 = vpop.xlane.xlu0 %1231 }
 0x367   :  { %v1294_v40 = vmax.f32 %v1202_v18, 0.0  ;;  %v1304_v18 = vmax.f32 %v1232_v58, 0.0  ;;  %v1241_v24 = vpop.xlane.xlu2 %1240 }
 0x368   :  { %v1307_v9 = vmax.f32 %v1241_v24, 0.0 }
 0x369   :  { %v2370_v14 = vperm.slane %v1294_v40, %v3794_v21  ;;  %v2388_v33 = vperm.slane %v1304_v18, %v3784_v55  ;;  %v2387_v40 = vsel %vm1510_vm2, %v2386_v28, %v2385_v19 }
 0x36a   :  { %v2393_v26 = vperm.slane %v1307_v9, %v3780_v0 }
 0x36b   :  { %v2371_v5 = vsel %vm1506_vm1, %v2370_v14, %v2369_v8  ;;  %v2389_v29 = vsel %vm1514_vm3, %v2388_v33, %v2387_v40 }
 0x36e   :  { %v1211_v7 = vpop.xlane.xlu1 %1210 }
 0x36f   :  { %v1297_v32 = vmax.f32 %v1211_v7, 0.0  ;;  %v2373_v7 = vsel %vm1510_vm2, %v2372_v63, %v2371_v5  ;;  %v2575_v22 = vpop.permute.xlu2 %2574 }
 0x370   :  { %v2375_v37 = vsel %vm1514_vm3, %v2374_v2, %v2373_v7 }
 0x371   :  { %v2376_v45 = vperm.slane %v1297_v32, %v3764_v54 }
 0x373   :  { %v2378_v59 = vsel %vm1506_vm1, %v2377_v25, %v2376_v45 }
 0x376   :  { %v1217_v51 = vpop.xlane.xlu1 %1216 }
 0x377   :  { %v1299_v38 = vmax.f32 %v1217_v51, 0.0  ;;  %v2368_v51 = vsel %vm1514_vm3, %v2367_v20, %v2366_v62 }
 0x378   :  { %v2406_v56 = vsel %vm1625_vm6, %v2368_v51, %v2405_v16 }
 0x379   :  { %v2379_v44 = vperm.slane %v1299_v38, %v3780_v0  ;;  %v2407_v1 = vsel %vm1627_vm7, %v2375_v37, %v2406_v56  ;;  %v2573_v25 = vpop.permute.xlu0 %2572 }
 0x37b   :  { %v2380_v43 = vsel %vm1510_vm2, %v2379_v44, %v2378_v59 }
 0x37e   :  { %v1220_v36 = vpop.xlane.xlu1 %1219 }
 0x37f   :  { %v1300_v41 = vmax.f32 %v1220_v36, 0.0 }
 0x381   :  { %v2381_v47 = vperm.slane %v1300_v41, %v3784_v55 }
 0x383   :  { %v2382_v36 = vsel %vm1514_vm3, %v2381_v47, %v2380_v43 }
 0x384   :  { %v2408_v3 = vsel %vm1629_vm8, %v2382_v36, %v2407_v1 }
 0x385   :  { %v2409_v39 = vsel %vm1631_vm9, %v2389_v29, %v2408_v3 }
 0x386   :  { %v1238_v52 = vpop.xlane.xlu1 %1237 }
 0x387   :  { %v1306_v27 = vmax.f32 %v1238_v52, 0.0 }
 0x389   :  { %v2391_v60 = vperm.slane %v1306_v27, %v3794_v21 }
 0x38b   :  { %v2392_v48 = vsel %vm1506_vm1, %v2391_v60, %v2390_v12  ;;  %vm3094_vm1 = vcmp.eq.s32.totalorder %v3764_v54, 0 }
 0x38c   :  { %v2394_v8 = vsel %vm1510_vm2, %v2393_v26, %v2392_v48  ;;  %vm3098_vm2 = vcmask 8192  }
 0x38e   :  { %v1244_v53 = vpop.xlane.xlu1 %1243 }
 0x38f   :  { %v1308_v21 = vmax.f32 %v1244_v53, 0.0 }
 0x391   :  { %v2395_v23 = vperm.slane %v1308_v21, %v3784_v55  ;;  %v5665_v55 = vpop.f32.mrf.mxu2 }
 0x392   :  { %v1941_v42 = vsel %vm1928_vm12, %v5665_v55, -inf  ;;  %v1929_v32 = vsel %vm1928_vm12, %v5665_v55, inf }
 0x393   :  { %v2396_v31 = vsel %vm1514_vm3, %v2395_v23, %v2394_v8  ;;  %v6034_v8 = vlaneseq }
 0x394   :  { %v5650_v0 = vsel %vm1633_vm10, %v2396_v31, %v2409_v39 }
 0x395   :  { %2747 = vrot.lane.b32.xlu0 %v5650_v0, %s3251_s3  ;;  %2578 = vrot.lane.b32.xlu2 %v5650_v0, %s3250_s2  ;;  %v1433_v31 = vshrl.u32 %v6034_v8, 7 }
 0x396   :  { %3124 = vmatpush.xpose.msk.msrb.mxu0 %vm92_vm0, %v5650_v0 }
 0x397   :  { %vm5729_vm14 = vcmp.eq.s32.totalorder %v1433_v31, %v3764_v54 }
 0x399   :  { %v5668_v10 = vpop.f32.mrf.mxu2 }
 0x39a   :  { %3125 = vmatpush.xpose.msk.msrb.mxu0 %vm92_vm0, %v5569_v34  ;;  %v1942_v15 = vsel %vm1928_vm12, %v5668_v10, -inf  ;;  %v1930_v11 = vsel %vm1928_vm12, %v5668_v10, inf }
 0x39b   :  { %v1943_v14 = vmax.f32 %v1941_v42, %v1942_v15  ;;  %v1931_v63 = vmin.f32 %v1929_v32, %v1930_v11  ;;  %v1434_v15 = vadd.s32 8, %v1433_v31 }
 0x39d   :  { %2910 = vrot.lane.b32.xlu2 %v5152_v13, %s3252_s6  ;;  %vm5734_vm15 = vcmp.eq.s32.totalorder %v1434_v15, %v3764_v54 }
 0x39e   :  { %3126 = vmatpush.xpose.msk.msrb.mxu0 %vm92_vm0, %v5475_v57 }
 0x3a1   :  { %v5676_v62 = vpop.f32.mrf.mxu2 }
 0x3a2   :  { %3127 = vmatpush.xpose.msk.msrb.mxu0 %vm92_vm0, %v5152_v13  ;;  %v1974_v38 = vsel %vm1961_vm13, %v5676_v62, -inf  ;;  %v1962_v41 = vsel %vm1961_vm13, %v5676_v62, inf }
 0x3a5   :  { %2912 = vrot.lane.b32.xlu2 %v5475_v57, %s3252_s6 }
 0x3a9   :  { %v5682_v49 = vpop.f32.mrf.mxu2 }
 0x3aa   :  { %v1975_v17 = vsel %vm1961_vm13, %v5682_v49, -inf  ;;  %v1963_v30 = vsel %vm1961_vm13, %v5682_v49, inf }
 0x3ab   :  { %v1976_v20 = vmax.f32 %v1974_v38, %v1975_v17  ;;  %v1964_v35 = vmin.f32 %v1962_v41, %v1963_v30 }
 0x3ad   :  { %2914 = vrot.lane.b32.xlu2 %v5569_v34, %s3252_s6 }
 0x3b0   :  { %v2577_v50 = vpop.permute.xlu0 %2576 }
 0x3b5   :  { %1944 = vmax.xlane.f32.xlu1 %v1943_v14  ;;  %2916 = vrot.lane.b32.xlu2 %v5650_v0, %s3252_s6 }
 0x3b8   :  { %v2742_v5 = vpop.permute.xlu0 %2741 }
 0x3bf   :  { %1932 = vmin.xlane.f32.xlu0 %v1931_v63 }
 0x3c0   :  { %v2744_v46 = vpop.permute.xlu0 %2743 }
 0x3c7   :  { %1977 = vmax.xlane.f32.xlu0 %v1976_v20 }
 0x3c8   :  { %v2746_v2 = vpop.permute.xlu0 %2745 }
 0x3de   :  { %1965 = vmin.xlane.f32.xlu2 %v1964_v35 }
 0x3ef   :  { %v2579_v52 = vpop.permute.xlu2 %2578 }
 0x3f7   :  { %v2911_v6 = vpop.permute.xlu2 %2910 }
 0x3f9   :  { %v1414_v45 = vpop.trf.xlu1 }
 0x3fa   :  { %v1430_v58 = vadd.f32 %v1414_v45, %v5595_v61 }
 0x3fc   :  { %v1431_v27 = vmul.f32 0.5, %v1430_v58 }
 0x3fe   :  { %2434 = vmatpush.msrb.mxu2 %v1431_v27  ;;  %3176 = vmatpush.msra.mxu3 %v1431_v27 }
 0x3ff   :  { %2603 = vmatpush.msrb.mxu1 %v1431_v27  ;;  %3120 = vmatmul.msk.f32.vlgmr.msrb.gmra.mxu2 %vm92_vm0, %v5152_v13  ;;  %v2913_v4 = vpop.permute.xlu2 %2912 }
 0x400   :  { %3121 = vmatmul.msk.f32.vlgmr.msra.gmra.mxu3 %vm92_vm0, %v5475_v57  ;;  %2772 = vmatpush.msra.mxu2 %v1431_v27 }
 0x401   :  { %3138 = vmatpush.xpose.msk.msrb.mxu3 %vm92_vm0, %v2579_v52  ;;  %2941 = vmatpush.msra.mxu1 %v1431_v27 }
 0x402   :  { %3134 = vmatmul.msk.f32.vlgmr.msrb.gmra.mxu1 %vm92_vm0, %v2573_v25 }
 0x405   :  { %3139 = vmatpush.xpose.msk.msrb.mxu3 %vm92_vm0, %v2577_v50 }
 0x407   :  { %v2915_v61 = vpop.permute.xlu2 %2914  ;;  %3148 = vmatmul.msk.f32.vlgmr.msra.gmra.mxu2 %vm92_vm0, %v2742_v5  ;;  %v2748_v18 = vpop.permute.xlu0 %2747 }
 0x408   :  { %3122 = vmatmul.msk.f32.gmra.mxu3 %vm92_vm0, %v5569_v34  ;;  %3152 = vmatpush.xpose.msk.msra.mxu0 %vm92_vm0, %v2748_v18 }
 0x409   :  { %3140 = vmatpush.xpose.msk.msrb.mxu3 %vm92_vm0, %v2575_v22 }
 0x40a   :  { %3135 = vmatmul.msk.f32.gmra.mxu1 %vm92_vm0, %v2575_v22 }
 0x40c   :  { %3153 = vmatpush.xpose.msk.msra.mxu0 %vm92_vm0, %v2746_v2 }
 0x40d   :  { %3141 = vmatpush.xpose.msk.msrb.mxu3 %vm92_vm0, %v2573_v25 }
 0x40f   :  { %v2917_v13 = vpop.permute.xlu2 %2916  ;;  %3149 = vmatmul.msk.f32.gmra.mxu2 %vm92_vm0, %v2744_v46 }
 0x410   :  { %3123 = vmatmul.msk.f32.gmra.mxu3 %vm92_vm0, %v5650_v0  ;;  %3154 = vmatpush.xpose.msk.msra.mxu0 %vm92_vm0, %v2744_v46 }
 0x411   :  { %3166 = vmatpush.xpose.msk.msra.mxu3 %vm92_vm0, %v2917_v13 }
 0x412   :  { %3136 = vmatmul.msk.f32.gmra.mxu1 %vm92_vm0, %v2577_v50 }
 0x414   :  { %3155 = vmatpush.xpose.msk.msra.mxu0 %vm92_vm0, %v2742_v5 }
 0x415   :  { %3167 = vmatpush.xpose.msk.msra.mxu3 %vm92_vm0, %v2915_v61 }
 0x417   :  { %3150 = vmatmul.msk.f32.gmra.mxu2 %vm92_vm0, %v2746_v2 }
 0x419   :  { %3168 = vmatpush.xpose.msk.msra.mxu3 %vm92_vm0, %v2913_v4 }
 0x41a   :  { %3137 = vmatmul.msk.f32.gmra.mxu1 %vm92_vm0, %v2579_v52 }
 0x41d   :  { %3169 = vmatpush.xpose.msk.msra.mxu3 %vm92_vm0, %v2911_v6 }
 0x41f   :  { %3151 = vmatmul.msk.f32.gmra.mxu2 %vm92_vm0, %v2748_v18 }
 0x422   :  { %3162 = vmatmul.msk.f32.vlgmr.msra.gmra.mxu1 %vm92_vm0, %v2911_v6 }
 0x428   :  { %v1945_v57 = vpop.xlane.xlu1 %1944 }
 0x429   :  { %v1946_v34 = vrot.slane %v1945_v57, 4 }
 0x42a   :  { %3163 = vmatmul.msk.f32.gmra.mxu1 %vm92_vm0, %v2913_v4 }
 0x42b   :  { %v1947_v44 = vmax.f32 %v1945_v57, %v1946_v34 }
 0x42d   :  { %v1948_v24 = vrot.slane %v1947_v44, 2 }
 0x42f   :  { %v1949_v51 = vmax.f32 %v1947_v44, %v1948_v24 }
 0x431   :  { %v1950_v12 = vrot.slane %v1949_v51, 1 }
 0x432   :  { %3164 = vmatmul.msk.f32.gmra.mxu1 %vm92_vm0, %v2915_v61  ;;  %v1933_v7 = vpop.xlane.xlu0 %1932 }
 0x433   :  { %v1934_v28 = vrot.slane %v1933_v7, 4  ;;  %v1951_v60 = vmax.f32 %v1949_v51, %v1950_v12 }
 0x435   :  { %v1935_v47 = vmin.f32 %v1933_v7, %v1934_v28 }
 0x437   :  { %v1936_v19 = vrot.slane %v1935_v47, 2 }
 0x439   :  { %v1937_v9 = vmin.f32 %v1935_v47, %v1936_v19 }
 0x43a   :  { %3165 = vmatmul.msk.f32.gmra.mxu1 %vm92_vm0, %v2917_v13  ;;  %v1978_v37 = vpop.xlane.xlu0 %1977 }
 0x43b   :  { %v1938_v16 = vrot.slane %v1937_v9, 1  ;;  %v1979_v33 = vrot.slane %v1978_v37, 4 }
 0x43d   :  { %v1939_v59 = vmin.f32 %v1937_v9, %v1938_v16  ;;  %v1980_v43 = vmax.f32 %v1978_v37, %v1979_v33 }
 0x43f   :  { %3177 = vpush %v1939_v59  ;;  %v1981_v40 = vrot.slane %v1980_v43, 2 }
 0x440   :  { %3179 = vpush %v1951_v60 }
 0x441   :  { %v1982_v53 = vmax.f32 %v1980_v43, %v1981_v40 }
 0x443   :  { %v1983_v21 = vrot.slane %v1982_v53, 1 }
 0x445   :  { %v1984_v23 = vmax.f32 %v1982_v53, %v1983_v21 }
 0x451   :  { %v1966_v36 = vpop.xlane.xlu2 %1965 }
 0x452   :  { %v1967_v56 = vrot.slane %v1966_v36, 4 }
 0x454   :  { %v1968_v26 = vmin.f32 %v1966_v36, %v1967_v56 }
 0x456   :  { %v1969_v1 = vrot.slane %v1968_v26, 2 }
 0x458   :  { %v1970_v48 = vmin.f32 %v1968_v26, %v1969_v1 }
 0x45a   :  { %v1971_v29 = vrot.slane %v1970_v48, 1 }
 0x45c   :  { %v1972_v3 = vmin.f32 %v1970_v48, %v1971_v29 }
 0x45e   :  { %3181 = vpush %v1972_v3 }
 0x45f   :  { %3183 = vpush %v1984_v23 }
 0x470   :  { %s3178_s1 = spop %3177 }
 0x471   :  { %s3180_s30 = spop %3179  ;;  %v1956_v0 = vstv %s3178_s1 }
 0x472   :  { %s1953_s5 = ssub.f32 %s3180_s30, %s3178_s1  ;;  %v1957_v42 = vsub.f32 %v5665_v55, %v1956_v0  ;;  %v1958_v14 = vsub.f32 %v5668_v10, %v1956_v0 }
 0x474   :  { %v1954_v39 = vstv %s1953_s5 }
 0x475   :  { %3228 = vrcp.f32 %v1954_v39 }
 0x47b   :  { %v3229_v11 = vpop.eup %3228 }
 0x47c   :  { %v5738_v17 = vmul.f32 %v3229_v11, %v1957_v42  ;;  %v5740_v38 = vmul.f32 %v3229_v11, %v1958_v14 }
 0x47e   :  { %v1994_v55 = vsel %vm5729_vm14, 1.0, %v5738_v17  ;;  %v1995_v10 = vsel %vm5734_vm15, 1.0, %v5740_v38 }
 0x47f   :  { %v2605_v20 = vpop.f32.mrf.mxu1  ;;  %1996 = vst.msk [vmem:[%s5994_s7] sm:$0xff] %vm1928_vm12, %v1994_v55 }
 0x480   :  { %3142 = vmatmul.msk.f32.vlgmr.msrb.gmra.mxu3 %vm92_vm0, %v2605_v20  ;;  %1997 = vst.msk [vmem:[%s5994_s7 + $0x8] sm:$0xff] %vm1928_vm12, %v1995_v10 }
 0x482   :  { %v2436_v25 = vpop.f32.mrf.mxu2 }
 0x483   :  { %3128 = vmatmul.msk.f32.vlgmr.msrb.gmra.mxu0 %vm92_vm0, %v2436_v25  ;;  %v2439_v30 = vpop.f32.mrf.mxu3 }
 0x487   :  { %v2608_v41 = vpop.f32.mrf.mxu1 }
 0x488   :  { %3143 = vmatmul.msk.f32.gmra.mxu3 %vm92_vm0, %v2608_v41 }
 0x48a   :  { %v2774_v4 = vpop.f32.mrf.mxu2 }
 0x48b   :  { %3129 = vmatmul.msk.f32.gmra.mxu0 %vm92_vm0, %v2439_v30  ;;  %v2442_v50 = vpop.f32.mrf.mxu3 }
 0x48f   :  { %v2611_v35 = vpop.f32.mrf.mxu1  ;;  %s3182_s12 = spop %3181 }
 0x490   :  { %3144 = vmatmul.msk.f32.gmra.mxu3 %vm92_vm0, %v2611_v35  ;;  %s3184_s13 = spop %3183  ;;  %v1989_v5 = vstv %s3182_s12 }
 0x491   :  { %s1986_s14 = ssub.f32 %s3184_s13, %s3182_s12  ;;  %v1990_v46 = vsub.f32 %v5676_v62, %v1989_v5  ;;  %v1991_v6 = vsub.f32 %v5682_v49, %v1989_v5 }
 0x492   :  { %v2777_v18 = vpop.f32.mrf.mxu2 }
 0x493   :  { %v1987_v22 = vstv %s1986_s14  ;;  %3130 = vmatmul.msk.f32.gmra.mxu0 %vm92_vm0, %v2442_v50  ;;  %v2445_v58 = vpop.f32.mrf.mxu3 }
 0x494   :  { %3230 = vrcp.f32 %v1987_v22 }
 0x497   :  { %v2614_v52 = vpop.f32.mrf.mxu1 }
 0x498   :  { %3145 = vmatmul.msk.f32.gmra.mxu3 %vm92_vm0, %v2614_v52 }
 0x49a   :  { %v3231_v45 = vpop.eup %3230  ;;  %v2780_v13 = vpop.f32.mrf.mxu2 }
 0x49b   :  { %3131 = vmatmul.msk.f32.gmra.mxu0 %vm92_vm0, %v2445_v58  ;;  %v1993_v27 = vmul.f32 %v3231_v45, %v1991_v6  ;;  %v1992_v2 = vmul.f32 %v3231_v45, %v1990_v46 }
 0x49d   :  { %2002 = vrot.lane.b32.xlu0 %v1993_v27, %s3251_s3  ;;  %2000 = vrot.lane.b32.xlu2 %v1992_v2, %s3251_s3 }
 0x49f   :  { %v2943_v61 = vpop.f32.mrf.mxu1 }
 0x4a0   :  { %3170 = vmatmul.msk.f32.vlgmr.msra.gmra.mxu3 %vm92_vm0, %v2943_v61 }
 0x4a2   :  { %v2783_v34 = vpop.f32.mrf.mxu2 }
 0x4a3   :  { %3156 = vmatmul.msk.f32.vlgmr.msra.gmra.mxu0 %vm92_vm0, %v2774_v4 }
 0x4a7   :  { %v2946_v62 = vpop.f32.mrf.mxu1 }
 0x4a8   :  { %3171 = vmatmul.msk.f32.gmra.mxu3 %vm92_vm0, %v2946_v62 }
 0x4ab   :  { %3157 = vmatmul.msk.f32.gmra.mxu0 %vm92_vm0, %v2777_v18 }
 0x4af   :  { %v2949_v49 = vpop.f32.mrf.mxu1 }
 0x4b0   :  { %3172 = vmatmul.msk.f32.gmra.mxu3 %vm92_vm0, %v2949_v49 }
 0x4b3   :  { %3158 = vmatmul.msk.f32.gmra.mxu0 %vm92_vm0, %v2780_v13 }
 0x4b7   :  { %v2952_v57 = vpop.f32.mrf.mxu1 }
 0x4b8   :  { %3173 = vmatmul.msk.f32.gmra.mxu3 %vm92_vm0, %v2952_v57 }
 0x4bb   :  { %3159 = vmatmul.msk.f32.gmra.mxu0 %vm92_vm0, %v2783_v34 }
 0x4f7   :  { %v2001_v28 = vpop.permute.xlu2 %2000 }
 0x4f8   :  { %v2006_v60 = vsub.f32 %v5738_v17, %v2001_v28 }
 0x4fa   :  { %v2008_v43 = vand.u32 2147483647, %v2006_v60 }
 0x4fc   :  { %v2010_v48 = vsel %vm1928_vm12, %v2008_v43, 0.0 }
 0x500   :  { %v5776_v44 = vpop.f32.mrf.mxu0 }
 0x501   :  { %v2489_v47 = vsel %vm1928_vm12, %v5776_v44, inf  ;;  %v2501_v51 = vsel %vm1928_vm12, %v5776_v44, -inf }
 0x503   :  { %v5778_v24 = vpop.f32.mrf.mxu3 }
 0x504   :  { %v2658_v56 = vsel %vm1928_vm12, %v5778_v24, inf  ;;  %v2670_v10 = vsel %vm1928_vm12, %v5778_v24, -inf }
 0x508   :  { %v5780_v7 = vpop.f32.mrf.mxu0 }
 0x509   :  { %v2490_v19 = vsel %vm1928_vm12, %v5780_v7, inf  ;;  %v2502_v9 = vsel %vm1928_vm12, %v5780_v7, -inf }
 0x50a   :  { %v2503_v12 = vmax.f32 %v2501_v51, %v2502_v9  ;;  %v2491_v16 = vmin.f32 %v2489_v47, %v2490_v19 }
 0x50b   :  { %v5790_v59 = vpop.f32.mrf.mxu3 }
 0x50c   :  { %2504 = vmax.xlane.f32.xlu1 %v2503_v12  ;;  %2492 = vmin.xlane.f32.xlu0 %v2491_v16  ;;  %v2659_v37 = vsel %vm1928_vm12, %v5790_v59, inf }
 0x50d   :  { %v2660_v53 = vmin.f32 %v2658_v56, %v2659_v37  ;;  %v3253_v56 = vmov 256.0  }
 0x50e   :  { %3232 = vrcp.f32 %v3253_v56 }
 0x50f   :  { %v2003_v33 = vpop.permute.xlu0 %2002 }
 0x510   :  { %v2007_v40 = vsub.f32 %v5740_v38, %v2003_v33  ;;  %v5796_v36 = vpop.f32.mrf.mxu0  ;;  %v2671_v38 = vsel %vm1928_vm12, %v5790_v59, -inf }
 0x511   :  { %v2521_v23 = vsel %vm1961_vm13, %v5796_v36, inf  ;;  %v2533_v15 = vsel %vm1961_vm13, %v5796_v36, -inf  ;;  %v2672_v25 = vmax.f32 %v2670_v10, %v2671_v38 }
 0x512   :  { %v2009_v26 = vand.u32 2147483647, %v2007_v40 }
 0x513   :  { %v5800_v1 = vpop.f32.mrf.mxu3 }
 0x514   :  { %v2011_v21 = vsel %vm1928_vm12, %v2009_v26, 0.0  ;;  %2661 = vmin.xlane.f32.xlu0 %v2660_v53  ;;  %v2702_v42 = vsel %vm1961_vm13, %v5800_v1, -inf  ;;  %v2690_v41 = vsel %vm1961_vm13, %v5800_v1, inf }
 0x515   :  { %v2012_v29 = vadd.f32 %v2011_v21, %v2010_v48  ;;  %v3233_v48 = vpop.eup %3232 }
 0x516   :  { %vm2027_vm0 = vweird.f32 %v3233_v48 }
 0x517   :  { %2013 = vadd.xlane.f32.xlu2 %v2012_v29 }
 0x518   :  { %v5804_v3 = vpop.f32.mrf.mxu0 }
 0x519   :  { %v2522_v8 = vsel %vm1961_vm13, %v5804_v3, inf  ;;  %v2534_v31 = vsel %vm1961_vm13, %v5804_v3, -inf }
 0x51a   :  { %v2523_v39 = vmin.f32 %v2521_v23, %v2522_v8  ;;  %v2535_v17 = vmax.f32 %v2533_v15, %v2534_v31  ;;  %v2023_v23 = vmul.f32 256.0, %v3233_v48 }
 0x51b   :  { %v5812_v0 = vpop.f32.mrf.mxu3 }
 0x51c   :  { %v2703_v14 = vsel %vm1961_vm13, %v5812_v0, -inf  ;;  %2524 = vmin.xlane.f32.xlu1 %v2523_v39  ;;  %v2691_v20 = vsel %vm1961_vm13, %v5812_v0, inf  ;;  %v2024_v15 = vsub.f32 1.0, %v2023_v23 }
 0x51d   :  { %v2704_v11 = vmax.f32 %v2702_v42, %v2703_v14  ;;  %v2692_v35 = vmin.f32 %v2690_v41, %v2691_v20 }
 0x51e   :  { %v2025_v20 = vmul.f32 %v3233_v48, %v2024_v15 }
 0x51f   :  { %2705 = vmax.xlane.f32.xlu0 %v2704_v11  ;;  %2536 = vmax.xlane.f32.xlu2 %v2535_v17 }
 0x520   :  { %v5822_v55 = vpop.f32.mrf.mxu0 }
 0x521   :  { %v2827_v22 = vsel %vm1928_vm12, %v5822_v55, inf  ;;  %v2839_v45 = vsel %vm1928_vm12, %v5822_v55, -inf }
 0x523   :  { %v5828_v30 = vpop.f32.mrf.mxu3 }
 0x524   :  { %2673 = vmax.xlane.f32.xlu1 %v2672_v25  ;;  %v2996_v61 = vsel %vm1928_vm12, %v5828_v30, inf  ;;  %v3008_v37 = vsel %vm1928_vm12, %v5828_v30, -inf }
 0x527   :  { %2693 = vmin.xlane.f32.xlu2 %v2692_v35 }
 0x528   :  { %v5832_v50 = vpop.f32.mrf.mxu0 }
 0x529   :  { %v2828_v5 = vsel %vm1928_vm12, %v5832_v50, inf  ;;  %v2840_v52 = vsel %vm1928_vm12, %v5832_v50, -inf }
 0x52a   :  { %v2829_v46 = vmin.f32 %v2827_v22, %v2828_v5  ;;  %v2841_v58 = vmax.f32 %v2839_v45, %v2840_v52  ;;  %v2026_v45 = vadd.f32 %v3233_v48, %v2025_v20 }
 0x52b   :  { %v5840_v6 = vpop.f32.mrf.mxu3 }
 0x52c   :  { %2830 = vmin.xlane.f32.xlu1 %v2829_v46  ;;  %v2997_v2 = vsel %vm1928_vm12, %v5840_v6, inf  ;;  %v3009_v16 = vsel %vm1928_vm12, %v5840_v6, -inf }
 0x52d   :  { %v2998_v18 = vmin.f32 %v2996_v61, %v2997_v2  ;;  %v3010_v40 = vmax.f32 %v3008_v37, %v3009_v16 }
 0x52f   :  { %2842 = vmax.xlane.f32.xlu2 %v2841_v58 }
 0x530   :  { %v5844_v27 = vpop.f32.mrf.mxu0 }
 0x531   :  { %v2859_v49 = vsel %vm1961_vm13, %v5844_v27, inf  ;;  %v2871_v13 = vsel %vm1961_vm13, %v5844_v27, -inf }
 0x533   :  { %v5848_v4 = vpop.f32.mrf.mxu3 }
 0x534   :  { %v3040_v19 = vsel %vm1961_vm13, %v5848_v4, -inf  ;;  %v3028_v33 = vsel %vm1961_vm13, %v5848_v4, inf }
 0x537   :  { %2999 = vmin.xlane.f32.xlu2 %v2998_v18 }
 0x538   :  { %v5852_v62 = vpop.f32.mrf.mxu0 }
 0x539   :  { %v2860_v57 = vsel %vm1961_vm13, %v5852_v62, inf  ;;  %v2872_v34 = vsel %vm1961_vm13, %v5852_v62, -inf }
 0x53a   :  { %v2861_v28 = vmin.f32 %v2859_v49, %v2860_v57  ;;  %v2873_v47 = vmax.f32 %v2871_v13, %v2872_v34 }
 0x53b   :  { %v5862_v51 = vpop.f32.mrf.mxu3 }
 0x53c   :  { %v3041_v9 = vsel %vm1961_vm13, %v5862_v51, -inf  ;;  %2874 = vmax.xlane.f32.xlu1 %v2873_v47  ;;  %2862 = vmin.xlane.f32.xlu0 %v2861_v28  ;;  %v3029_v60 = vsel %vm1961_vm13, %v5862_v51, inf }
 0x53d   :  { %v3042_v12 = vmax.f32 %v3040_v19, %v3041_v9  ;;  %v3030_v43 = vmin.f32 %v3028_v33, %v3029_v60 }
 0x53f   :  { %3043 = vmax.xlane.f32.xlu2 %v3042_v12  ;;  %v2028_v12 = vsel %vm2027_vm0, %v3233_v48, %v2026_v45 }
 0x544   :  { %3031 = vmin.xlane.f32.xlu1 %v3030_v43  ;;  %3011 = vmax.xlane.f32.xlu0 %v3010_v40 }
 0x57f   :  { %v2493_v26 = vpop.xlane.xlu0 %2492  ;;  %v2505_v53 = vpop.xlane.xlu1 %2504 }
 0x580   :  { %v2494_v21 = vrot.slane %v2493_v26, 4  ;;  %v2506_v29 = vrot.slane %v2505_v53, 4 }
 0x582   :  { %v2495_v8 = vmin.f32 %v2493_v26, %v2494_v21  ;;  %v2507_v39 = vmax.f32 %v2505_v53, %v2506_v29 }
 0x584   :  { %v2496_v11 = vrot.slane %v2495_v8, 2  ;;  %v2508_v38 = vrot.slane %v2507_v39, 2 }
 0x586   :  { %v2497_v22 = vmin.f32 %v2495_v8, %v2496_v11  ;;  %v2509_v52 = vmax.f32 %v2507_v39, %v2508_v38 }
 0x587   :  { %v2662_v31 = vpop.xlane.xlu0 %2661 }
 0x588   :  { %v2663_v42 = vrot.slane %v2662_v31, 4  ;;  %v2498_v34 = vrot.slane %v2497_v22, 1  ;;  %v2510_v47 = vrot.slane %v2509_v52, 1 }
 0x58a   :  { %v2014_v14 = vpop.xlane.xlu2 %2013  ;;  %v2664_v25 = vmin.f32 %v2662_v31, %v2663_v42  ;;  %v2499_v43 = vmin.f32 %v2497_v22, %v2498_v34  ;;  %v2511_v56 = vmax.f32 %v2509_v52, %v2510_v47 }
 0x58b   :  { %v2015_v17 = vrot.slane %v2014_v14, 4 }
 0x58c   :  { %v2665_v58 = vrot.slane %v2664_v25, 2 }
 0x58d   :  { %v2016_v10 = vadd.f32 %v2015_v17, %v2014_v14 }
 0x58e   :  { %v2666_v37 = vmin.f32 %v2664_v25, %v2665_v58 }
 0x58f   :  { %v2017_v41 = vrot.slane %v2016_v10, 2  ;;  %v2525_v35 = vpop.xlane.xlu1 %2524 }
 0x590   :  { %v2526_v5 = vrot.slane %v2525_v35, 4  ;;  %v2667_v39 = vrot.slane %v2666_v37, 1 }
 0x591   :  { %v2018_v46 = vadd.f32 %v2017_v41, %v2016_v10 }
 0x592   :  { %v2527_v2 = vmin.f32 %v2525_v35, %v2526_v5  ;;  %v2706_v61 = vpop.xlane.xlu0 %2705  ;;  %v2537_v18 = vpop.xlane.xlu2 %2536  ;;  %v2668_v17 = vmin.f32 %v2666_v37, %v2667_v39 }
 0x593   :  { %v2707_v49 = vrot.slane %v2706_v61, 4  ;;  %v2538_v13 = vrot.slane %v2537_v18, 4  ;;  %v2019_v57 = vrot.slane %v2018_v46, 1 }
 0x594   :  { %v2528_v28 = vrot.slane %v2527_v2, 2 }
 0x595   :  { %v2539_v19 = vmax.f32 %v2537_v18, %v2538_v13  ;;  %v2020_v9 = vadd.f32 %v2019_v57, %v2018_v46  ;;  %v2708_v16 = vmax.f32 %v2706_v61, %v2707_v49 }
 0x596   :  { %v2529_v60 = vmin.f32 %v2527_v2, %v2528_v28 }
 0x597   :  { %v2540_v33 = vrot.slane %v2539_v19, 2  ;;  %3185 = vpush %v2020_v9  ;;  %v2674_v40 = vpop.xlane.xlu1 %2673  ;;  %v2709_v29 = vrot.slane %v2708_v16, 2 }
 0x598   :  { %3187 = vpush %v2028_v12  ;;  %v2675_v26 = vrot.slane %v2674_v40, 4  ;;  %v2530_v53 = vrot.slane %v2529_v60, 1 }
 0x599   :  { %3189 = vpush %v2499_v43  ;;  %v2541_v21 = vmax.f32 %v2539_v19, %v2540_v33  ;;  %v2710_v10 = vmax.f32 %v2708_v16, %v2709_v29 }
 0x59a   :  { %3191 = vpush %v2511_v56  ;;  %v2676_v23 = vmax.f32 %v2674_v40, %v2675_v26  ;;  %v2694_v8 = vpop.xlane.xlu2 %2693  ;;  %v2531_v31 = vmin.f32 %v2529_v60, %v2530_v53 }
 0x59b   :  { %v2695_v48 = vrot.slane %v2694_v8, 4  ;;  %v2542_v15 = vrot.slane %v2541_v21, 1  ;;  %v2711_v45 = vrot.slane %v2710_v10, 1 }
 0x59c   :  { %v2677_v42 = vrot.slane %v2676_v23, 2  ;;  %3193 = vpush %v2531_v31 }
 0x59d   :  { %v2696_v14 = vmin.f32 %v2694_v8, %v2695_v48  ;;  %v2543_v11 = vmax.f32 %v2541_v21, %v2542_v15  ;;  %v2712_v13 = vmax.f32 %v2710_v10, %v2711_v45 }
 0x59e   :  { %v2678_v38 = vmax.f32 %v2676_v23, %v2677_v42 }
 0x59f   :  { %v2697_v20 = vrot.slane %v2696_v14, 2  ;;  %3195 = vpush %v2543_v11  ;;  %v2831_v25 = vpop.xlane.xlu1 %2830 }
 0x5a0   :  { %3197 = vpush %v2668_v17  ;;  %v2832_v41 = vrot.slane %v2831_v25, 4  ;;  %v2679_v35 = vrot.slane %v2678_v38, 1 }
 0x5a1   :  { %v2698_v22 = vmin.f32 %v2696_v14, %v2697_v20 }
 0x5a2   :  { %v2833_v5 = vmin.f32 %v2831_v25, %v2832_v41  ;;  %v2843_v52 = vpop.xlane.xlu2 %2842  ;;  %v2680_v46 = vmax.f32 %v2678_v38, %v2679_v35 }
 0x5a3   :  { %v2844_v58 = vrot.slane %v2843_v52, 4  ;;  %v2699_v2 = vrot.slane %v2698_v22, 1 }
 0x5a4   :  { %v2834_v61 = vrot.slane %v2833_v5, 2  ;;  %3199 = vpush %v2680_v46 }
 0x5a5   :  { %v2845_v18 = vmax.f32 %v2843_v52, %v2844_v58  ;;  %v2700_v49 = vmin.f32 %v2698_v22, %v2699_v2 }
 0x5a6   :  { %v2835_v57 = vmin.f32 %v2833_v5, %v2834_v61 }
 0x5a7   :  { %v2846_v34 = vrot.slane %v2845_v18, 2  ;;  %3201 = vpush %v2700_v49 }
 0x5a8   :  { %3203 = vpush %v2712_v13  ;;  %v2836_v28 = vrot.slane %v2835_v57, 1 }
 0x5a9   :  { %v2847_v47 = vmax.f32 %v2845_v18, %v2846_v34 }
 0x5aa   :  { %v3000_v19 = vpop.xlane.xlu2 %2999  ;;  %v2837_v9 = vmin.f32 %v2835_v57, %v2836_v28 }
 0x5ab   :  { %v3001_v12 = vrot.slane %v3000_v19, 4  ;;  %v2848_v16 = vrot.slane %v2847_v47, 1 }
 0x5ac   :  { %3205 = vpush %v2837_v9 }
 0x5ad   :  { %v3002_v60 = vmin.f32 %v3000_v19, %v3001_v12  ;;  %v2849_v37 = vmax.f32 %v2847_v47, %v2848_v16 }
 0x5af   :  { %v3003_v33 = vrot.slane %v3002_v60, 2  ;;  %3207 = vpush %v2849_v37  ;;  %v2875_v43 = vpop.xlane.xlu1 %2874  ;;  %v2863_v40 = vpop.xlane.xlu0 %2862 }
 0x5b0   :  { %v2876_v56 = vrot.slane %v2875_v43, 4  ;;  %v2864_v26 = vrot.slane %v2863_v40, 4 }
 0x5b1   :  { %v3004_v8 = vmin.f32 %v3002_v60, %v3003_v33 }
 0x5b2   :  { %v2877_v53 = vmax.f32 %v2875_v43, %v2876_v56  ;;  %v2865_v21 = vmin.f32 %v2863_v40, %v2864_v26  ;;  %v3044_v29 = vpop.xlane.xlu2 %3043 }
 0x5b3   :  { %v3045_v23 = vrot.slane %v3044_v29, 4  ;;  %v3005_v38 = vrot.slane %v3004_v8, 1 }
 0x5b4   :  { %v2878_v31 = vrot.slane %v2877_v53, 2  ;;  %v2866_v39 = vrot.slane %v2865_v21, 2 }
 0x5b5   :  { %v3046_v48 = vmax.f32 %v3044_v29, %v3045_v23  ;;  %v3006_v58 = vmin.f32 %v3004_v8, %v3005_v38 }
 0x5b6   :  { %v2867_v15 = vmin.f32 %v2865_v21, %v2866_v39  ;;  %v2879_v42 = vmax.f32 %v2877_v53, %v2878_v31 }
 0x5b7   :  { %v3047_v14 = vrot.slane %v3046_v48, 2  ;;  %v3032_v11 = vpop.xlane.xlu1 %3031  ;;  %v3012_v17 = vpop.xlane.xlu0 %3011 }
 0x5b8   :  { %v3033_v10 = vrot.slane %v3032_v11, 4  ;;  %v3013_v20 = vrot.slane %v3012_v17, 4  ;;  %v2868_v25 = vrot.slane %v2867_v15, 1  ;;  %v2880_v41 = vrot.slane %v2879_v42, 1 }
 0x5b9   :  { %v3048_v2 = vmax.f32 %v3046_v48, %v3047_v14 }
 0x5ba   :  { %v3034_v35 = vmin.f32 %v3032_v11, %v3033_v10  ;;  %v3014_v22 = vmax.f32 %v3012_v17, %v3013_v20  ;;  %v2869_v5 = vmin.f32 %v2867_v15, %v2868_v25  ;;  %v2881_v52 = vmax.f32 %v2879_v42, %v2880_v41 }
 0x5bb   :  { %v3049_v57 = vrot.slane %v3048_v2, 1 }
 0x5bc   :  { %v3035_v46 = vrot.slane %v3034_v35, 2  ;;  %v3015_v45 = vrot.slane %v3014_v22, 2  ;;  %3209 = vpush %v2869_v5 }
 0x5bd   :  { %3211 = vpush %v2881_v52  ;;  %v3050_v47 = vmax.f32 %v3048_v2, %v3049_v57 }
 0x5be   :  { %3213 = vpush %v3006_v58  ;;  %v3016_v61 = vmax.f32 %v3014_v22, %v3015_v45  ;;  %v3036_v18 = vmin.f32 %v3034_v35, %v3035_v46 }
 0x5c0   :  { %v3017_v49 = vrot.slane %v3016_v61, 1  ;;  %v3037_v13 = vrot.slane %v3036_v18, 1 }
 0x5c2   :  { %v3018_v34 = vmax.f32 %v3016_v61, %v3017_v49  ;;  %v3038_v28 = vmin.f32 %v3036_v18, %v3037_v13 }
 0x5c4   :  { %3215 = vpush %v3018_v34 }
 0x5c5   :  { %3217 = vpush %v3038_v28 }
 0x5c6   :  { %3219 = vpush %v3050_v47 }
 0x5c8   :  { %s5876_s15 = spop %3185 }
 0x5c9   :  { %s5878_s16 = spop %3187 }
 0x5ca   :  { %s2030_s17 = smul.f32 %s5878_s16, %s5876_s15  ;;  %s3190_s18 = spop %3189 }
 0x5cb   :  { %s3192_s19 = spop %3191  ;;  %v2516_v9 = vstv %s3190_s18 }
 0x5cc   :  { %s2513_s20 = ssub.f32 %s3192_s19, %s3190_s18  ;;  %v2517_v16 = vsub.f32 %v5776_v44, %v2516_v9  ;;  %v2518_v60 = vsub.f32 %v5780_v7, %v2516_v9  ;;  %v3095_v32 = vstv %s2030_s17 }
 0x5cd   :  { %s3194_s0 = spop %3193 }
 0x5ce   :  { %v2514_v19 = vstv %s2513_s20  ;;  %v2548_v33 = vstv %s3194_s0 }
 0x5cf   :  { %3234 = vrcp.f32 %v2514_v19  ;;  %v2549_v7 = vsub.f32 %v5796_v36, %v2548_v33  ;;  %v2550_v53 = vsub.f32 %v5804_v3, %v2548_v33 }
 0x5d0   :  { %s3196_s21 = spop %3195 }
 0x5d1   :  { %s2545_s22 = ssub.f32 %s3196_s21, %s3194_s0  ;;  %s3198_s23 = spop %3197 }
 0x5d2   :  { %v2685_v29 = vstv %s3198_s23 }
 0x5d3   :  { %v2546_v12 = vstv %s2545_s22  ;;  %v2686_v3 = vsub.f32 %v5778_v24, %v2685_v29  ;;  %v2687_v31 = vsub.f32 %v5790_v59, %v2685_v29 }
 0x5d4   :  { %3236 = vrcp.f32 %v2546_v12 }
 0x5d5   :  { %v3235_v37 = vpop.eup %3234  ;;  %s3200_s2 = spop %3199 }
 0x5d6   :  { %s2682_s24 = ssub.f32 %s3200_s2, %s3198_s23  ;;  %v5884_v43 = vmul.f32 %v3235_v37, %v2518_v60  ;;  %v5886_v40 = vmul.f32 %v3235_v37, %v2517_v16 }
 0x5d8   :  { %v2683_v56 = vstv %s2682_s24  ;;  %s3202_s25 = spop %3201  ;;  %v2554_v26 = vsel %vm5734_vm15, 1.0, %v5884_v43  ;;  %v2553_v44 = vsel %vm5729_vm14, 1.0, %v5886_v40 }
 0x5d9   :  { %3238 = vrcp.f32 %v2683_v56  ;;  %s3204_s26 = spop %3203  ;;  %3133 = vst.msk [vmem:[%s5994_s7 + $0x18] sm:$0xff] %vm1928_vm12, %v2554_v26  ;;  %v2717_v48 = vstv %s3202_s25 }
 0x5da   :  { %v3237_v21 = vpop.eup %3236  ;;  %s2714_s29 = ssub.f32 %s3204_s26, %s3202_s25  ;;  %3132 = vst.msk [vmem:[%s5994_s7 + $0x10] sm:$0xff] %vm1928_vm12, %v2553_v44  ;;  %v2718_v14 = vsub.f32 %v5800_v1, %v2717_v48  ;;  %v2719_v11 = vsub.f32 %v5812_v0, %v2717_v48 }
 0x5db   :  { %v2552_v23 = vmul.f32 %v3237_v21, %v2550_v53  ;;  %v2551_v8 = vmul.f32 %v3237_v21, %v2549_v7 }
 0x5dc   :  { %v2715_v36 = vstv %s2714_s29 }
 0x5dd   :  { %3240 = vrcp.f32 %v2715_v36  ;;  %2562 = vrot.lane.b32.xlu1 %v2552_v23, %s3251_s3  ;;  %2560 = vrot.lane.b32.xlu0 %v2551_v8, %s3251_s3  ;;  %s3206_s30 = spop %3205 }
 0x5de   :  { %v2854_v0 = vstv %s3206_s30 }
 0x5df   :  { %v3239_v39 = vpop.eup %3238  ;;  %v2855_v20 = vsub.f32 %v5822_v55, %v2854_v0  ;;  %v2856_v25 = vsub.f32 %v5832_v50, %v2854_v0 }
 0x5e0   :  { %s3208_s5 = spop %3207  ;;  %v5908_v15 = vmul.f32 %v3239_v39, %v2686_v3  ;;  %v5910_v42 = vmul.f32 %v3239_v39, %v2687_v31 }
 0x5e1   :  { %s2851_s9 = ssub.f32 %s3208_s5, %s3206_s30 }
 0x5e2   :  { %v2722_v17 = vsel %vm5729_vm14, 1.0, %v5908_v15  ;;  %v2723_v24 = vsel %vm5734_vm15, 1.0, %v5910_v42 }
 0x5e3   :  { %v3241_v59 = vpop.eup %3240  ;;  %v2852_v38 = vstv %s2851_s9  ;;  %3146 = vst.msk [vmem:[%s5994_s7 + $0x20] sm:$0xff] %vm1928_vm12, %v2722_v17 }
 0x5e4   :  { %3242 = vrcp.f32 %v2852_v38  ;;  %v2721_v10 = vmul.f32 %v3241_v59, %v2719_v11  ;;  %v2720_v1 = vmul.f32 %v3241_v59, %v2718_v14  ;;  %3147 = vst.msk [vmem:[%s5994_s7 + $0x28] sm:$0xff] %vm1928_vm12, %v2723_v24 }
 0x5e6   :  { %2731 = vrot.lane.b32.xlu0 %v2721_v10, %s3251_s3  ;;  %2729 = vrot.lane.b32.xlu2 %v2720_v1, %s3251_s3 }
 0x5ea   :  { %v3243_v41 = vpop.eup %3242 }
 0x5eb   :  { %v5932_v35 = vmul.f32 %v3243_v41, %v2856_v25  ;;  %v2857_v22 = vmul.f32 %v3243_v41, %v2855_v20 }
 0x5ed   :  { %s3210_s13 = spop %3209  ;;  %v2892_v5 = vsel %vm5734_vm15, 1.0, %v5932_v35  ;;  %v2891_v52 = vsel %vm5729_vm14, 1.0, %v2857_v22 }
 0x5ee   :  { %s3212_s14 = spop %3211  ;;  %3161 = vst.msk [vmem:[%s5994_s7 + $0x38] sm:$0xff] %vm1928_vm12, %v2892_v5  ;;  %v2886_v50 = vstv %s3210_s13 }
 0x5ef   :  { %s2883_s20 = ssub.f32 %s3212_s14, %s3210_s13  ;;  %3160 = vst.msk [vmem:[%s5994_s7 + $0x30] sm:$0xff] %vm1928_vm12, %v2891_v52  ;;  %s3214_s22 = spop %3213  ;;  %v2887_v46 = vsub.f32 %v5844_v27, %v2886_v50  ;;  %v2888_v45 = vsub.f32 %v5852_v62, %v2886_v50 }
 0x5f0   :  { %v3023_v13 = vstv %s3214_s22 }
 0x5f1   :  { %v2884_v55 = vstv %s2883_s20  ;;  %v3024_v34 = vsub.f32 %v5828_v30, %v3023_v13  ;;  %v3025_v27 = vsub.f32 %v5840_v6, %v3023_v13 }
 0x5f2   :  { %3244 = vrcp.f32 %v2884_v55 }
 0x5f5   :  { %s3216_s23 = spop %3215 }
 0x5f6   :  { %s3020_s2 = ssub.f32 %s3216_s23, %s3214_s22  ;;  %s3218_s24 = spop %3217 }
 0x5f7   :  { %s3220_s25 = spop %3219  ;;  %v3055_v57 = vstv %s3218_s24 }
 0x5f8   :  { %v3245_v58 = vpop.eup %3244  ;;  %v3021_v2 = vstv %s3020_s2  ;;  %s3052_s26 = ssub.f32 %s3220_s25, %s3218_s24  ;;  %v3056_v28 = vsub.f32 %v5848_v4, %v3055_v57  ;;  %v3057_v47 = vsub.f32 %v5862_v51, %v3055_v57 }
 0x5f9   :  { %3246 = vrcp.f32 %v3021_v2  ;;  %v2890_v61 = vmul.f32 %v3245_v58, %v2888_v45  ;;  %v2889_v18 = vmul.f32 %v3245_v58, %v2887_v46 }
 0x5fa   :  { %v3053_v49 = vstv %s3052_s26 }
 0x5fb   :  { %3248 = vrcp.f32 %v3053_v49  ;;  %2900 = vrot.lane.b32.xlu1 %v2890_v61, %s3251_s3  ;;  %2898 = vrot.lane.b32.xlu0 %v2889_v18, %s3251_s3 }
 0x5ff   :  { %v3247_v62 = vpop.eup %3246 }
 0x600   :  { %v3026_v19 = vmul.f32 %v3247_v62, %v3024_v34  ;;  %v3027_v9 = vmul.f32 %v3247_v62, %v3025_v27 }
 0x601   :  { %v3249_v12 = vpop.eup %3248 }
 0x602   :  { %v3059_v16 = vmul.f32 %v3249_v12, %v3057_v47  ;;  %v3058_v60 = vmul.f32 %v3249_v12, %v3056_v28  ;;  %v3060_v37 = vsel %vm5729_vm14, 1.0, %v3026_v19  ;;  %v3061_v33 = vsel %vm5734_vm15, 1.0, %v3027_v9 }
 0x603   :  { %3174 = vst.msk [vmem:[%s5994_s7 + $0x40] sm:$0xff] %vm1928_vm12, %v3060_v37 }
 0x604   :  { %3069 = vrot.lane.b32.xlu0 %v3059_v16, %s3251_s3  ;;  %3067 = vrot.lane.b32.xlu2 %v3058_v60, %s3251_s3  ;;  %3175 = vst.msk [vmem:[%s5994_s7 + $0x48] sm:$0xff] %vm1928_vm12, %v3061_v33 }
 0x640   :  { %v2730_v4 = vpop.permute.xlu2 %2729 }
 0x641   :  { %v2735_v26 = vsub.f32 %v5908_v15, %v2730_v4 }
 0x643   :  { %v2737_v23 = vand.u32 2147483647, %v2735_v26 }
 0x64f   :  { %v2561_v30 = vpop.permute.xlu0 %2560  ;;  %v2563_v51 = vpop.permute.xlu1 %2562 }
 0x650   :  { %v2566_v56 = vsub.f32 %v5886_v40, %v2561_v30  ;;  %v2567_v3 = vsub.f32 %v5884_v43, %v2563_v51 }
 0x652   :  { %v2568_v44 = vand.u32 2147483647, %v2566_v56  ;;  %v2569_v40 = vand.u32 2147483647, %v2567_v3 }
 0x654   :  { %v2739_v31 = vadd.f32 %v2737_v23, %v2568_v44 }
 0x658   :  { %v2732_v6 = vpop.permute.xlu0 %2731 }
 0x659   :  { %v2736_v8 = vsub.f32 %v5910_v42, %v2732_v6 }
 0x65b   :  { %v2738_v14 = vand.u32 2147483647, %v2736_v8 }
 0x65d   :  { %v2740_v59 = vadd.f32 %v2738_v14, %v2569_v40 }
 0x65e   :  { %v3068_v53 = vpop.permute.xlu2 %3067 }
 0x65f   :  { %v3073_v39 = vsub.f32 %v3026_v19, %v3068_v53 }
 0x661   :  { %v3075_v17 = vand.u32 2147483647, %v3073_v39 }
 0x66d   :  { %v2899_v7 = vpop.permute.xlu0 %2898  ;;  %v2901_v21 = vpop.permute.xlu1 %2900 }
 0x66e   :  { %v2904_v29 = vsub.f32 %v2857_v22, %v2899_v7  ;;  %v2905_v48 = vsub.f32 %v5932_v35, %v2901_v21 }
 0x670   :  { %v2906_v36 = vand.u32 2147483647, %v2904_v29  ;;  %v2907_v15 = vand.u32 2147483647, %v2905_v48 }
 0x672   :  { %v2908_v11 = vadd.f32 %v2906_v36, %v2739_v31  ;;  %v2909_v1 = vadd.f32 %v2907_v15, %v2740_v59 }
 0x674   :  { %v3077_v38 = vadd.f32 %v3075_v17, %v2908_v11 }
 0x676   :  { %v3070_v24 = vpop.permute.xlu0 %3069  ;;  %v3079_v42 = vsel %vm5729_vm14, 0.0, %v3077_v38 }
 0x677   :  { %v3074_v10 = vsub.f32 %v3027_v9, %v3070_v24  ;;  %v3081_v25 = vsel %vm1928_vm12, %v3079_v42, 0.0 }
 0x679   :  { %v3076_v0 = vand.u32 2147483647, %v3074_v10 }
 0x67b   :  { %v3078_v20 = vadd.f32 %v3076_v0, %v2909_v1 }
 0x67d   :  { %v3080_v43 = vsel %vm5734_vm15, 0.0, %v3078_v20 }
 0x67e   :  { %v3082_v41 = vsel %vm1928_vm12, %v3080_v43, 0.0 }
 0x67f   :  { %v3083_v35 = vadd.f32 %v3082_v41, %v3081_v25 }
 0x681   :  { %3084 = vadd.xlane.f32.xlu1 %v3083_v35 }
 0x6f4   :  { %v3085_v22 = vpop.xlane.xlu1 %3084 }
 0x6f5   :  { %v3086_v5 = vrot.slane %v3085_v22, 4 }
 0x6f7   :  { %v3087_v52 = vadd.f32 %v3086_v5, %v3085_v22 }
 0x6f9   :  { %v3088_v55 = vrot.slane %v3087_v52, 2 }
 0x6fb   :  { %v3089_v50 = vadd.f32 %v3088_v55, %v3087_v52 }
 0x6fd   :  { %v3090_v46 = vrot.slane %v3089_v50, 1 }
 0x6ff   :  { %v3091_v45 = vadd.f32 %v3090_v46, %v3089_v50 }
 0x701   :  { %3221 = vpush %v3091_v45 }
 0x732   :  { %s3222_s7 = spop %3221 }
 0x733   :  { %s3093_s3 = smul.f32 0.0009765625, %s3222_s7 }
 0x735   :  { %v3096_v63 = vstv %s3093_s3 }
 0x736   :  { %v3097_v58 = vsel %vm3094_vm1, %v3095_v32, %v3096_v63 }
 0x737   :  { %3099 = vst.msk [vmem:[%s5995_s8] sm:$0x1] %vm3098_vm2, %v3097_v58 }

</bundles_post_ra>
